<compile_context>
chip_gen: v7x
topology: tpu7x:2x2x1
jax: 0.10.0
libtpu: 0.0.40
codegen_flags: <defaults>
</compile_context>

<pallas_src>
import functools

import jax
import jax.numpy as jnp
from jax.experimental import pallas as pl
from jax.experimental.pallas import tpu as pltpu


# ----------------------------------------------------------------- device tuning
def _device_kind():
    try:
        return jax.devices()[0].device_kind.lower()
    except Exception:  # pragma: no cover
        return ""


_KIND = _device_kind()
# bf16 tanh for the (B, P, A) attention intermediate only where VPU/EUP are
# bf16-native (v6e / v7x); keep f32 on v5e (no bf16 VPU/EUP) and unknown chips.
_ATTN_BF16 = ("v6" in _KIND) or ("v7" in _KIND)
# Per-generation scoped-VMEM budget (128 MiB physical on v5e/v6e, 64 MiB on v7x).
if "v7" in _KIND:
    _VMEM_LIMIT = 48 * 1024 * 1024
elif ("v5" in _KIND) or ("v6" in _KIND):
    _VMEM_LIMIT = 100 * 1024 * 1024
else:
    _VMEM_LIMIT = None


# ----------------------------------------------------------------- shared step math
def _pack_alpha_beta(alpha, beta, width):
    """Pack alpha into lanes [0, P) and beta into lane P of a lane-dense (B, width)
    slab.  Uses an exact 0/1 selection matmul (and an iota mask for beta) instead of
    an unaligned lane concatenation; the result feeds one full-width unmasked store."""
    bsz, p = alpha.shape
    sel = (jax.lax.broadcasted_iota(jnp.int32, (p, width), 0)
           == jax.lax.broadcasted_iota(jnp.int32, (p, width), 1)).astype(jnp.float32)
    placed = jnp.dot(alpha, sel, preferred_element_type=jnp.float32)      # (B, width)
    beta_lane = (jax.lax.broadcasted_iota(jnp.int32, (1, width), 1)
                 == p).astype(jnp.float32)
    return placed + beta * beta_lane


def _step_math(x, h_prev, c_prev, sp_ref, cnnp_ref,
               wx_ref, wh_ref, bg_ref,
               wdec_ref, wsen_ref, watt_ref, wfc_ref, bfc_ref,
               *, H, attn_bf16):
    """One decoding timestep: fused LSTMCell + Sentinal gates, AdaptiveAttention and
    the vocab projection.  x is bf16; h/c are carried in f32."""
    # ---- fused gates: [i, f, g, o, sentinel] in two wide bf16 matmuls (f32 acc) ----
    gx = (jnp.dot(x, wx_ref[...], preferred_element_type=jnp.float32)
          + jnp.dot(h_prev.astype(jnp.bfloat16), wh_ref[...],
                    preferred_element_type=jnp.float32)
          + bg_ref[...])                                                   # (B, 5H)
    i_g = jax.nn.sigmoid(gx[:, 0 * H:1 * H])
    f_g = jax.nn.sigmoid(gx[:, 1 * H:2 * H])
    g_g = jnp.tanh(gx[:, 2 * H:3 * H])
    o_g = jax.nn.sigmoid(gx[:, 3 * H:4 * H])
    gt = jax.nn.sigmoid(gx[:, 4 * H:5 * H])                                # Sentinal gate

    c_new = f_g * c_prev + i_g * g_g
    tanh_c = jnp.tanh(c_new)
    h_new = o_g * tanh_c
    st = gt * tanh_c                                                       # (B, H)

    # ---- AdaptiveAttention (spatial @ W_cnn hoisted into the prologue -> cnnp) ----
    w_att = watt_ref[...]                                                  # (1, A)
    dec_out = jnp.dot(h_new.astype(jnp.bfloat16), wdec_ref[...],
                      preferred_element_type=jnp.float32)                  # (B, A)
    pre = cnnp_ref[...] + dec_out[:, None, :]                              # (B, P, A)
    if attn_bf16:
        add = jnp.tanh(pre.astype(jnp.bfloat16)).astype(jnp.float32)
    else:
        add = jnp.tanh(pre)
    zt = jnp.sum(add * w_att[None, :, :], axis=-1)                         # (B, P)

    # alpha = softmax(zt) over pixels (exact division; alphas sum to 1).
    m_z = jnp.max(zt, axis=1, keepdims=True)
    e_z = jnp.exp(zt - m_z)
    sum_z = jnp.sum(e_z, axis=1, keepdims=True)
    alpha = e_z / sum_z                                                    # (B, P)
    ct = jnp.sum(sp_ref[...] * alpha[:, :, None], axis=1)                  # (B, H)

    sen = jnp.dot(st.astype(jnp.bfloat16), wsen_ref[...],
                  preferred_element_type=jnp.float32)                      # (B, A)
    out = jnp.sum(jnp.tanh(dec_out + sen) * w_att, axis=-1, keepdims=True)  # (B, 1)

    # beta = last element of softmax over concat([zt, out]); reuse the alpha exp-sum.
    m_c = jnp.maximum(m_z, out)
    e_o = jnp.exp(out - m_c)
    beta = e_o / (sum_z * jnp.exp(m_z - m_c) + e_o)                        # (B, 1)

    c_hat = beta * st + (1.0 - beta) * ct                                  # (B, H)

    pt = (jnp.dot((c_hat + h_new).astype(jnp.bfloat16), wfc_ref[...],
                  preferred_element_type=jnp.float32) + bfc_ref[...])      # (B, V)
    return pt, alpha, beta, h_new, c_new


# ----------------------------------------------------------------- kernels
def _prologue_kernel(enc_ref, sp_ref, wh_ref, bh_ref, wc_ref, bc_ref, wcnn_ref,
                     h_ref, c_ref, cnnp_ref):
    """Hidden-state init (pixel mean + two Linears) + hoisted spatial attention proj,
    for one batch tile."""
    mean = jnp.mean(enc_ref[...], axis=1).astype(jnp.bfloat16)             # (TB, 2048)
    h_ref[...] = jnp.dot(mean, wh_ref[...],
                         preferred_element_type=jnp.float32) + bh_ref[...]
    c_ref[...] = jnp.dot(mean, wc_ref[...],
                         preferred_element_type=jnp.float32) + bc_ref[...]

    sp = sp_ref[...].astype(jnp.bfloat16)                                  # (TB, P, H)
    tb, p, h = sp.shape
    a = wcnn_ref.shape[1]
    cnnp_ref[...] = jnp.dot(sp.reshape(tb * p, h), wcnn_ref[...],
                            preferred_element_type=jnp.float32).reshape(tb, p, a)


def _decoder_grid_kernel(bt_ref,
                         x_ref, sp_ref, cnnp_ref,
                         wx_ref, wh_ref, bg_ref,
                         wdec_ref, wsen_ref, watt_ref,
                         wfc_ref, bfc_ref,
                         h0_ref, c0_ref,
                         pt_ref, ab_ref,
                         h_scr, c_scr,
                         *, H, attn_bf16):
    """One grid step == one decoding timestep; h/c carried in VMEM scratch."""
    t = pl.program_id(0)

    @pl.when(t == 0)
    def _():
        h_scr[...] = h0_ref[...]
        c_scr[...] = c0_ref[...]

    pt, alpha, beta, h_new, c_new = _step_math(
        x_ref[...], h_scr[...], c_scr[...], sp_ref, cnnp_ref,
        wx_ref, wh_ref, bg_ref, wdec_ref, wsen_ref, watt_ref, wfc_ref, bfc_ref,
        H=H, attn_bf16=attn_bf16)

    bsz = pt.shape[0]
    active = jax.lax.broadcasted_iota(jnp.int32, (bsz, 1), 0) < bt_ref[t]
    pt_ref[...] = jnp.where(active, pt, 0.0)
    ab_ref[...] = jnp.where(active, _pack_alpha_beta(alpha, beta, ab_ref.shape[-1]),
                            0.0)

    # Rows beyond batch_size_t keep evolving but are never consumed by an active row
    # (caption lengths are sorted descending), so unconditional carry is safe.
    h_scr[...] = h_new
    c_scr[...] = c_new


def _decoder_loop_kernel(bt_ref,
                         x_ref, sp_ref, cnnp_ref,
                         wx_ref, wh_ref, bg_ref,
                         wdec_ref, wsen_ref, watt_ref,
                         wfc_ref, bfc_ref,
                         h0_ref, c0_ref,
                         pt_ref, ab_ref,
                         *, H, attn_bf16):
    """Whole time loop in one kernel body: everything VMEM-resident, per-step slices
    written with ref[t].  Avoids the per-grid-step fixed overhead at small shapes."""
    T = pt_ref.shape[0]
    bsz = h0_ref.shape[0]
    row = jax.lax.broadcasted_iota(jnp.int32, (bsz, 1), 0)
    padw = ab_ref.shape[-1]

    def body(t, carry):
        h_prev, c_prev = carry
        pt, alpha, beta, h_new, c_new = _step_math(
            x_ref[t], h_prev, c_prev, sp_ref, cnnp_ref,
            wx_ref, wh_ref, bg_ref, wdec_ref, wsen_ref, watt_ref, wfc_ref, bfc_ref,
            H=H, attn_bf16=attn_bf16)
        active = row < bt_ref[t]
        pt_ref[t] = jnp.where(active, pt, 0.0)
        ab_ref[t] = jnp.where(active, _pack_alpha_beta(alpha, beta, padw), 0.0)
        return h_new, c_new

    jax.lax.fori_loop(0, T, body, (h0_ref[...], c0_ref[...]))


# ----------------------------------------------------------------- wrappers
def decoder_prologue(enc_image, spatial_image, params):
    B, P, C = enc_image.shape
    H = params['w_init_h'].shape[1]
    A = params['w_cnn_att'].shape[1]
    TB = 8 if B % 8 == 0 else B
    nb = B // TB

    def tiled(tail):
        n = 1 + len(tail)
        return pl.BlockSpec((TB,) + tuple(tail), lambda b, n=n: (b,) + (0,) * (n - 1))

    def resident(shape):
        n = len(shape)
        return pl.BlockSpec(shape, lambda b, n=n: (0,) * n)

    args = (enc_image, spatial_image,
            params['w_init_h'], params['b_init_h'],
            params['w_init_c'], params['b_init_c'],
            params['w_cnn_att'])
    in_specs = [tiled((P, C)), tiled((P, H))] + [resident(a.shape) for a in args[2:]]
    out_shapes = (jax.ShapeDtypeStruct((B, H), jnp.float32),      # h0
                  jax.ShapeDtypeStruct((B, H), jnp.float32),      # c0
                  jax.ShapeDtypeStruct((B, P, A), jnp.float32))   # spatial @ W_cnn
    out_specs = (tiled((H,)), tiled((H,)), tiled((P, A)))

    return pl.pallas_call(
        _prologue_kernel,
        grid=(nb,),
        in_specs=in_specs,
        out_specs=out_specs,
        out_shape=out_shapes,
        compiler_params=pltpu.CompilerParams(
            dimension_semantics=("parallel",),
            vmem_limit_bytes=_VMEM_LIMIT),
    )(*args)


def decoder_sequence(inputs_t, spatial, cnn_proj, h0, c0, bt, params, path=None):
    """Run the whole timestep loop.  path in {None (auto), 'loop', 'grid'}."""
    T, B, E2 = inputs_t.shape
    P = spatial.shape[1]
    H = h0.shape[1]
    V = params['w_fc'].shape[1]
    PADW = max(128, ((P + 1 + 127) // 128) * 128)   # lane-dense alpha+beta slab width

    tensor_args = (inputs_t, spatial, cnn_proj,
                   params['w_x_cat'], params['w_h_cat'], params['b_gate_cat'],
                   params['w_dec_att'], params['w_sen_out'], params['w_att_out'],
                   params['w_fc'], params['b_fc'],
                   h0, c0)

    out_shapes = (jax.ShapeDtypeStruct((T, B, V), jnp.float32),    # predictions (T-major)
                  jax.ShapeDtypeStruct((T, B, PADW), jnp.float32))  # packed alpha|beta

    footprint = sum(int(a.size) * a.dtype.itemsize for a in tensor_args)
    footprint += T * B * (V + PADW) * 4
    use_loop = (path == "loop") if path is not None else (footprint <= 16 * 1024 * 1024)

    cp = pltpu.CompilerParams(dimension_semantics=("arbitrary",),
                              vmem_limit_bytes=_VMEM_LIMIT)

    if use_loop:
        # Everything resident; the kernel iterates over time internally.
        def full(shape):
            n = len(shape)
            return pl.BlockSpec(shape, lambda i, bt_ref, n=n: (0,) * n)

        grid_spec = pltpu.PrefetchScalarGridSpec(
            num_scalar_prefetch=1,                 # bt (per-step batch_size_t) in SMEM
            grid=(1,),
            in_specs=[full(a.shape) for a in tensor_args],
            out_specs=(full((T, B, V)), full((T, B, PADW))))
        kernel = functools.partial(_decoder_loop_kernel, H=H, attn_bf16=_ATTN_BF16)
        return pl.pallas_call(kernel, grid_spec=grid_spec, out_shape=out_shapes,
                              compiler_params=cp)(bt, *tensor_args)

    # grid=(T,) fallback: weights resident, per-step input/output blocks pipelined.
    def resident(shape):
        # Constant block index across the time grid -> DMA'd once, stays in VMEM.
        # TODO(synk): at production sizes add pipeline_mode=pl.Buffered(1) here.
        n = len(shape)
        return pl.BlockSpec(shape, lambda t, bt_ref, n=n: (0,) * n)

    def timed(tail):
        n = len(tail)
        return pl.BlockSpec((None,) + tuple(tail),
                            lambda t, bt_ref, n=n: (t,) + (0,) * n)

    in_specs = [timed((B, E2))] + [resident(a.shape) for a in tensor_args[1:]]
    out_specs = (timed((B, V)), timed((B, PADW)))
    grid_spec = pltpu.PrefetchScalarGridSpec(
        num_scalar_prefetch=1,
        grid=(T,),
        in_specs=in_specs,
        out_specs=out_specs,
        scratch_shapes=[pltpu.VMEM((B, H), jnp.float32),    # carried h
                        pltpu.VMEM((B, H), jnp.float32)])   # carried c
    kernel = functools.partial(_decoder_grid_kernel, H=H, attn_bf16=_ATTN_BF16)
    return pl.pallas_call(kernel, grid_spec=grid_spec, out_shape=out_shapes,
                          compiler_params=cp)(bt, *tensor_args)


def decoder_forward(params, spatial_image, global_image, encoded_captions,
                    caption_lengths, enc_image, path=None):
    """Mirrors DecoderWithAttention.forward (eval mode)."""
    B, P, _ = spatial_image.shape

    lengths = caption_lengths[:, 0]
    sort_ind = jnp.argsort(-lengths)                    # descending sort
    lengths_sorted = lengths[sort_ind]
    spatial_image = spatial_image[sort_ind]
    global_image = global_image[sort_ind]
    encoded_captions = encoded_captions[sort_ind]
    enc_image = enc_image[sort_ind]

    embeddings = params['embedding'][encoded_captions]  # (B, Tcap, E)

    # Prologue kernel: init hidden/cell + hoisted spatial attention projection.
    h0, c0, cnn_proj = decoder_prologue(enc_image, spatial_image, params)

    # Host-side lengths (matches PyTorch .tolist()).
    decode_lengths = [int(l) - 1 for l in list(jax.device_get(lengths_sorted))]
    max_dec = max(decode_lengths)
    bt = jnp.asarray([sum(l > t for l in decode_lengths) for t in range(max_dec)],
                     jnp.int32)

    g_exp = jnp.broadcast_to(global_image[:, None, :], embeddings.shape)
    inputs = jnp.concatenate([embeddings, g_exp], axis=2)[:, :max_dec, :]
    # Time-major, bf16 (x is only ever a matmul LHS inside the kernel).
    inputs_t = jnp.transpose(inputs, (1, 0, 2)).astype(jnp.bfloat16)       # (T, B, 2E)

    preds_t, ab_t = decoder_sequence(inputs_t, spatial_image, cnn_proj, h0, c0, bt,
                                     params, path=path)

    predictions = jnp.transpose(preds_t, (1, 0, 2))     # (B, max_dec, V)
    ab = jnp.transpose(ab_t, (1, 0, 2))                 # (B, max_dec, PADW)
    alphas = ab[:, :, :P]                               # (B, max_dec, P)
    betas = ab[:, :, P:P + 1]                           # (B, max_dec, 1)
    return predictions, alphas, betas, encoded_captions, decode_lengths, sort_ind


# ----------------------------------------------------------------- params
def init_params(key, hidden_size, vocab_size, att_dim, embed_size):
    H, V, A, E = hidden_size, vocab_size, att_dim, embed_size
    ks = jax.random.split(key, 18)
    bf16 = jnp.bfloat16

    def xavier(k, fan_in, fan_out, shape):
        b = (6.0 / (fan_in + fan_out)) ** 0.5
        return jax.random.uniform(k, shape, jnp.float32, -b, b)

    def unif(k, shape, b):
        return jax.random.uniform(k, shape, jnp.float32, -b, b)

    k_lstm = 1.0 / (H ** 0.5)
    k_init = 1.0 / (2048.0 ** 0.5)

    p = {}
    p['embedding'] = unif(ks[0], (V, E), 0.1)                    # init_weights: U(-0.1,0.1)
    p['w_init_h'] = unif(ks[1], (2048, H), k_init).astype(bf16)
    p['b_init_h'] = unif(ks[2], (1, H), k_init)
    p['w_init_c'] = unif(ks[3], (2048, H), k_init).astype(bf16)
    p['b_init_c'] = unif(ks[4], (1, H), k_init)

    # LSTM gates (i,f,g,o) + sentinel input/hidden gates fused into two wide matmuls:
    #   x @ W_x_cat -> [i | f | g | o | inp_gate], h_prev @ W_h_cat -> [... | hidd_gate].
    w_ih = unif(ks[5], (4, 2 * E, H), k_lstm)                    # per-gate, (in,out)-T
    w_hh = unif(ks[6], (4, H, H), k_lstm)
    b_lstm = unif(ks[7], (4, 1, H), k_lstm) + unif(ks[8], (4, 1, H), k_lstm)
    w_inp_gate = xavier(ks[9], 2 * E, H, (2 * E, H))             # Sentinal (xavier)
    w_hidd_gate = xavier(ks[10], H, H, (H, H))
    p['w_x_cat'] = jnp.concatenate([w_ih[g] for g in range(4)] + [w_inp_gate],
                                   axis=1).astype(bf16)          # (2E, 5H)
    p['w_h_cat'] = jnp.concatenate([w_hh[g] for g in range(4)] + [w_hidd_gate],
                                   axis=1).astype(bf16)          # (H, 5H)
    p['b_gate_cat'] = jnp.concatenate(
        [b_lstm[g] for g in range(4)] + [jnp.zeros((1, H), jnp.float32)],
        axis=1)                                                  # (1, 5H), no sentinel bias

    p['w_cnn_att'] = xavier(ks[11], H, A, (H, A)).astype(bf16)   # AdaptiveAttention
    p['w_dec_att'] = xavier(ks[12], H, A, (H, A)).astype(bf16)
    p['w_sen_out'] = xavier(ks[13], H, A, (H, A)).astype(bf16)
    p['w_att_out'] = xavier(ks[14], A, 1, (1, A))                # VPU-side reduce; f32
    p['w_fc'] = unif(ks[15], (H, V), 0.1).astype(bf16)           # init_weights: U(-0.1,0.1)
    p['b_fc'] = jnp.zeros((1, V), jnp.float32)                   # init_weights: fill 0
    return p


# ----------------------------------------------------------------- main
if __name__ == "__main__":
    # Small but lane/sublane-aligned demo shapes: B multiple of 8; H, A, V, 2E = 128.
    B, P, H, A, E, V, T = 8, 16, 128, 128, 64, 128, 8

    key = jax.random.PRNGKey(0)
    kp, k1, k2, k3, k4 = jax.random.split(key, 5)
    params = init_params(kp, hidden_size=H, vocab_size=V, att_dim=A, embed_size=E)

    spatial_image = jax.random.normal(k1, (B, P, H), jnp.float32)
    global_image = jax.random.normal(k2, (B, E), jnp.float32)
    encoded_captions = jax.random.randint(k3, (B, T), 0, V)
    caption_lengths = jnp.array([[5], [8], [3], [7], [6], [4], [8], [2]], jnp.int32)
    enc_image = jax.random.normal(k4, (B, P, 2048), jnp.float32)

    # In-kernel time loop (the path auto-selection would pick at these sizes).
    preds, alphas, betas, enc_caps, dec_lens, sort_ind = decoder_forward(
        params, spatial_image, global_image, encoded_captions, caption_lengths,
        enc_image, path="loop")
    # Time-grid fallback path (used when the resident footprint outgrows VMEM).
    preds_g, alphas_g, betas_g, *_ = decoder_forward(
        params, spatial_image, global_image, encoded_captions, caption_lengths,
        enc_image, path="grid")

    jax.block_until_ready((preds, alphas, betas, preds_g, alphas_g, betas_g))
    max_dec = max(dec_lens)
    assert preds.shape == (B, max_dec, V)
    assert alphas.shape == (B, max_dec, P)
    assert betas.shape == (B, max_dec, 1)
    assert jnp.allclose(preds, preds_g, atol=1e-4, rtol=1e-4)
    assert jnp.allclose(alphas, alphas_g, atol=1e-5, rtol=1e-5)
    assert jnp.allclose(betas, betas_g, atol=1e-5, rtol=1e-5)
    print("KERNEL_OK")
</pallas_src>

<mosaic_0001>
module attributes {stable_mosaic.version = 11 : i64} {
  func.func @_prologue_kernel(%arg0: i32, %arg1: memref<8x16x2048xf32, #tpu.memory_space<vmem>>, %arg2: memref<8x16x128xf32, #tpu.memory_space<vmem>>, %arg3: memref<2048x128xbf16, #tpu.memory_space<vmem>>, %arg4: memref<1x128xf32, #tpu.memory_space<vmem>>, %arg5: memref<2048x128xbf16, #tpu.memory_space<vmem>>, %arg6: memref<1x128xf32, #tpu.memory_space<vmem>>, %arg7: memref<128x128xbf16, #tpu.memory_space<vmem>>, %arg8: memref<8x128xf32, #tpu.memory_space<vmem>>, %arg9: memref<8x128xf32, #tpu.memory_space<vmem>>, %arg10: memref<8x16x128xf32, #tpu.memory_space<vmem>>) attributes {dimension_semantics = [#tpu.dimension_semantics<parallel>], iteration_bounds = array<i64: 1>, scalar_prefetch = 0 : i64, scratch_operands = 0 : i64, tpu.core_type = #tpu.core_type<tc>, window_params = [{transform_indices = @transform_0, window_bounds = array<i64: 8, 16, 2048>}, {transform_indices = @transform_1, window_bounds = array<i64: 8, 16, 128>}, {pipeline_mode = #tpu.pipeline_mode<synchronous>, transform_indices = @transform_2, window_bounds = array<i64: 2048, 128>}, {pipeline_mode = #tpu.pipeline_mode<synchronous>, transform_indices = @transform_3, window_bounds = array<i64: 1, 128>}, {pipeline_mode = #tpu.pipeline_mode<synchronous>, transform_indices = @transform_4, window_bounds = array<i64: 2048, 128>}, {pipeline_mode = #tpu.pipeline_mode<synchronous>, transform_indices = @transform_5, window_bounds = array<i64: 1, 128>}, {pipeline_mode = #tpu.pipeline_mode<synchronous>, transform_indices = @transform_6, window_bounds = array<i64: 128, 128>}, {transform_indices = @transform_7, window_bounds = array<i64: 8, 128>}, {transform_indices = @transform_8, window_bounds = array<i64: 8, 128>}, {transform_indices = @transform_9, window_bounds = array<i64: 8, 16, 128>}]} {
    %c0 = arith.constant 0 : index
    %c0_0 = arith.constant 0 : index
    %c0_1 = arith.constant 0 : index
    %0 = vector.load %arg1[%c0, %c0_0, %c0_1] : memref<8x16x2048xf32, #tpu.memory_space<vmem>>, vector<8x16x2048xf32>
    %cst = arith.constant dense<0.000000e+00> : vector<8x2048xf32>
    %1 = vector.multi_reduction <add>, %0, %cst [1] : vector<8x16x2048xf32> to vector<8x2048xf32>
    %cst_2 = arith.constant 1.600000e+01 : f32
    %2 = vector.broadcast %cst_2 : f32 to vector<8x2048xf32>
    %3 = arith.divf %1, %2 : vector<8x2048xf32>
    %4 = arith.truncf %3 : vector<8x2048xf32> to vector<8x2048xbf16>
    %c0_3 = arith.constant 0 : index
    %c0_4 = arith.constant 0 : index
    %5 = vector.load %arg3[%c0_3, %c0_4] : memref<2048x128xbf16, #tpu.memory_space<vmem>>, vector<2048x128xbf16>
    %cst_5 = arith.constant dense<0.000000e+00> : vector<8x128xf32>
    %6 = tpu.matmul %4, %5, %cst_5 {dimension_numbers = #tpu.dot_dimension_numbers<[1], [0], [0], [1], [0, 0, 1, 1], [], []>} : vector<8x2048xbf16>, vector<2048x128xbf16>, vector<8x128xf32> -> vector<8x128xf32>
    %c0_6 = arith.constant 0 : index
    %c0_7 = arith.constant 0 : index
    %7 = vector.load %arg4[%c0_6, %c0_7] : memref<1x128xf32, #tpu.memory_space<vmem>>, vector<1x128xf32>
    %8 = vector.broadcast %7 : vector<1x128xf32> to vector<8x128xf32>
    %9 = arith.addf %6, %8 : vector<8x128xf32>
    %c0_8 = arith.constant 0 : index
    %c0_9 = arith.constant 0 : index
    %10 = vector.load %arg8[%c0_8, %c0_9] : memref<8x128xf32, #tpu.memory_space<vmem>>, vector<8x128xf32>
    tpu.vector_store %arg8[%c0_8, %c0_9], %9 {strides = array<i32>} : memref<8x128xf32, #tpu.memory_space<vmem>>, vector<8x128xf32>,
    %c0_10 = arith.constant 0 : index
    %c0_11 = arith.constant 0 : index
    %11 = vector.load %arg5[%c0_10, %c0_11] : memref<2048x128xbf16, #tpu.memory_space<vmem>>, vector<2048x128xbf16>
    %cst_12 = arith.constant dense<0.000000e+00> : vector<8x128xf32>
    %12 = tpu.matmul %4, %11, %cst_12 {dimension_numbers = #tpu.dot_dimension_numbers<[1], [0], [0], [1], [0, 0, 1, 1], [], []>} : vector<8x2048xbf16>, vector<2048x128xbf16>, vector<8x128xf32> -> vector<8x128xf32>
    %c0_13 = arith.constant 0 : index
    %c0_14 = arith.constant 0 : index
    %13 = vector.load %arg6[%c0_13, %c0_14] : memref<1x128xf32, #tpu.memory_space<vmem>>, vector<1x128xf32>
    %14 = vector.broadcast %13 : vector<1x128xf32> to vector<8x128xf32>
    %15 = arith.addf %12, %14 : vector<8x128xf32>
    %c0_15 = arith.constant 0 : index
    %c0_16 = arith.constant 0 : index
    %16 = vector.load %arg9[%c0_15, %c0_16] : memref<8x128xf32, #tpu.memory_space<vmem>>, vector<8x128xf32>
    tpu.vector_store %arg9[%c0_15, %c0_16], %15 {strides = array<i32>} : memref<8x128xf32, #tpu.memory_space<vmem>>, vector<8x128xf32>,
    %c0_17 = arith.constant 0 : index
    %c0_18 = arith.constant 0 : index
    %c0_19 = arith.constant 0 : index
    %17 = vector.load %arg2[%c0_17, %c0_18, %c0_19] : memref<8x16x128xf32, #tpu.memory_space<vmem>>, vector<8x16x128xf32>
    %18 = arith.truncf %17 : vector<8x16x128xf32> to vector<8x16x128xbf16>
    %19 = vector.shape_cast %18 : vector<8x16x128xbf16> to vector<128x128xbf16>
    %c0_20 = arith.constant 0 : index
    %c0_21 = arith.constant 0 : index
    %20 = vector.load %arg7[%c0_20, %c0_21] : memref<128x128xbf16, #tpu.memory_space<vmem>>, vector<128x128xbf16>
    %cst_22 = arith.constant dense<0.000000e+00> : vector<128x128xf32>
    %21 = tpu.matmul %19, %20, %cst_22 {dimension_numbers = #tpu.dot_dimension_numbers<[1], [0], [0], [1], [0, 0, 1, 1], [], []>} : vector<128x128xbf16>, vector<128x128xbf16>, vector<128x128xf32> -> vector<128x128xf32>
    %22 = vector.shape_cast %21 : vector<128x128xf32> to vector<8x16x128xf32>
    %c0_23 = arith.constant 0 : index
    %c0_24 = arith.constant 0 : index
    %c0_25 = arith.constant 0 : index
    %23 = vector.load %arg10[%c0_23, %c0_24, %c0_25] : memref<8x16x128xf32, #tpu.memory_space<vmem>>, vector<8x16x128xf32>
    tpu.vector_store %arg10[%c0_23, %c0_24, %c0_25], %22 {strides = array<i32>} : memref<8x16x128xf32, #tpu.memory_space<vmem>>, vector<8x16x128xf32>,
    return
  }
  func.func @transform_0(%arg0: i32) -> (i32, i32, i32) {
    %c0_i32 = arith.constant 0 : i32
    %c0_i32_0 = arith.constant 0 : i32
    %c0_i32_1 = arith.constant 0 : i32
    return %arg0, %c0_i32, %c0_i32_0 : i32, i32, i32
  }
  func.func @transform_1(%arg0: i32) -> (i32, i32, i32) {
    %c0_i32 = arith.constant 0 : i32
    %c0_i32_0 = arith.constant 0 : i32
    %c0_i32_1 = arith.constant 0 : i32
    return %arg0, %c0_i32, %c0_i32_0 : i32, i32, i32
  }
  func.func @transform_2(%arg0: i32) -> (i32, i32) {
    %c0_i32 = arith.constant 0 : i32
    %c0_i32_0 = arith.constant 0 : i32
    %c0_i32_1 = arith.constant 0 : i32
    return %c0_i32, %c0_i32_0 : i32, i32
  }
  func.func @transform_3(%arg0: i32) -> (i32, i32) {
    %c0_i32 = arith.constant 0 : i32
    %c0_i32_0 = arith.constant 0 : i32
    %c0_i32_1 = arith.constant 0 : i32
    return %c0_i32, %c0_i32_0 : i32, i32
  }
  func.func @transform_4(%arg0: i32) -> (i32, i32) {
    %c0_i32 = arith.constant 0 : i32
    %c0_i32_0 = arith.constant 0 : i32
    %c0_i32_1 = arith.constant 0 : i32
    return %c0_i32, %c0_i32_0 : i32, i32
  }
  func.func @transform_5(%arg0: i32) -> (i32, i32) {
    %c0_i32 = arith.constant 0 : i32
    %c0_i32_0 = arith.constant 0 : i32
    %c0_i32_1 = arith.constant 0 : i32
    return %c0_i32, %c0_i32_0 : i32, i32
  }
  func.func @transform_6(%arg0: i32) -> (i32, i32) {
    %c0_i32 = arith.constant 0 : i32
    %c0_i32_0 = arith.constant 0 : i32
    %c0_i32_1 = arith.constant 0 : i32
    return %c0_i32, %c0_i32_0 : i32, i32
  }
  func.func @transform_7(%arg0: i32) -> (i32, i32) {
    %c0_i32 = arith.constant 0 : i32
    %c0_i32_0 = arith.constant 0 : i32
    return %arg0, %c0_i32 : i32, i32
  }
  func.func @transform_8(%arg0: i32) -> (i32, i32) {
    %c0_i32 = arith.constant 0 : i32
    %c0_i32_0 = arith.constant 0 : i32
    return %arg0, %c0_i32 : i32, i32
  }
  func.func @transform_9(%arg0: i32) -> (i32, i32, i32) {
    %c0_i32 = arith.constant 0 : i32
    %c0_i32_0 = arith.constant 0 : i32
    %c0_i32_1 = arith.constant 0 : i32
    return %arg0, %c0_i32, %c0_i32_0 : i32, i32, i32
  }
}

</mosaic_0001>

<bundles_post_ra>
// kernel: tpu_custom_call.1
= control target key start
LH: loop header
LB: loop body
LE: loop exit
PB: predicated region body
PF: predicated region fallthrough
CT: control target
= control target key end

     0   :  { %15 = vsyncpa [#allocation3], 0  ;;  %s6388_s0 = inlined_call_operand.hbm [shape: f32[8,16,2048], index: 0, kind: input, shape index: {}]   ;;  %s6389_s1 = inlined_call_operand.hbm [shape: f32[8,16,128], index: 1, kind: input, shape index: {}]   ;;  %s6390_s2 = inlined_call_operand.hbm [shape: bf16[2048,128], index: 2, kind: input, shape index: {}]   ;;  %s6391_s3 = inlined_call_operand.vmem [shape: f32[1,128], index: 3, kind: input, shape index: {}]   ;;  %s6392_s4 = inlined_call_operand.hbm [shape: bf16[2048,128], index: 4, kind: input, shape index: {}]   ;;  %s6393_s5 = inlined_call_operand.vmem [shape: f32[1,128], index: 5, kind: input, shape index: {}]   ;;  %s6394_s6 = inlined_call_operand.hbm [shape: bf16[128,128], index: 6, kind: input, shape index: {}]   ;;  %s6395_s7 = inlined_call_operand.hbm [shape: f32[8,128], index: 7, kind: output, shape index: {0}]   ;;  %s6396_s8 = inlined_call_operand.hbm [shape: f32[8,128], index: 8, kind: output, shape index: {1}]   ;;  %s6397_s9 = inlined_call_operand.hbm [shape: f32[8,16,128], index: 9, kind: output, shape index: {2}]  }
   0x1   :  { %16 = vsyncpa [#allocation6], 0 }
   0x2   :  { %17 = vsyncpa [#allocation9], 0 }
   0x3   :  { %18 = vsyncpa [#allocation4], 0 }
   0x4   :  { %19 = vsyncpa [#allocation13], 0  ;;  %s5996_s30 = smov [#allocation5]   ;;  %s5810_s13 = scalar_lea.hbm %s6389_s1, 2048 }
   0x5   :  { %s37_s10 = sshll.u32 %s5996_s30, 4  ;;  %p5811_p0 = scmp.ne.s32.totalorder %s6389_s1, %s5810_s13  ;;  %s38_s10 = int_to_ptr.vmem [resolvable:$true] %s37_s10 }
   0x6   :  { %p5814_p1 = scmp.lt.u32.totalorder %s5810_s13, %s6389_s1 }
   0x8   :  { %p5816_p2 = pnand %p5814_p1, %p5811_p0 }
   0xa   :  { %5819 = shalt.err (!%p5816_p2)
}
   0xb   :  { %s5820_s18 = scalar_lea.vmem %s38_s10, 2048  ;;  %p5825_p4 = scmp.lt.s32.totalorder %s38_s10, %s38_s10 }
   0xc   :  { %p5821_p3 = scmp.ne.s32.totalorder %s38_s10, %s5820_s18  ;;  %p5826_p5 = scmp.lt.s32.totalorder %s5820_s18, %s5820_s18 }
   0xe   :  { %p5827_p6 = por %p5826_p5, %p5825_p4 }
  0x10   :  { %p5828_p7 = pnand %p5827_p6, %p5821_p3 }
  0x12   :  { %5831 = shalt.err (!%p5828_p7)
}
  0x13   :  { %s5997_s19 = smov 128   ;;  %s5998_s20 = smov 8  }
  0x14   :  { %43 = dma.hbm_to_vmem [thread:$0]  %s6389_s1, 2048, %s38_s10, [#allocation6], %s5997_s19, %s5997_s19, %s5998_s20  }
  0x15   :  { %s5999_s23 = smov [#allocation8]   ;;  %s6000_s25 = smov [#allocation2]  }
  0x16   :  { %s63_s24 = sshll.u32 %s5999_s23, 4  ;;  %s25_s26 = sshll.u32 %s6000_s25, 4  ;;  %s64_s24 = int_to_ptr.vmem [resolvable:$true] %s63_s24  ;;  %s26_s26 = int_to_ptr.vmem [resolvable:$true] %s25_s26 }
  0x17   :  { %s5832_s29 = scalar_lea.hbm %s6392_s4, 16384 }
  0x18   :  { %p5833_p8 = scmp.ne.s32.totalorder %s6392_s4, %s5832_s29  ;;  %p5836_p9 = scmp.lt.u32.totalorder %s5832_s29, %s6392_s4 }
  0x1a   :  { %p5838_p10 = pnand %p5836_p9, %p5833_p8 }
  0x1c   :  { %5841 = shalt.err (!%p5838_p10)
}
  0x1d   :  { %s5842_s1 = scalar_lea.vmem %s64_s24, 16384  ;;  %p5847_p12 = scmp.lt.s32.totalorder %s64_s24, %s64_s24 }
  0x1e   :  { %p5843_p11 = scmp.ne.s32.totalorder %s64_s24, %s5842_s1  ;;  %p5848_p13 = scmp.lt.s32.totalorder %s5842_s1, %s5842_s1 }
  0x20   :  { %p5849_p0 = por %p5848_p13, %p5847_p12 }
  0x22   :  { %p5850_p1 = pnand %p5849_p0, %p5843_p11 }
  0x24   :  { %5853 = shalt.err (!%p5850_p1)
}
  0x25   :  { %s6001_s10 = smov 64   ;;  %s6002_s14 = smov 4  }
  0x26   :  { %69 = dma.hbm_to_vmem [thread:$0]  %s6392_s4, 16384, %s64_s24, [#allocation9], %s6001_s10, %s6001_s10, %s6002_s14  }
  0x27   :  { %s5854_s21 = scalar_lea.hbm %s6388_s0, 32768 }
  0x28   :  { %p5855_p2 = scmp.ne.s32.totalorder %s6388_s0, %s5854_s21  ;;  %p5858_p3 = scmp.lt.u32.totalorder %s5854_s21, %s6388_s0 }
  0x2a   :  { %p5860_p4 = pnand %p5858_p3, %p5855_p2 }
  0x2c   :  { %5863 = shalt.err (!%p5860_p4)
}
  0x2d   :  { %s5864_s28 = scalar_lea.vmem %s26_s26, 32768  ;;  %p5869_p6 = scmp.lt.s32.totalorder %s26_s26, %s26_s26 }
  0x2e   :  { %p5865_p5 = scmp.ne.s32.totalorder %s26_s26, %s5864_s28  ;;  %p5870_p7 = scmp.lt.s32.totalorder %s5864_s28, %s5864_s28 }
  0x30   :  { %p5871_p8 = por %p5870_p7, %p5869_p6 }
  0x32   :  { %p5872_p9 = pnand %p5871_p8, %p5865_p5 }
  0x34   :  { %5875 = shalt.err (!%p5872_p9)
}
  0x35   :  { %s6003_s4 = smov 2048   ;;  %s6004_s30 = smov [#allocation7]  }
  0x36   :  { %31 = dma.hbm_to_vmem [thread:$0]  %s6388_s0, 32768, %s26_s26, [#allocation3], %s6003_s4, %s6003_s4, %s5997_s19  }
  0x37   :  { %s49_s11 = sshll.u32 %s6004_s30, 4  ;;  %s6005_s12 = smov [#allocation10]   ;;  %s50_s11 = int_to_ptr.vmem [resolvable:$true] %s49_s11 }
  0x38   :  { %s77_s13 = sshll.u32 %s6005_s12, 4  ;;  %s5876_s16 = scalar_lea.hbm %s6390_s2, 16384  ;;  %s6102_s13 = int_to_ptr.vmem [resolvable:$true] %s77_s13 }
  0x39   :  { %p5877_p10 = scmp.ne.s32.totalorder %s6390_s2, %s5876_s16  ;;  %p5880_p11 = scmp.lt.u32.totalorder %s5876_s16, %s6390_s2 }
  0x3b   :  { %p5882_p12 = pnand %p5880_p11, %p5877_p10 }
  0x3d   :  { %5885 = shalt.err (!%p5882_p12)
}
  0x3e   :  { %s5886_s0 = scalar_lea.vmem %s50_s11, 16384  ;;  %p5891_p0 = scmp.lt.s32.totalorder %s50_s11, %s50_s11 }
  0x3f   :  { %p5887_p13 = scmp.ne.s32.totalorder %s50_s11, %s5886_s0  ;;  %p5892_p1 = scmp.lt.s32.totalorder %s5886_s0, %s5886_s0 }
  0x41   :  { %p5893_p2 = por %p5892_p1, %p5891_p0 }
  0x43   :  { %p5894_p3 = pnand %p5893_p2, %p5887_p13 }
  0x45   :  { %5897 = shalt.err (!%p5894_p3)
}
  0x46   :  { %55 = dma.hbm_to_vmem [thread:$0]  %s6390_s2, 16384, %s50_s11, [#allocation6], %s6001_s10, %s6001_s10, %s6002_s14  }
  0x47   :  { %s5898_s28 = scalar_lea.hbm %s6394_s6, 1024 }
  0x48   :  { %p5899_p4 = scmp.ne.s32.totalorder %s6394_s6, %s5898_s28  ;;  %p5902_p5 = scmp.lt.u32.totalorder %s5898_s28, %s6394_s6 }
  0x4a   :  { %p5904_p6 = pnand %p5902_p5, %p5899_p4 }
  0x4c   :  { %5907 = shalt.err (!%p5904_p6)
}
  0x4d   :  { %s5908_s12 = scalar_lea.vmem %s6102_s13, 1024  ;;  %p5913_p8 = scmp.lt.s32.totalorder %s6102_s13, %s6102_s13 }
  0x4e   :  { %p5909_p7 = scmp.ne.s32.totalorder %s6102_s13, %s5908_s12  ;;  %p5914_p9 = scmp.lt.s32.totalorder %s5908_s12, %s5908_s12 }
  0x50   :  { %p5915_p10 = por %p5914_p9, %p5913_p8 }
  0x52   :  { %p5916_p11 = pnand %p5915_p10, %p5909_p7 }
  0x54   :  { %5919 = shalt.err (!%p5916_p11)
}
  0x55   :  { %83 = dma.hbm_to_vmem [thread:$0]  %s6394_s6, 1024, %s6102_s13, [#allocation9], %s6001_s10, %s6001_s10, %s6002_s14  }
  0x56   :  { %5986 = dma.done.wait [#allocation3], 32768  }
  0x57   :  { %5987 = vsyncadd [#allocation3], 4294934528 }
  0x58   :  { %5988 = dma.done.wait [#allocation6], 18432  }
  0x59   :  { %5989 = vsyncadd [#allocation6], 4294948864 }
  0x5a   :  { %5990 = dma.done.wait [#allocation9], 17408  }
  0x5b   :  { %5991 = vsyncadd [#allocation9], 4294949888  ;;  %v5546_v0 = vld [vmem:[#allocation7 + $0x40] sm:$0xff]   ;;  %v5548_v2 = vld [vmem:[#allocation7 + $0x48] sm:$0xff]   ;;  %vm2028_vm0 = vcmask 1041409   ;;  %vm2030_vm1 = vcmask 1042434  }
  0x5c   :  { %v5547_v1 = vld [vmem:[#allocation7] sm:$0xff]   ;;  %5133 = vmatprep.subr.bf16.mxu1 %v5546_v0  ;;  %v5549_v3 = vld [vmem:[#allocation7 + $0x8] sm:$0xff]   ;;  %v5550_v4 = vld [vmem:[#allocation7 + $0x50] sm:$0xff]   ;;  %vm2032_vm2 = vcmask 1043459   ;;  %vm2034_vm3 = vcmask 1044484   ;;  %vm2036_vm4 = vcmask 1045509  }
  0x5d   :  { %5134 = vmatpush3.bf16.msra.mxu1 %v5547_v1  ;;  %v5551_v5 = vld [vmem:[#allocation7 + $0x140] sm:$0xff]   ;;  %v5552_v6 = vld [vmem:[#allocation7 + $0x10] sm:$0xff]   ;;  %v5554_v8 = vld [vmem:[#allocation7 + $0x58] sm:$0xff]   ;;  %vm2038_vm5 = vcmask 1046534   ;;  %vm2040_vm6 = vcmask 1047559  }
  0x5e   :  { %5135 = vmatprep.subr.bf16.mxu1 %v5548_v2  ;;  %5177 = vmatprep.subr.bf16.mxu0 %v5551_v5  ;;  %v5553_v7 = vld [vmem:[#allocation7 + $0x100] sm:$0xff]   ;;  %v5555_v9 = vld [vmem:[#allocation7 + $0x148] sm:$0xff]   ;;  %v5556_v10 = vld [vmem:[#allocation7 + $0x18] sm:$0xff]  }
  0x5f   :  { %5178 = vmatpush3.bf16.msra.mxu0 %v5553_v7  ;;  %v5557_v11 = vld [vmem:[#allocation7 + $0x108] sm:$0xff]   ;;  %v5558_v12 = vld [vmem:[#allocation7 + $0x60] sm:$0xff]   ;;  %v5559_v13 = vld [vmem:[#allocation7 + $0x150] sm:$0xff]  }
  0x60   :  { %5179 = vmatprep.subr.bf16.mxu0 %v5555_v9  ;;  %v5560_v14 = vld [vmem:[#allocation7 + $0x20] sm:$0xff]   ;;  %v5561_v15 = vld [vmem:[#allocation7 + $0x110] sm:$0xff]   ;;  %v5562_v16 = vld [vmem:[#allocation7 + $0x68] sm:$0xff]  }
  0x61   :  { %5136 = vmatpush3.bf16.msra.mxu1 %v5549_v3  ;;  %v5563_v17 = vld [vmem:[#allocation7 + $0x158] sm:$0xff]   ;;  %v5564_v18 = vld [vmem:[#allocation7 + $0x28] sm:$0xff]   ;;  %v5566_v20 = vld [vmem:[#allocation7 + $0x70] sm:$0xff]  }
  0x62   :  { %5137 = vmatprep.subr.bf16.mxu1 %v5550_v4  ;;  %v5565_v19 = vld [vmem:[#allocation7 + $0x118] sm:$0xff]   ;;  %v5567_v21 = vld [vmem:[#allocation7 + $0x160] sm:$0xff]   ;;  %v5568_v22 = vld [vmem:[#allocation7 + $0x30] sm:$0xff]  }
  0x63   :  { %5180 = vmatpush3.bf16.msra.mxu0 %v5557_v11  ;;  %v5569_v23 = vld [vmem:[#allocation7 + $0x120] sm:$0xff]   ;;  %v5570_v24 = vld [vmem:[#allocation7 + $0x78] sm:$0xff]   ;;  %v5571_v25 = vld [vmem:[#allocation7 + $0x168] sm:$0xff]  }
  0x64   :  { %5181 = vmatprep.subr.bf16.mxu0 %v5559_v13  ;;  %v5572_v26 = vld [vmem:[#allocation7 + $0x38] sm:$0xff]   ;;  %v5573_v27 = vld [vmem:[#allocation7 + $0x128] sm:$0xff]  }
  0x65   :  { %5138 = vmatpush3.bf16.msra.mxu1 %v5552_v6  ;;  %v101_v28 = vld [vmem:[#allocation2 + $0x8] sm:$0xff] }
  0x66   :  { %5139 = vmatprep.subr.bf16.mxu1 %v5554_v8  ;;  %v117_v29 = vld [vmem:[#allocation2 + $0x88] sm:$0xff] }
  0x67   :  { %5182 = vmatpush3.bf16.msra.mxu0 %v5561_v15  ;;  %v133_v30 = vld [vmem:[#allocation2 + $0x108] sm:$0xff]  ;;  %v363_v34 = vadd.f32 %v117_v29, %v101_v28 }
  0x68   :  { %5183 = vmatprep.subr.bf16.mxu0 %v5563_v17  ;;  %v149_v31 = vld [vmem:[#allocation2 + $0x188] sm:$0xff]  ;;  %v5575_v17 = vld [vmem:[#allocation7 + $0x170] sm:$0xff]  }
  0x69   :  { %5140 = vmatpush3.bf16.msra.mxu1 %v5556_v10  ;;  %v165_v32 = vld [vmem:[#allocation2 + $0x208] sm:$0xff]  ;;  %v475_v38 = vadd.f32 %v149_v31, %v133_v30  ;;  %v364_v43 = vrot.slane %v363_v34, 4  ;;  %v5577_v30 = vld [vmem:[#allocation7 + $0x130] sm:$0xff]  }
  0x6a   :  { %5141 = vmatprep.subr.bf16.mxu1 %v5558_v12  ;;  %v181_v33 = vld [vmem:[#allocation2 + $0x288] sm:$0xff] }
  0x6b   :  { %5184 = vmatpush3.bf16.msra.mxu0 %v5565_v19  ;;  %v197_v35 = vld [vmem:[#allocation2 + $0x308] sm:$0xff]  ;;  %v587_v39 = vadd.f32 %v181_v33, %v165_v32  ;;  %v476_v48 = vrot.slane %v475_v38, 4  ;;  %v365_v53 = vadd.f32 %v364_v43, %v363_v34 }
  0x6c   :  { %5185 = vmatprep.subr.bf16.mxu0 %v5567_v21  ;;  %v213_v36 = vld [vmem:[#allocation2 + $0x388] sm:$0xff] }
  0x6d   :  { %5142 = vmatpush3.bf16.msra.mxu1 %v5560_v14  ;;  %v229_v37 = vld [vmem:[#allocation2 + $0x408] sm:$0xff]  ;;  %v699_v44 = vadd.f32 %v213_v36, %v197_v35  ;;  %v588_v49 = vrot.slane %v587_v39, 4  ;;  %v477_v56 = vadd.f32 %v476_v48, %v475_v38  ;;  %v366_v60 = vrot.slane %v365_v53, 2 }
  0x6e   :  { %5143 = vmatprep.subr.bf16.mxu1 %v5562_v16  ;;  %v245_v40 = vld [vmem:[#allocation2 + $0x488] sm:$0xff]  ;;  %v5574_v16 = vld [vmem:[#allocation7 + $0xc0] sm:$0xff]  }
  0x6f   :  { %5186 = vmatpush3.bf16.msra.mxu0 %v5569_v23  ;;  %v261_v41 = vld [vmem:[#allocation2 + $0x508] sm:$0xff]  ;;  %v811_v50 = vadd.f32 %v245_v40, %v229_v37  ;;  %v700_v54 = vrot.slane %v699_v44, 4  ;;  %v589_v57 = vadd.f32 %v588_v49, %v587_v39  ;;  %v478_v0 = vrot.slane %v477_v56, 2  ;;  %v100_v39 = vld [vmem:[#allocation2] sm:$0xff] }
  0x70   :  { %5187 = vmatprep.subr.bf16.mxu0 %v5571_v25  ;;  %v277_v42 = vld [vmem:[#allocation2 + $0x588] sm:$0xff]  ;;  %v367_v4 = vadd.f32 %v366_v60, %v365_v53  ;;  %v116_v40 = vld [vmem:[#allocation2 + $0x80] sm:$0xff] }
  0x71   :  { %5144 = vmatpush3.bf16.msra.mxu1 %v5564_v18  ;;  %v293_v45 = vld [vmem:[#allocation2 + $0x608] sm:$0xff]  ;;  %v923_v51 = vadd.f32 %v277_v42, %v261_v41  ;;  %v812_v58 = vrot.slane %v811_v50, 4  ;;  %v701_v61 = vadd.f32 %v700_v54, %v699_v44  ;;  %v590_v1 = vrot.slane %v589_v57, 2  ;;  %v5579_v41 = vld [vmem:[#allocation7 + $0x178] sm:$0xff]  }
  0x72   :  { %5145 = vmatprep.subr.bf16.mxu1 %v5566_v20  ;;  %v309_v46 = vld [vmem:[#allocation2 + $0x688] sm:$0xff]  ;;  %v479_v8 = vadd.f32 %v478_v0, %v477_v56  ;;  %v368_v12 = vrot.slane %v367_v4, 1  ;;  %v164_v56 = vld [vmem:[#allocation2 + $0x200] sm:$0xff] }
  0x73   :  { %5188 = vmatpush3.bf16.msra.mxu0 %v5573_v27  ;;  %v325_v47 = vld [vmem:[#allocation2 + $0x708] sm:$0xff]  ;;  %v1035_v55 = vadd.f32 %v309_v46, %v293_v45  ;;  %v924_v59 = vrot.slane %v923_v51, 4  ;;  %v813_v2 = vadd.f32 %v812_v58, %v811_v50  ;;  %v702_v5 = vrot.slane %v701_v61, 2  ;;  %v132_v46 = vld [vmem:[#allocation2 + $0x100] sm:$0xff] }
  0x74   :  { %v341_v52 = vld [vmem:[#allocation2 + $0x788] sm:$0xff]  ;;  %v591_v9 = vadd.f32 %v590_v1, %v589_v57  ;;  %v480_v18 = vrot.slane %v479_v8, 1  ;;  %5189 = vmatprep.subr.bf16.mxu0 %v5575_v17  ;;  %v180_v1 = vld [vmem:[#allocation2 + $0x280] sm:$0xff] }
  0x75   :  { %5146 = vmatpush3.bf16.msra.mxu1 %v5568_v22  ;;  %v1036_v62 = vrot.slane %v1035_v55, 4  ;;  %v1147_v63 = vadd.f32 %v341_v52, %v325_v47  ;;  %v925_v3 = vadd.f32 %v924_v59, %v923_v51  ;;  %v814_v10 = vrot.slane %v813_v2, 2  ;;  %v148_v47 = vld [vmem:[#allocation2 + $0x180] sm:$0xff] }
  0x76   :  { %5147 = vmatprep.subr.bf16.mxu1 %v5570_v24  ;;  %v703_v13 = vadd.f32 %v702_v5, %v701_v61  ;;  %v592_v19 = vrot.slane %v591_v9, 1  ;;  %v369_v22 = vadd.f32 %v368_v12, %v367_v4  ;;  %v5581_v61 = vld [vmem:[#allocation7 + $0x138] sm:$0xff]   ;;  %v356_v4 = vadd.f32 %v116_v40, %v100_v39  ;;  %v276_v17 = vld [vmem:[#allocation2 + $0x580] sm:$0xff] }
  0x77   :  { %v1037_v6 = vadd.f32 %v1036_v62, %v1035_v55  ;;  %v1148_v7 = vrot.slane %v1147_v63, 4  ;;  %v926_v11 = vrot.slane %v925_v3, 2  ;;  %v815_v20 = vadd.f32 %v814_v10, %v813_v2  ;;  %5190 = vmatpush3.bf16.msra.mxu0 %v5577_v30  ;;  %v196_v2 = vld [vmem:[#allocation2 + $0x300] sm:$0xff] }
  0x78   :  { %v704_v23 = vrot.slane %v703_v13, 1  ;;  %v593_v27 = vadd.f32 %v592_v19, %v591_v9  ;;  %v1254_v34 = vmul.f32 0.0625, %v369_v22  ;;  %5191 = vmatprep.subr.bf16.mxu0 %v5579_v41  ;;  %v244_v9 = vld [vmem:[#allocation2 + $0x480] sm:$0xff]  ;;  %v468_v10 = vadd.f32 %v148_v47, %v132_v46 }
  0x79   :  { %5148 = vmatpush3.bf16.msra.mxu1 %v5572_v26  ;;  %v1038_v14 = vrot.slane %v1037_v6, 2  ;;  %v1149_v15 = vadd.f32 %v1148_v7, %v1147_v63  ;;  %v927_v21 = vadd.f32 %v926_v11, %v925_v3  ;;  %v481_v26 = vadd.f32 %v480_v18, %v479_v8  ;;  %v212_v3 = vld [vmem:[#allocation2 + $0x380] sm:$0xff] }
  0x7a   :  { %5155 = vmatprep.subr.bf16.mxu1 %v5574_v16  ;;  %v816_v28 = vrot.slane %v815_v20, 1  ;;  %v705_v31 = vadd.f32 %v704_v23, %v703_v13  ;;  %v1286_v38 = vmul.f32 0.0625, %v593_v27  ;;  %v1382_v45 = vpack.c.bf16 %v1254_v34, %v1254_v34  ;;  %v228_v8 = vld [vmem:[#allocation2 + $0x400] sm:$0xff] }
  0x7b   :  { %v1039_v24 = vadd.f32 %v1038_v14, %v1037_v6  ;;  %v1150_v25 = vrot.slane %v1149_v15, 2  ;;  %v928_v29 = vrot.slane %v927_v21, 1  ;;  %v1270_v37 = vmul.f32 0.0625, %v481_v26  ;;  %5192 = vmatpush3.bf16.msra.mxu0 %v5581_v61  ;;  %v260_v16 = vld [vmem:[#allocation2 + $0x500] sm:$0xff] }
  0x7c   :  { %v817_v35 = vadd.f32 %v816_v28, %v815_v20  ;;  %v1302_v44 = vmul.f32 0.0625, %v705_v31  ;;  %v1414_v51 = vpack.c.bf16 %v1286_v38, %v1286_v38  ;;  %v1901_v55 = vunpack.c.l.b16 %v1382_v45  ;;  %v292_v26 = vld [vmem:[#allocation2 + $0x600] sm:$0xff] }
  0x7d   :  { %v1040_v32 = vrot.slane %v1039_v24, 1  ;;  %v1151_v33 = vadd.f32 %v1150_v25, %v1149_v15  ;;  %v929_v36 = vadd.f32 %v928_v29, %v927_v21  ;;  %v1398_v50 = vpack.c.bf16 %v1270_v37, %v1270_v37  ;;  %v308_v27 = vld [vmem:[#allocation2 + $0x680] sm:$0xff] }
  0x7e   :  { %v1318_v48 = vmul.f32 0.0625, %v817_v35  ;;  %v1430_v54 = vpack.c.bf16 %v1302_v44, %v1302_v44  ;;  %v1933_v60 = vunpack.c.l.b16 %v1414_v51  ;;  %v357_v14 = vrot.slane %v356_v4, 4  ;;  %v340_v38 = vld [vmem:[#allocation2 + $0x780] sm:$0xff] }
  0x7f   :  { %v1041_v42 = vadd.f32 %v1040_v32, %v1039_v24  ;;  %v1152_v43 = vrot.slane %v1151_v33, 1  ;;  %v1334_v49 = vmul.f32 0.0625, %v929_v36  ;;  %v1917_v59 = vunpack.c.l.b16 %v1398_v50  ;;  %v324_v32 = vld [vmem:[#allocation2 + $0x700] sm:$0xff] }
  0x80   :  { %v1446_v57 = vpack.c.bf16 %v1318_v48, %v1318_v48  ;;  %v1949_v0 = vunpack.c.l.b16 %v1430_v54  ;;  %v469_v18 = vrot.slane %v468_v10, 4  ;;  %v580_v19 = vadd.f32 %v180_v1, %v164_v56  ;;  %v5583_v36 = vld [vmem:[#allocation7 + $0x240] sm:$0xff]  }
  0x81   :  { %v1153_v52 = vadd.f32 %v1152_v43, %v1151_v33  ;;  %v1350_v53 = vmul.f32 0.0625, %v1041_v42  ;;  %v1462_v58 = vpack.c.bf16 %v1334_v49, %v1334_v49  ;;  %v2042_v7 = vsel %vm2028_vm0, %v1917_v59, %v1901_v55  ;;  %5221 = vmatprep.subr.bf16.mxu0 %v5583_v36 }
  0x82   :  { %v1965_v5 = vunpack.c.l.b16 %v1446_v57  ;;  %v2043_v13 = vsel %vm2030_vm1, %v1933_v60, %v2042_v7  ;;  %v692_v20 = vadd.f32 %v212_v3, %v196_v2  ;;  %v358_v23 = vadd.f32 %v357_v14, %v356_v4  ;;  %v105_v14 = vld [vmem:[#allocation2 + $0x28] sm:$0xff] }
  0x83   :  { %v1366_v62 = vmul.f32 0.0625, %v1153_v52  ;;  %v1478_v63 = vpack.c.bf16 %v1350_v53, %v1350_v53  ;;  %v1981_v6 = vunpack.c.l.b16 %v1462_v58  ;;  %v2044_v15 = vsel %vm2032_vm2, %v1949_v0, %v2043_v13 }
  0x84   :  { %v2045_v22 = vsel %vm2034_vm3, %v1965_v5, %v2044_v15  ;;  %v804_v24 = vadd.f32 %v244_v9, %v228_v8  ;;  %v470_v28 = vadd.f32 %v469_v18, %v468_v10  ;;  %v581_v29 = vrot.slane %v580_v19, 4  ;;  %v121_v15 = vld [vmem:[#allocation2 + $0xa8] sm:$0xff] }
  0x85   :  { %v1494_v11 = vpack.c.bf16 %v1366_v62, %v1366_v62  ;;  %v1997_v12 = vunpack.c.l.b16 %v1478_v63  ;;  %v2046_v25 = vsel %vm2036_vm4, %v1981_v6, %v2045_v22  ;;  %v693_v30 = vrot.slane %v692_v20, 4 }
  0x86   :  { %v359_v33 = vrot.slane %v358_v23, 2  ;;  %v805_v34 = vrot.slane %v804_v24, 4  ;;  %v916_v35 = vadd.f32 %v276_v17, %v260_v16  ;;  %v471_v39 = vrot.slane %v470_v28, 2 }
  0x87   :  { %v2013_v21 = vunpack.c.l.b16 %v1494_v11  ;;  %v2047_v31 = vsel %vm2038_vm5, %v1997_v12, %v2046_v25  ;;  %v582_v40 = vadd.f32 %v581_v29, %v580_v19  ;;  %v694_v41 = vadd.f32 %v693_v30, %v692_v20  ;;  %v153_v25 = vld [vmem:[#allocation2 + $0x1a8] sm:$0xff] }
  0x88   :  { %v360_v43 = vadd.f32 %v359_v33, %v358_v23  ;;  %v806_v44 = vadd.f32 %v805_v34, %v804_v24  ;;  %v917_v45 = vrot.slane %v916_v35, 4  ;;  %v472_v46 = vadd.f32 %v471_v39, %v470_v28  ;;  %v137_v24 = vld [vmem:[#allocation2 + $0x128] sm:$0xff] }
  0x89   :  { %v2048_v37 = vsel %vm2040_vm6, %v2013_v21, %v2047_v31  ;;  %v583_v47 = vrot.slane %v582_v40, 2  ;;  %v695_v48 = vrot.slane %v694_v41, 2  ;;  %v1028_v49 = vadd.f32 %v308_v27, %v292_v26  ;;  %v169_v26 = vld [vmem:[#allocation2 + $0x228] sm:$0xff] }
  0x8a   :  { %v6146_v42 = vpack.c.b16 %v2048_v37, %v2048_v37  ;;  %v361_v50 = vrot.slane %v360_v43, 1  ;;  %v807_v51 = vrot.slane %v806_v44, 2  ;;  %v918_v52 = vadd.f32 %v917_v45, %v916_v35  ;;  %v185_v31 = vld [vmem:[#allocation2 + $0x2a8] sm:$0xff] }
  0x8b   :  { %v1140_v53 = vadd.f32 %v340_v38, %v324_v32  ;;  %v473_v54 = vrot.slane %v472_v46, 1  ;;  %v584_v55 = vadd.f32 %v583_v47, %v582_v40  ;;  %v696_v56 = vadd.f32 %v695_v48, %v694_v41  ;;  %v201_v40 = vld [vmem:[#allocation2 + $0x328] sm:$0xff] }
  0x8c   :  { %2979 = vmatprep.mubr.bf16.mxu1 %v6146_v42  ;;  %v1029_v57 = vrot.slane %v1028_v49, 4  ;;  %v362_v58 = vadd.f32 %v361_v50, %v360_v43  ;;  %v808_v59 = vadd.f32 %v807_v51, %v806_v44  ;;  %v919_v60 = vrot.slane %v918_v52, 2  ;;  %v217_v45 = vld [vmem:[#allocation2 + $0x3a8] sm:$0xff] }
  0x8d   :  { %v1141_v61 = vrot.slane %v1140_v53, 4  ;;  %v474_v62 = vadd.f32 %v473_v54, %v472_v46  ;;  %v585_v63 = vrot.slane %v584_v55, 1  ;;  %v697_v0 = vrot.slane %v696_v56, 1 }
  0x8e   :  { %v1030_v1 = vadd.f32 %v1029_v57, %v1028_v49  ;;  %v809_v2 = vrot.slane %v808_v59, 1  ;;  %v920_v3 = vadd.f32 %v919_v60, %v918_v52  ;;  %v1253_v5 = vmul.f32 0.0625, %v362_v58  ;;  %v233_v49 = vld [vmem:[#allocation2 + $0x428] sm:$0xff] }
  0x8f   :  { %v1142_v4 = vadd.f32 %v1141_v61, %v1140_v53  ;;  %v586_v6 = vadd.f32 %v585_v63, %v584_v55  ;;  %v698_v7 = vadd.f32 %v697_v0, %v696_v56  ;;  %v1269_v9 = vmul.f32 0.0625, %v474_v62  ;;  %v249_v55 = vld [vmem:[#allocation2 + $0x4a8] sm:$0xff] }
  0x90   :  { %v1031_v8 = vrot.slane %v1030_v1, 2  ;;  %v810_v10 = vadd.f32 %v809_v2, %v808_v59  ;;  %v921_v11 = vrot.slane %v920_v3, 1  ;;  %v1381_v13 = vpack.c.bf16 %v1253_v5, %v1253_v5  ;;  %v265_v59 = vld [vmem:[#allocation2 + $0x528] sm:$0xff] }
  0x91   :  { %v1143_v12 = vrot.slane %v1142_v4, 2  ;;  %v1285_v17 = vmul.f32 0.0625, %v586_v6  ;;  %v1301_v18 = vmul.f32 0.0625, %v698_v7  ;;  %v1397_v19 = vpack.c.bf16 %v1269_v9, %v1269_v9  ;;  %v281_v60 = vld [vmem:[#allocation2 + $0x5a8] sm:$0xff] }
  0x92   :  { %v1032_v16 = vadd.f32 %v1031_v8, %v1030_v1  ;;  %v922_v20 = vadd.f32 %v921_v11, %v920_v3  ;;  %v1317_v22 = vmul.f32 0.0625, %v810_v10  ;;  %v1900_v23 = vunpack.c.l.b16 %v1381_v13  ;;  %v5576_v8 = vld [vmem:[#allocation7 + $0x80] sm:$0xff]   ;;  %v297_v9 = vld [vmem:[#allocation2 + $0x628] sm:$0xff] }
  0x93   :  { %v1144_v21 = vadd.f32 %v1143_v12, %v1142_v4  ;;  %v1413_v28 = vpack.c.bf16 %v1285_v17, %v1285_v17  ;;  %v1429_v29 = vpack.c.bf16 %v1301_v18, %v1301_v18  ;;  %v1916_v30 = vunpack.c.l.b16 %v1397_v19 }
  0x94   :  { %v1033_v27 = vrot.slane %v1032_v16, 1  ;;  %v1333_v33 = vmul.f32 0.0625, %v922_v20  ;;  %v1445_v34 = vpack.c.bf16 %v1317_v22, %v1317_v22  ;;  %v391_v35 = vadd.f32 %v121_v15, %v105_v14  ;;  %v5578_v14 = vld [vmem:[#allocation7 + $0xc8] sm:$0xff]  }
  0x95   :  { %v1145_v32 = vrot.slane %v1144_v21, 1  ;;  %v1932_v37 = vunpack.c.l.b16 %v1413_v28  ;;  %v1948_v38 = vunpack.c.l.b16 %v1429_v29  ;;  %v2029_v39 = vsel %vm2028_vm0, %v1916_v30, %v1900_v23  ;;  %v313_v15 = vld [vmem:[#allocation2 + $0x6a8] sm:$0xff] }
  0x96   :  { %v1034_v36 = vadd.f32 %v1033_v27, %v1032_v16  ;;  %v1461_v43 = vpack.c.bf16 %v1333_v33, %v1333_v33  ;;  %v1964_v44 = vunpack.c.l.b16 %v1445_v34  ;;  %v392_v46 = vrot.slane %v391_v35, 4  ;;  %v329_v20 = vld [vmem:[#allocation2 + $0x728] sm:$0xff] }
  0x97   :  { %v1146_v41 = vadd.f32 %v1145_v32, %v1144_v21  ;;  %v2031_v48 = vsel %vm2030_vm1, %v1932_v37, %v2029_v39  ;;  %v503_v50 = vadd.f32 %v153_v25, %v137_v24  ;;  %v615_v51 = vadd.f32 %v185_v31, %v169_v26  ;;  %v345_v21 = vld [vmem:[#allocation2 + $0x7a8] sm:$0xff] }
  0x98   :  { %v1349_v47 = vmul.f32 0.0625, %v1034_v36  ;;  %v1980_v53 = vunpack.c.l.b16 %v1461_v43  ;;  %v2033_v54 = vsel %vm2032_vm2, %v1948_v38, %v2031_v48  ;;  %v393_v56 = vadd.f32 %v392_v46, %v391_v35  ;;  %v5580_v37 = vld [vmem:[#allocation7 + $0x88] sm:$0xff]   ;;  %v5582_v43 = vld [vmem:[#allocation7 + $0xd0] sm:$0xff]  }
  0x99   :  { %v1365_v52 = vmul.f32 0.0625, %v1146_v41  ;;  %v2035_v58 = vsel %vm2034_vm3, %v1964_v44, %v2033_v54  ;;  %v504_v61 = vrot.slane %v503_v50, 4  ;;  %v616_v62 = vrot.slane %v615_v51, 4 }
  0x9a   :  { %v1477_v57 = vpack.c.bf16 %v1349_v47, %v1349_v47  ;;  %v2037_v0 = vsel %vm2036_vm4, %v1980_v53, %v2035_v58  ;;  %v394_v1 = vrot.slane %v393_v56, 2  ;;  %v727_v2 = vadd.f32 %v217_v45, %v201_v40 }
  0x9b   :  { %v1493_v63 = vpack.c.bf16 %v1365_v52, %v1365_v52  ;;  %v505_v4 = vadd.f32 %v504_v61, %v503_v50  ;;  %v617_v5 = vadd.f32 %v616_v62, %v615_v51  ;;  %v839_v6 = vadd.f32 %v249_v55, %v233_v49  ;;  %v5584_v62 = vld [vmem:[#allocation7 + $0x90] sm:$0xff]  }
  0x9c   :  { %v1996_v3 = vunpack.c.l.b16 %v1477_v57  ;;  %v395_v10 = vadd.f32 %v394_v1, %v393_v56  ;;  %v728_v11 = vrot.slane %v727_v2, 4  ;;  %v951_v12 = vadd.f32 %v281_v60, %v265_v59  ;;  %v104_v56 = vld [vmem:[#allocation2 + $0x20] sm:$0xff] }
  0x9d   :  { %v2012_v7 = vunpack.c.l.b16 %v1493_v63  ;;  %v506_v16 = vrot.slane %v505_v4, 2  ;;  %v618_v17 = vrot.slane %v617_v5, 2  ;;  %v840_v18 = vrot.slane %v839_v6, 4  ;;  %v120_v57 = vld [vmem:[#allocation2 + $0xa0] sm:$0xff] }
  0x9e   :  { %v2039_v13 = vsel %vm2038_vm5, %v1996_v3, %v2037_v0  ;;  %v396_v22 = vrot.slane %v395_v10, 1  ;;  %v729_v23 = vadd.f32 %v728_v11, %v727_v2  ;;  %v952_v24 = vrot.slane %v951_v12, 4  ;;  %v5586_v3 = vld [vmem:[#allocation7 + $0xd8] sm:$0xff]  }
  0x9f   :  { %v2041_v19 = vsel %vm2040_vm6, %v2012_v7, %v2039_v13  ;;  %v507_v26 = vadd.f32 %v506_v16, %v505_v4  ;;  %v619_v27 = vadd.f32 %v618_v17, %v617_v5  ;;  %v841_v28 = vadd.f32 %v840_v18, %v839_v6  ;;  %v136_v7 = vld [vmem:[#allocation2 + $0x120] sm:$0xff]  ;;  %v5588_v18 = vld [vmem:[#allocation7 + $0x98] sm:$0xff]  }
  0xa0   :  { %v6156_v25 = vpack.c.b16 %v2041_v19, %v2041_v19  ;;  %v397_v29 = vadd.f32 %v396_v22, %v395_v10  ;;  %v730_v30 = vrot.slane %v729_v23, 2  ;;  %v953_v31 = vadd.f32 %v952_v24, %v951_v12  ;;  %v168_v22 = vld [vmem:[#allocation2 + $0x220] sm:$0xff] }
  0xa1   :  { %v1063_v32 = vadd.f32 %v313_v15, %v297_v9  ;;  %v508_v33 = vrot.slane %v507_v26, 1  ;;  %v620_v34 = vrot.slane %v619_v27, 1  ;;  %v842_v35 = vrot.slane %v841_v28, 2 }
  0xa2   :  { %2980 = vmatmul.mubr.bf16.vlgmr.msra.gmra.mrb[0].mxu1 %v6156_v25  ;;  %v1175_v36 = vadd.f32 %v345_v21, %v329_v20  ;;  %v731_v38 = vadd.f32 %v730_v30, %v729_v23  ;;  %v954_v39 = vrot.slane %v953_v31, 2  ;;  %v1258_v41 = vmul.f32 0.0625, %v397_v29  ;;  %v184_v23 = vld [vmem:[#allocation2 + $0x2a0] sm:$0xff] }
  0xa3   :  { %5156 = vmatpush3.bf16.msra.mxu1 %v5576_v8  ;;  %v1064_v40 = vrot.slane %v1063_v32, 4  ;;  %v509_v44 = vadd.f32 %v508_v33, %v507_v26  ;;  %v621_v45 = vadd.f32 %v620_v34, %v619_v27  ;;  %v843_v46 = vadd.f32 %v842_v35, %v841_v28  ;;  %v152_v8 = vld [vmem:[#allocation2 + $0x1a0] sm:$0xff] }
  0xa4   :  { %5157 = vmatprep.subr.bf16.mxu1 %v5578_v14  ;;  %v1176_v47 = vrot.slane %v1175_v36, 4  ;;  %v732_v48 = vrot.slane %v731_v38, 1  ;;  %v955_v49 = vadd.f32 %v954_v39, %v953_v31  ;;  %v1386_v51 = vpack.c.bf16 %v1258_v41, %v1258_v41  ;;  %v5590_v26 = vld [vmem:[#allocation7 + $0xe0] sm:$0xff]  }
  0xa5   :  { %v1065_v50 = vadd.f32 %v1064_v40, %v1063_v32  ;;  %v844_v52 = vrot.slane %v843_v46, 1  ;;  %v1274_v54 = vmul.f32 0.0625, %v509_v44  ;;  %v1290_v55 = vmul.f32 0.0625, %v621_v45  ;;  %v200_v31 = vld [vmem:[#allocation2 + $0x320] sm:$0xff] }
  0xa6   :  { %v1177_v53 = vadd.f32 %v1176_v47, %v1175_v36  ;;  %v733_v58 = vadd.f32 %v732_v48, %v731_v38  ;;  %v956_v59 = vrot.slane %v955_v49, 1  ;;  %v1905_v61 = vunpack.c.l.b16 %v1386_v51  ;;  %v216_v32 = vld [vmem:[#allocation2 + $0x3a0] sm:$0xff]  ;;  %v5594_v47 = vld [vmem:[#allocation7 + $0xe8] sm:$0xff]  }
  0xa7   :  { %5158 = vmatpush3.bf16.msra.mxu1 %v5580_v37  ;;  %v1066_v60 = vrot.slane %v1065_v50, 2  ;;  %v845_v63 = vadd.f32 %v844_v52, %v843_v46  ;;  %v1402_v1 = vpack.c.bf16 %v1274_v54, %v1274_v54  ;;  %v1418_v2 = vpack.c.bf16 %v1290_v55, %v1290_v55  ;;  %v232_v35 = vld [vmem:[#allocation2 + $0x420] sm:$0xff] }
  0xa8   :  { %5159 = vmatprep.subr.bf16.mxu1 %v5582_v43  ;;  %v1178_v0 = vrot.slane %v1177_v53, 2  ;;  %v957_v4 = vadd.f32 %v956_v59, %v955_v49  ;;  %v1306_v6 = vmul.f32 0.0625, %v733_v58  ;;  %v384_v9 = vadd.f32 %v120_v57, %v104_v56  ;;  %v248_v36 = vld [vmem:[#allocation2 + $0x4a0] sm:$0xff] }
  0xa9   :  { %v1067_v5 = vadd.f32 %v1066_v60, %v1065_v50  ;;  %v1322_v11 = vmul.f32 0.0625, %v845_v63  ;;  %v1921_v12 = vunpack.c.l.b16 %v1402_v1  ;;  %v1937_v13 = vunpack.c.l.b16 %v1418_v2  ;;  %v264_v37 = vld [vmem:[#allocation2 + $0x520] sm:$0xff] }
  0xaa   :  { %v1179_v10 = vadd.f32 %v1178_v0, %v1177_v53  ;;  %v1338_v15 = vmul.f32 0.0625, %v957_v4  ;;  %v1434_v16 = vpack.c.bf16 %v1306_v6, %v1306_v6  ;;  %v385_v17 = vrot.slane %v384_v9, 4  ;;  %v280_v44 = vld [vmem:[#allocation2 + $0x5a0] sm:$0xff] }
  0xab   :  { %v1068_v14 = vrot.slane %v1067_v5, 1  ;;  %5160 = vmatpush3.bf16.msra.mxu1 %v5584_v62  ;;  %v1450_v20 = vpack.c.bf16 %v1322_v11, %v1322_v11  ;;  %v2070_v21 = vsel %vm2028_vm0, %v1921_v12, %v1905_v61  ;;  %v496_v24 = vadd.f32 %v152_v8, %v136_v7  ;;  %v5592_v46 = vld [vmem:[#allocation7 + $0xa0] sm:$0xff]  }
  0xac   :  { %v1180_v19 = vrot.slane %v1179_v10, 1  ;;  %5161 = vmatprep.subr.bf16.mxu1 %v5586_v3  ;;  %v1466_v28 = vpack.c.bf16 %v1338_v15, %v1338_v15  ;;  %v1953_v29 = vunpack.c.l.b16 %v1434_v16  ;;  %v2071_v30 = vsel %vm2030_vm1, %v1937_v13, %v2070_v21  ;;  %v296_v61 = vld [vmem:[#allocation2 + $0x620] sm:$0xff]  ;;  %v5596_v3 = vld [vmem:[#allocation7 + $0xa8] sm:$0xff]  }
  0xad   :  { %v1069_v27 = vadd.f32 %v1068_v14, %v1067_v5  ;;  %v1969_v34 = vunpack.c.l.b16 %v1450_v20  ;;  %v386_v38 = vadd.f32 %v385_v17, %v384_v9  ;;  %v497_v39 = vrot.slane %v496_v24, 4  ;;  %v312_v62 = vld [vmem:[#allocation2 + $0x6a0] sm:$0xff]  ;;  %v5598_v9 = vld [vmem:[#allocation7 + $0xf0] sm:$0xff]  }
  0xae   :  { %v1181_v33 = vadd.f32 %v1180_v19, %v1179_v10  ;;  %v1985_v41 = vunpack.c.l.b16 %v1466_v28  ;;  %v2072_v43 = vsel %vm2032_vm2, %v1953_v29, %v2071_v30  ;;  %v608_v45 = vadd.f32 %v184_v23, %v168_v22  ;;  %v328_v63 = vld [vmem:[#allocation2 + $0x720] sm:$0xff]  ;;  %v5600_v22 = vld [vmem:[#allocation7 + $0xb0] sm:$0xff]   ;;  %v5602_v28 = vld [vmem:[#allocation7 + $0xf8] sm:$0xff]  }
  0xaf   :  { %v1354_v40 = vmul.f32 0.0625, %v1069_v27  ;;  %5162 = vmatpush3.bf16.msra.mxu1 %v5588_v18  ;;  %v2073_v49 = vsel %vm2034_vm3, %v1969_v34, %v2072_v43  ;;  %v387_v50 = vrot.slane %v386_v38, 2  ;;  %v498_v51 = vadd.f32 %v497_v39, %v496_v24  ;;  %v344_v5 = vld [vmem:[#allocation2 + $0x7a0] sm:$0xff] }
  0xb0   :  { %v1370_v48 = vmul.f32 0.0625, %v1181_v33  ;;  %5163 = vmatprep.subr.bf16.mxu1 %v5590_v26  ;;  %v2074_v53 = vsel %vm2036_vm4, %v1985_v41, %v2073_v49  ;;  %v609_v54 = vrot.slane %v608_v45, 4  ;;  %v720_v55 = vadd.f32 %v216_v32, %v200_v31  ;;  %v5604_v41 = vld [vmem:[#allocation7 + $0xb8] sm:$0xff]   ;;  %v5606_v49 = vld [vmem:[#allocation7 + $0x1c0] sm:$0xff]  }
  0xb1   :  { %v1482_v52 = vpack.c.bf16 %v1354_v40, %v1354_v40  ;;  %v388_v57 = vadd.f32 %v387_v50, %v386_v38  ;;  %v499_v58 = vrot.slane %v498_v51, 2  ;;  %v832_v59 = vadd.f32 %v248_v36, %v232_v35 }
  0xb2   :  { %v1498_v56 = vpack.c.bf16 %v1370_v48, %v1370_v48  ;;  %v610_v0 = vadd.f32 %v609_v54, %v608_v45  ;;  %v721_v1 = vrot.slane %v720_v55, 4  ;;  %v944_v2 = vadd.f32 %v280_v44, %v264_v37  ;;  %v119_v48 = vld [vmem:[#allocation2 + $0x98] sm:$0xff] }
  0xb3   :  { %v2001_v60 = vunpack.c.l.b16 %v1482_v52  ;;  %5164 = vmatpush3.bf16.msra.mxu1 %v5592_v46  ;;  %v389_v6 = vrot.slane %v388_v57, 1  ;;  %v500_v7 = vadd.f32 %v499_v58, %v498_v51  ;;  %v833_v8 = vrot.slane %v832_v59, 4  ;;  %v135_v58 = vld [vmem:[#allocation2 + $0x118] sm:$0xff] }
  0xb4   :  { %v2017_v4 = vunpack.c.l.b16 %v1498_v56  ;;  %5165 = vmatprep.subr.bf16.mxu1 %v5594_v47  ;;  %v611_v11 = vrot.slane %v610_v0, 2  ;;  %v722_v12 = vadd.f32 %v721_v1, %v720_v55  ;;  %v945_v13 = vrot.slane %v944_v2, 4  ;;  %v103_v47 = vld [vmem:[#allocation2 + $0x18] sm:$0xff] }
  0xb5   :  { %v2075_v10 = vsel %vm2038_vm5, %v2001_v60, %v2074_v53  ;;  %v390_v15 = vadd.f32 %v389_v6, %v388_v57  ;;  %v501_v16 = vrot.slane %v500_v7, 1  ;;  %v834_v17 = vadd.f32 %v833_v8, %v832_v59 }
  0xb6   :  { %v2076_v14 = vsel %vm2040_vm6, %v2017_v4, %v2075_v10  ;;  %v612_v19 = vadd.f32 %v611_v11, %v610_v0  ;;  %v723_v20 = vrot.slane %v722_v12, 2  ;;  %v946_v21 = vadd.f32 %v945_v13, %v944_v2  ;;  %v167_v11 = vld [vmem:[#allocation2 + $0x218] sm:$0xff] }
  0xb7   :  { %v6166_v18 = vpack.c.b16 %v2076_v14, %v2076_v14  ;;  %5166 = vmatpush3.bf16.msra.mxu1 %v5596_v3  ;;  %v502_v23 = vadd.f32 %v501_v16, %v500_v7  ;;  %v835_v24 = vrot.slane %v834_v17, 2  ;;  %v1056_v26 = vadd.f32 %v312_v62, %v296_v61  ;;  %v151_v62 = vld [vmem:[#allocation2 + $0x198] sm:$0xff] }
  0xb8   :  { %v1168_v27 = vadd.f32 %v344_v5, %v328_v63  ;;  %5167 = vmatprep.subr.bf16.mxu1 %v5598_v9  ;;  %v613_v29 = vrot.slane %v612_v19, 1  ;;  %v724_v30 = vadd.f32 %v723_v20, %v722_v12  ;;  %v947_v31 = vrot.slane %v946_v21, 2  ;;  %v183_v12 = vld [vmem:[#allocation2 + $0x298] sm:$0xff] }
  0xb9   :  { %3059 = vmatprep.mubr.bf16.mxu0 %v6166_v18  ;;  %v1257_v32 = vmul.f32 0.0625, %v390_v15  ;;  %v836_v33 = vadd.f32 %v835_v24, %v834_v17  ;;  %v1057_v34 = vrot.slane %v1056_v26, 4  ;;  %v1273_v36 = vmul.f32 0.0625, %v502_v23  ;;  %v215_v23 = vld [vmem:[#allocation2 + $0x398] sm:$0xff] }
  0xba   :  { %v1169_v35 = vrot.slane %v1168_v27, 4  ;;  %v614_v37 = vadd.f32 %v613_v29, %v612_v19  ;;  %v725_v38 = vrot.slane %v724_v30, 1  ;;  %v948_v39 = vadd.f32 %v947_v31, %v946_v21  ;;  %v247_v29 = vld [vmem:[#allocation2 + $0x498] sm:$0xff] }
  0xbb   :  { %v1385_v40 = vpack.c.bf16 %v1257_v32, %v1257_v32  ;;  %5168 = vmatpush3.bf16.msra.mxu1 %v5600_v22  ;;  %v837_v43 = vrot.slane %v836_v33, 1  ;;  %v1058_v44 = vadd.f32 %v1057_v34, %v1056_v26  ;;  %v1401_v46 = vpack.c.bf16 %v1273_v36, %v1273_v36  ;;  %v199_v22 = vld [vmem:[#allocation2 + $0x318] sm:$0xff] }
  0xbc   :  { %v1170_v45 = vadd.f32 %v1169_v35, %v1168_v27  ;;  %5169 = vmatprep.subr.bf16.mxu1 %v5602_v28  ;;  %v726_v50 = vadd.f32 %v725_v38, %v724_v30  ;;  %v949_v51 = vrot.slane %v948_v39, 1  ;;  %v1289_v52 = vmul.f32 0.0625, %v614_v37  ;;  %v231_v28 = vld [vmem:[#allocation2 + $0x418] sm:$0xff] }
  0xbd   :  { %v1904_v53 = vunpack.c.l.b16 %v1385_v40  ;;  %v838_v54 = vadd.f32 %v837_v43, %v836_v33  ;;  %v1059_v55 = vrot.slane %v1058_v44, 2  ;;  %v1920_v57 = vunpack.c.l.b16 %v1401_v46  ;;  %v263_v35 = vld [vmem:[#allocation2 + $0x518] sm:$0xff] }
  0xbe   :  { %v1171_v56 = vrot.slane %v1170_v45, 2  ;;  %v950_v59 = vadd.f32 %v949_v51, %v948_v39  ;;  %v1305_v60 = vmul.f32 0.0625, %v726_v50  ;;  %v1417_v61 = vpack.c.bf16 %v1289_v52, %v1289_v52  ;;  %v279_v36 = vld [vmem:[#allocation2 + $0x598] sm:$0xff] }
  0xbf   :  { %5170 = vmatpush3.bf16.msra.mxu1 %v5604_v41  ;;  %v377_v63 = vadd.f32 %v119_v48, %v103_v47  ;;  %v1060_v0 = vadd.f32 %v1059_v55, %v1058_v44  ;;  %v1321_v2 = vmul.f32 0.0625, %v838_v54  ;;  %v2063_v3 = vsel %vm2028_vm0, %v1920_v57, %v1904_v53  ;;  %v295_v47 = vld [vmem:[#allocation2 + $0x618] sm:$0xff] }
  0xc0   :  { %v1172_v1 = vadd.f32 %v1171_v56, %v1170_v45  ;;  %5199 = vmatprep.subr.bf16.mxu1 %v5606_v49  ;;  %v1337_v4 = vmul.f32 0.0625, %v950_v59  ;;  %v1433_v5 = vpack.c.bf16 %v1305_v60, %v1305_v60  ;;  %v1936_v6 = vunpack.c.l.b16 %v1417_v61  ;;  %v311_v48 = vld [vmem:[#allocation2 + $0x698] sm:$0xff] }
  0xc1   :  { %v378_v7 = vrot.slane %v377_v63, 4  ;;  %v1061_v8 = vrot.slane %v1060_v0, 1  ;;  %v1449_v10 = vpack.c.bf16 %v1321_v2, %v1321_v2  ;;  %v489_v13 = vadd.f32 %v151_v62, %v135_v58  ;;  %v327_v55 = vld [vmem:[#allocation2 + $0x718] sm:$0xff]  ;;  %v5585_v58 = vld [vmem:[#allocation7 + $0x200] sm:$0xff]  }
  0xc2   :  { %v1173_v9 = vrot.slane %v1172_v1, 1  ;;  %v1465_v14 = vpack.c.bf16 %v1337_v4, %v1337_v4  ;;  %v1952_v15 = vunpack.c.l.b16 %v1433_v5  ;;  %v2064_v16 = vsel %vm2030_vm1, %v1936_v6, %v2063_v3  ;;  %v5587_v5 = vld [vmem:[#allocation7 + $0x248] sm:$0xff]  }
  0xc3   :  { %v379_v17 = vadd.f32 %v378_v7, %v377_v63  ;;  %v1062_v19 = vadd.f32 %v1061_v8, %v1060_v0  ;;  %v1968_v21 = vunpack.c.l.b16 %v1449_v10  ;;  %v490_v24 = vrot.slane %v489_v13, 4  ;;  %v343_v0 = vld [vmem:[#allocation2 + $0x798] sm:$0xff] }
  0xc4   :  { %v1174_v20 = vadd.f32 %v1173_v9, %v1172_v1  ;;  %v1984_v26 = vunpack.c.l.b16 %v1465_v14  ;;  %v2065_v27 = vsel %vm2032_vm2, %v1952_v15, %v2064_v16  ;;  %v601_v31 = vadd.f32 %v183_v12, %v167_v11 }
  0xc5   :  { %v380_v30 = vrot.slane %v379_v17, 2  ;;  %v1353_v32 = vmul.f32 0.0625, %v1062_v19  ;;  %v2066_v34 = vsel %vm2034_vm3, %v1968_v21, %v2065_v27  ;;  %v491_v37 = vadd.f32 %v490_v24, %v489_v13  ;;  %v5589_v13 = vld [vmem:[#allocation7 + $0x208] sm:$0xff]   ;;  %v5591_v19 = vld [vmem:[#allocation7 + $0x250] sm:$0xff]  }
  0xc6   :  { %v1369_v33 = vmul.f32 0.0625, %v1174_v20  ;;  %v2067_v38 = vsel %vm2036_vm4, %v1984_v26, %v2066_v34  ;;  %v602_v40 = vrot.slane %v601_v31, 4  ;;  %v713_v41 = vadd.f32 %v215_v23, %v199_v22 }
  0xc7   :  { %v381_v39 = vadd.f32 %v380_v30, %v379_v17  ;;  %v1481_v43 = vpack.c.bf16 %v1353_v32, %v1353_v32  ;;  %v492_v45 = vrot.slane %v491_v37, 2  ;;  %v825_v46 = vadd.f32 %v247_v29, %v231_v28  ;;  %v102_v29 = vld [vmem:[#allocation2 + $0x10] sm:$0xff] }
  0xc8   :  { %v1497_v44 = vpack.c.bf16 %v1369_v33, %v1369_v33  ;;  %v603_v50 = vadd.f32 %v602_v40, %v601_v31  ;;  %v714_v51 = vrot.slane %v713_v41, 4  ;;  %v937_v52 = vadd.f32 %v279_v36, %v263_v35  ;;  %v118_v30 = vld [vmem:[#allocation2 + $0x90] sm:$0xff]  ;;  %v5595_v40 = vld [vmem:[#allocation7 + $0x258] sm:$0xff]  }
  0xc9   :  { %v382_v49 = vrot.slane %v381_v39, 1  ;;  %v2000_v53 = vunpack.c.l.b16 %v1481_v43  ;;  %v493_v56 = vadd.f32 %v492_v45, %v491_v37  ;;  %v826_v57 = vrot.slane %v825_v46, 4  ;;  %v5593_v35 = vld [vmem:[#allocation7 + $0x210] sm:$0xff]  }
  0xca   :  { %v2016_v54 = vunpack.c.l.b16 %v1497_v44  ;;  %v604_v60 = vrot.slane %v603_v50, 2  ;;  %v715_v61 = vadd.f32 %v714_v51, %v713_v41  ;;  %v938_v62 = vrot.slane %v937_v52, 4  ;;  %v150_v51 = vld [vmem:[#allocation2 + $0x190] sm:$0xff] }
  0xcb   :  { %v383_v59 = vadd.f32 %v382_v49, %v381_v39  ;;  %v2068_v63 = vsel %vm2038_vm5, %v2000_v53, %v2067_v38  ;;  %v494_v1 = vrot.slane %v493_v56, 1  ;;  %v827_v2 = vadd.f32 %v826_v57, %v825_v46  ;;  %v5597_v57 = vld [vmem:[#allocation7 + $0x218] sm:$0xff]  }
  0xcc   :  { %v1049_v3 = vadd.f32 %v311_v48, %v295_v47  ;;  %v2069_v4 = vsel %vm2040_vm6, %v2016_v54, %v2068_v63  ;;  %v605_v6 = vadd.f32 %v604_v60, %v603_v50  ;;  %v716_v7 = vrot.slane %v715_v61, 2  ;;  %v134_v50 = vld [vmem:[#allocation2 + $0x110] sm:$0xff]  ;;  %v5599_v63 = vld [vmem:[#allocation7 + $0x260] sm:$0xff]  }
  0xcd   :  { %v939_v8 = vadd.f32 %v938_v62, %v937_v52  ;;  %v6176_v9 = vpack.c.b16 %v2069_v4, %v2069_v4  ;;  %v495_v10 = vadd.f32 %v494_v1, %v493_v56  ;;  %v828_v11 = vrot.slane %v827_v2, 2  ;;  %v182_v62 = vld [vmem:[#allocation2 + $0x290] sm:$0xff] }
  0xce   :  { %v1050_v12 = vrot.slane %v1049_v3, 4  ;;  %v606_v14 = vrot.slane %v605_v6, 1  ;;  %v717_v15 = vadd.f32 %v716_v7, %v715_v61  ;;  %v1161_v17 = vadd.f32 %v343_v0, %v327_v55  ;;  %v166_v55 = vld [vmem:[#allocation2 + $0x210] sm:$0xff] }
  0xcf   :  { %v940_v16 = vrot.slane %v939_v8, 2  ;;  %3060 = vmatmul.mubr.bf16.vlgmr.msra.gmra.mrb[0].mxu0 %v6176_v9  ;;  %v829_v20 = vadd.f32 %v828_v11, %v827_v2  ;;  %v1256_v22 = vmul.f32 0.0625, %v383_v59  ;;  %v1272_v23 = vmul.f32 0.0625, %v495_v10  ;;  %v198_v2 = vld [vmem:[#allocation2 + $0x310] sm:$0xff] }
  0xd0   :  { %v1051_v21 = vadd.f32 %v1050_v12, %v1049_v3  ;;  %5222 = vmatpush3.bf16.msra.mxu0 %v5585_v58  ;;  %v607_v24 = vadd.f32 %v606_v14, %v605_v6  ;;  %v718_v26 = vrot.slane %v717_v15, 1  ;;  %v1162_v28 = vrot.slane %v1161_v17, 4  ;;  %v214_v3 = vld [vmem:[#allocation2 + $0x390] sm:$0xff] }
  0xd1   :  { %v941_v27 = vadd.f32 %v940_v16, %v939_v8  ;;  %5223 = vmatprep.subr.bf16.mxu0 %v5587_v5  ;;  %v830_v31 = vrot.slane %v829_v20, 1  ;;  %v1384_v33 = vpack.c.bf16 %v1256_v22, %v1256_v22  ;;  %v1400_v34 = vpack.c.bf16 %v1272_v23, %v1272_v23  ;;  %v230_v11 = vld [vmem:[#allocation2 + $0x410] sm:$0xff] }
  0xd2   :  { %v1052_v32 = vrot.slane %v1051_v21, 2  ;;  %v719_v36 = vadd.f32 %v718_v26, %v717_v15  ;;  %v1163_v38 = vadd.f32 %v1162_v28, %v1161_v17  ;;  %v1288_v39 = vmul.f32 0.0625, %v607_v24  ;;  %v246_v14 = vld [vmem:[#allocation2 + $0x490] sm:$0xff] }
  0xd3   :  { %v942_v37 = vrot.slane %v941_v27, 1  ;;  %v831_v41 = vadd.f32 %v830_v31, %v829_v20  ;;  %v1903_v44 = vunpack.c.l.b16 %v1384_v33  ;;  %v1919_v45 = vunpack.c.l.b16 %v1400_v34  ;;  %v262_v15 = vld [vmem:[#allocation2 + $0x510] sm:$0xff]  ;;  %v5603_v34 = vld [vmem:[#allocation7 + $0x268] sm:$0xff]  }
  0xd4   :  { %v1053_v43 = vadd.f32 %v1052_v32, %v1051_v21  ;;  %5224 = vmatpush3.bf16.msra.mxu0 %v5589_v13  ;;  %v1164_v47 = vrot.slane %v1163_v38, 2  ;;  %v1304_v48 = vmul.f32 0.0625, %v719_v36  ;;  %v1416_v49 = vpack.c.bf16 %v1288_v39, %v1288_v39  ;;  %v278_v26 = vld [vmem:[#allocation2 + $0x590] sm:$0xff] }
  0xd5   :  { %v943_v46 = vadd.f32 %v942_v37, %v941_v27  ;;  %5225 = vmatprep.subr.bf16.mxu0 %v5591_v19  ;;  %v1320_v53 = vmul.f32 0.0625, %v831_v41  ;;  %v2056_v54 = vsel %vm2028_vm0, %v1919_v45, %v1903_v44  ;;  %v370_v56 = vadd.f32 %v118_v30, %v102_v29  ;;  %v5601_v29 = vld [vmem:[#allocation7 + $0x220] sm:$0xff]   ;;  %v310_v41 = vld [vmem:[#allocation2 + $0x690] sm:$0xff] }
  0xd6   :  { %v1054_v52 = vrot.slane %v1053_v43, 1  ;;  %v1165_v58 = vadd.f32 %v1164_v47, %v1163_v38  ;;  %v1432_v60 = vpack.c.bf16 %v1304_v48, %v1304_v48  ;;  %v1935_v61 = vunpack.c.l.b16 %v1416_v49 }
  0xd7   :  { %v1336_v59 = vmul.f32 0.0625, %v943_v46  ;;  %v1448_v1 = vpack.c.bf16 %v1320_v53, %v1320_v53  ;;  %v371_v4 = vrot.slane %v370_v56, 4  ;;  %v482_v5 = vadd.f32 %v150_v51, %v134_v50  ;;  %v5605_v50 = vld [vmem:[#allocation7 + $0x228] sm:$0xff]  }
  0xd8   :  { %v1055_v0 = vadd.f32 %v1054_v52, %v1053_v43  ;;  %5226 = vmatpush3.bf16.msra.mxu0 %v5593_v35  ;;  %v1166_v6 = vrot.slane %v1165_v58, 1  ;;  %v1951_v8 = vunpack.c.l.b16 %v1432_v60  ;;  %v2057_v10 = vsel %vm2030_vm1, %v1935_v61, %v2056_v54  ;;  %v5607_v61 = vld [vmem:[#allocation7 + $0x270] sm:$0xff]  }
  0xd9   :  { %v1464_v7 = vpack.c.bf16 %v1336_v59, %v1336_v59  ;;  %5227 = vmatprep.subr.bf16.mxu0 %v5595_v40  ;;  %v1967_v13 = vunpack.c.l.b16 %v1448_v1  ;;  %v372_v16 = vadd.f32 %v371_v4, %v370_v56  ;;  %v483_v17 = vrot.slane %v482_v5, 4  ;;  %v294_v40 = vld [vmem:[#allocation2 + $0x610] sm:$0xff] }
  0xda   :  { %v1352_v12 = vmul.f32 0.0625, %v1055_v0  ;;  %v1167_v19 = vadd.f32 %v1166_v6, %v1165_v58  ;;  %v2058_v21 = vsel %vm2032_vm2, %v1951_v8, %v2057_v10  ;;  %v594_v22 = vadd.f32 %v182_v62, %v166_v55  ;;  %v326_v55 = vld [vmem:[#allocation2 + $0x710] sm:$0xff] }
  0xdb   :  { %v1983_v20 = vunpack.c.l.b16 %v1464_v7  ;;  %v2059_v24 = vsel %vm2034_vm3, %v1967_v13, %v2058_v21  ;;  %v373_v27 = vrot.slane %v372_v16, 2  ;;  %v484_v28 = vadd.f32 %v483_v17, %v482_v5  ;;  %v342_v56 = vld [vmem:[#allocation2 + $0x790] sm:$0xff] }
  0xdc   :  { %v1480_v23 = vpack.c.bf16 %v1352_v12, %v1352_v12  ;;  %5228 = vmatpush3.bf16.msra.mxu0 %v5597_v57  ;;  %v1368_v30 = vmul.f32 0.0625, %v1167_v19  ;;  %v595_v32 = vrot.slane %v594_v22, 4  ;;  %v706_v33 = vadd.f32 %v214_v3, %v198_v2 }
  0xdd   :  { %v2060_v31 = vsel %vm2036_vm4, %v1983_v20, %v2059_v24  ;;  %5229 = vmatprep.subr.bf16.mxu0 %v5599_v63  ;;  %v374_v36 = vadd.f32 %v373_v27, %v372_v16  ;;  %v485_v37 = vrot.slane %v484_v28, 2  ;;  %v818_v38 = vadd.f32 %v246_v14, %v230_v11  ;;  %v5609_v11 = vld [vmem:[#allocation7 + $0x230] sm:$0xff]   ;;  %v5611_v16 = vld [vmem:[#allocation7 + $0x278] sm:$0xff]  }
  0xde   :  { %v1999_v35 = vunpack.c.l.b16 %v1480_v23  ;;  %v1496_v39 = vpack.c.bf16 %v1368_v30, %v1368_v30  ;;  %v596_v43 = vadd.f32 %v595_v32, %v594_v22  ;;  %v707_v44 = vrot.slane %v706_v33, 4  ;;  %v5613_v22 = vld [vmem:[#allocation7 + $0x238] sm:$0xff]  }
  0xdf   :  { %v930_v45 = vadd.f32 %v278_v26, %v262_v15  ;;  %v375_v47 = vrot.slane %v374_v36, 1  ;;  %v486_v48 = vadd.f32 %v485_v37, %v484_v28  ;;  %v819_v49 = vrot.slane %v818_v38, 4  ;;  %v109_v28 = vld [vmem:[#allocation2 + $0x48] sm:$0xff] }
  0xe0   :  { %v2061_v46 = vsel %vm2038_vm5, %v1999_v35, %v2060_v31  ;;  %5230 = vmatpush3.bf16.msra.mxu0 %v5601_v29  ;;  %v2015_v51 = vunpack.c.l.b16 %v1496_v39  ;;  %v597_v52 = vrot.slane %v596_v43, 2  ;;  %v708_v53 = vadd.f32 %v707_v44, %v706_v33  ;;  %v125_v29 = vld [vmem:[#allocation2 + $0xc8] sm:$0xff] }
  0xe1   :  { %v931_v54 = vrot.slane %v930_v45, 4  ;;  %5231 = vmatprep.subr.bf16.mxu0 %v5603_v34  ;;  %v376_v57 = vadd.f32 %v375_v47, %v374_v36  ;;  %v487_v58 = vrot.slane %v486_v48, 1  ;;  %v820_v59 = vadd.f32 %v819_v49, %v818_v38  ;;  %v5615_v38 = vld [vmem:[#allocation7 + $0x340] sm:$0xff]   ;;  %v141_v44 = vld [vmem:[#allocation2 + $0x148] sm:$0xff] }
  0xe2   :  { %v1042_v60 = vadd.f32 %v310_v41, %v294_v40  ;;  %v2062_v62 = vsel %vm2040_vm6, %v2015_v51, %v2061_v46  ;;  %v598_v63 = vadd.f32 %v597_v52, %v596_v43  ;;  %v709_v0 = vrot.slane %v708_v53, 2  ;;  %v173_v49 = vld [vmem:[#allocation2 + $0x248] sm:$0xff] }
  0xe3   :  { %v932_v1 = vadd.f32 %v931_v54, %v930_v45  ;;  %v6186_v2 = vpack.c.b16 %v2062_v62, %v2062_v62  ;;  %v488_v3 = vadd.f32 %v487_v58, %v486_v48  ;;  %v821_v4 = vrot.slane %v820_v59, 2  ;;  %v157_v45 = vld [vmem:[#allocation2 + $0x1c8] sm:$0xff] }
  0xe4   :  { %v1043_v5 = vrot.slane %v1042_v60, 4  ;;  %5232 = vmatpush3.bf16.msra.mxu0 %v5605_v50  ;;  %v599_v6 = vrot.slane %v598_v63, 1  ;;  %v710_v7 = vadd.f32 %v709_v0, %v708_v53  ;;  %v1154_v10 = vadd.f32 %v342_v56, %v326_v55  ;;  %v189_v55 = vld [vmem:[#allocation2 + $0x2c8] sm:$0xff] }
  0xe5   :  { %v933_v8 = vrot.slane %v932_v1, 2  ;;  %3019 = vmatprep.mubr.bf16.mxu1 %v6186_v2  ;;  %v822_v12 = vadd.f32 %v821_v4, %v820_v59  ;;  %v1255_v14 = vmul.f32 0.0625, %v376_v57  ;;  %v1271_v15 = vmul.f32 0.0625, %v488_v3  ;;  %5233 = vmatprep.subr.bf16.mxu0 %v5607_v61  ;;  %v205_v58 = vld [vmem:[#allocation2 + $0x348] sm:$0xff] }
  0xe6   :  { %v1044_v13 = vadd.f32 %v1043_v5, %v1042_v60  ;;  %v600_v17 = vadd.f32 %v599_v6, %v598_v63  ;;  %v711_v19 = vrot.slane %v710_v7, 1  ;;  %v1155_v21 = vrot.slane %v1154_v10, 4  ;;  %v221_v59 = vld [vmem:[#allocation2 + $0x3c8] sm:$0xff] }
  0xe7   :  { %v934_v20 = vadd.f32 %v933_v8, %v932_v1  ;;  %v823_v23 = vrot.slane %v822_v12, 1  ;;  %v1383_v26 = vpack.c.bf16 %v1255_v14, %v1255_v14  ;;  %v1399_v27 = vpack.c.bf16 %v1271_v15, %v1271_v15  ;;  %v237_v3 = vld [vmem:[#allocation2 + $0x448] sm:$0xff] }
  0xe8   :  { %v1045_v24 = vrot.slane %v1044_v13, 2  ;;  %v712_v30 = vadd.f32 %v711_v19, %v710_v7  ;;  %v1156_v32 = vadd.f32 %v1155_v21, %v1154_v10  ;;  %v1287_v33 = vmul.f32 0.0625, %v600_v17  ;;  %5234 = vmatpush3.bf16.msra.mxu0 %v5609_v11  ;;  %v285_v17 = vld [vmem:[#allocation2 + $0x5c8] sm:$0xff] }
  0xe9   :  { %v935_v31 = vrot.slane %v934_v20, 1  ;;  %v824_v34 = vadd.f32 %v823_v23, %v822_v12  ;;  %v1902_v36 = vunpack.c.l.b16 %v1383_v26  ;;  %v1918_v37 = vunpack.c.l.b16 %v1399_v27  ;;  %5235 = vmatprep.subr.bf16.mxu0 %v5611_v16  ;;  %v253_v12 = vld [vmem:[#allocation2 + $0x4c8] sm:$0xff] }
  0xea   :  { %v1046_v35 = vadd.f32 %v1045_v24, %v1044_v13  ;;  %v1157_v40 = vrot.slane %v1156_v32, 2  ;;  %v1303_v41 = vmul.f32 0.0625, %v712_v30  ;;  %v1415_v43 = vpack.c.bf16 %v1287_v33, %v1287_v33  ;;  %v269_v16 = vld [vmem:[#allocation2 + $0x548] sm:$0xff] }
  0xeb   :  { %v936_v39 = vadd.f32 %v935_v31, %v934_v20  ;;  %v1319_v47 = vmul.f32 0.0625, %v824_v34  ;;  %v2049_v48 = vsel %vm2028_vm0, %v1918_v37, %v1902_v36  ;;  %v419_v50 = vadd.f32 %v125_v29, %v109_v28  ;;  %v301_v31 = vld [vmem:[#allocation2 + $0x648] sm:$0xff] }
  0xec   :  { %v1047_v46 = vrot.slane %v1046_v35, 1  ;;  %v1158_v51 = vadd.f32 %v1157_v40, %v1156_v32  ;;  %v1431_v53 = vpack.c.bf16 %v1303_v41, %v1303_v41  ;;  %v1934_v54 = vunpack.c.l.b16 %v1415_v43  ;;  %5236 = vmatpush3.bf16.msra.mxu0 %v5613_v22  ;;  %v317_v32 = vld [vmem:[#allocation2 + $0x6c8] sm:$0xff] }
  0xed   :  { %v1335_v52 = vmul.f32 0.0625, %v936_v39  ;;  %v1447_v57 = vpack.c.bf16 %v1319_v47, %v1319_v47  ;;  %v420_v60 = vrot.slane %v419_v50, 4  ;;  %v531_v61 = vadd.f32 %v157_v45, %v141_v44  ;;  %5265 = vmatprep.subr.bf16.mxu0 %v5615_v38  ;;  %v333_v41 = vld [vmem:[#allocation2 + $0x748] sm:$0xff] }
  0xee   :  { %v1048_v56 = vadd.f32 %v1047_v46, %v1046_v35  ;;  %v1159_v62 = vrot.slane %v1158_v51, 1  ;;  %v1950_v0 = vunpack.c.l.b16 %v1431_v53  ;;  %v2050_v1 = vsel %vm2030_vm1, %v1934_v54, %v2049_v48  ;;  %v349_v46 = vld [vmem:[#allocation2 + $0x7c8] sm:$0xff] }
  0xef   :  { %v1463_v63 = vpack.c.bf16 %v1335_v52, %v1335_v52  ;;  %v1966_v5 = vunpack.c.l.b16 %v1447_v57  ;;  %v421_v6 = vadd.f32 %v420_v60, %v419_v50  ;;  %v532_v7 = vrot.slane %v531_v61, 4  ;;  %v5608_v52 = vld [vmem:[#allocation7 + $0x180] sm:$0xff]   ;;  %v5610_v57 = vld [vmem:[#allocation7 + $0x1c8] sm:$0xff]  }
  0xf0   :  { %v1351_v4 = vmul.f32 0.0625, %v1048_v56  ;;  %v1160_v8 = vadd.f32 %v1159_v62, %v1158_v51  ;;  %v2051_v11 = vsel %vm2032_vm2, %v1950_v0, %v2050_v1  ;;  %v643_v13 = vadd.f32 %v189_v55, %v173_v49 }
  0xf1   :  { %v1982_v10 = vunpack.c.l.b16 %v1463_v63  ;;  %v2052_v15 = vsel %vm2034_vm3, %v1966_v5, %v2051_v11  ;;  %v422_v19 = vrot.slane %v421_v6, 2  ;;  %v533_v20 = vadd.f32 %v532_v7, %v531_v61 }
  0xf2   :  { %v1479_v14 = vpack.c.bf16 %v1351_v4, %v1351_v4  ;;  %v1367_v21 = vmul.f32 0.0625, %v1160_v8  ;;  %v644_v23 = vrot.slane %v643_v13, 4  ;;  %v755_v24 = vadd.f32 %v221_v59, %v205_v58 }
  0xf3   :  { %v2053_v22 = vsel %vm2036_vm4, %v1982_v10, %v2052_v15  ;;  %v423_v27 = vadd.f32 %v422_v19, %v421_v6  ;;  %v534_v28 = vrot.slane %v533_v20, 2  ;;  %v867_v29 = vadd.f32 %v253_v12, %v237_v3  ;;  %v5612_v6 = vld [vmem:[#allocation7 + $0x188] sm:$0xff]   ;;  %v5614_v12 = vld [vmem:[#allocation7 + $0x1d0] sm:$0xff]   ;;  %v124_v19 = vld [vmem:[#allocation2 + $0xc0] sm:$0xff] }
  0xf4   :  { %v1998_v26 = vunpack.c.l.b16 %v1479_v14  ;;  %v1495_v30 = vpack.c.bf16 %v1367_v21, %v1367_v21  ;;  %v645_v33 = vadd.f32 %v644_v23, %v643_v13  ;;  %v756_v34 = vrot.slane %v755_v24, 4 }
  0xf5   :  { %v979_v35 = vadd.f32 %v285_v17, %v269_v16  ;;  %v424_v37 = vrot.slane %v423_v27, 1  ;;  %v535_v38 = vadd.f32 %v534_v28, %v533_v20  ;;  %v868_v39 = vrot.slane %v867_v29, 4  ;;  %v108_v17 = vld [vmem:[#allocation2 + $0x40] sm:$0xff] }
  0xf6   :  { %v2054_v36 = vsel %vm2038_vm5, %v1998_v26, %v2053_v22  ;;  %v2014_v40 = vunpack.c.l.b16 %v1495_v30  ;;  %v646_v43 = vrot.slane %v645_v33, 2  ;;  %v757_v44 = vadd.f32 %v756_v34, %v755_v24  ;;  %v5616_v24 = vld [vmem:[#allocation7 + $0x190] sm:$0xff]   ;;  %v140_v30 = vld [vmem:[#allocation2 + $0x140] sm:$0xff] }
  0xf7   :  { %v980_v45 = vrot.slane %v979_v35, 4  ;;  %v425_v47 = vadd.f32 %v424_v37, %v423_v27  ;;  %v536_v48 = vrot.slane %v535_v38, 1  ;;  %v869_v49 = vadd.f32 %v868_v39, %v867_v29 }
  0xf8   :  { %v1091_v50 = vadd.f32 %v317_v32, %v301_v31  ;;  %v2055_v51 = vsel %vm2040_vm6, %v2014_v40, %v2054_v36  ;;  %v647_v53 = vadd.f32 %v646_v43, %v645_v33  ;;  %v758_v54 = vrot.slane %v757_v44, 2  ;;  %v5618_v36 = vld [vmem:[#allocation7 + $0x1d8] sm:$0xff]   ;;  %v172_v40 = vld [vmem:[#allocation2 + $0x240] sm:$0xff] }
  0xf9   :  { %v981_v55 = vadd.f32 %v980_v45, %v979_v35  ;;  %v6196_v56 = vpack.c.b16 %v2055_v51, %v2055_v51  ;;  %v537_v58 = vadd.f32 %v536_v48, %v535_v38  ;;  %v870_v59 = vrot.slane %v869_v49, 2  ;;  %v156_v35 = vld [vmem:[#allocation2 + $0x1c0] sm:$0xff] }
  0xfa   :  { %v1092_v60 = vrot.slane %v1091_v50, 4  ;;  %v648_v61 = vrot.slane %v647_v53, 1  ;;  %v759_v62 = vadd.f32 %v758_v54, %v757_v44  ;;  %v1203_v0 = vadd.f32 %v349_v46, %v333_v41  ;;  %v220_v51 = vld [vmem:[#allocation2 + $0x3c0] sm:$0xff] }
  0xfb   :  { %v982_v63 = vrot.slane %v981_v55, 2  ;;  %3020 = vmatmul.mubr.bf16.vlgmr.msra.gmra.mrb[4].mxu1 %v6196_v56  ;;  %v871_v1 = vadd.f32 %v870_v59, %v869_v49  ;;  %v1262_v4 = vmul.f32 0.0625, %v425_v47  ;;  %v1278_v5 = vmul.f32 0.0625, %v537_v58  ;;  %v188_v47 = vld [vmem:[#allocation2 + $0x2c0] sm:$0xff] }
  0xfc   :  { %v1093_v3 = vadd.f32 %v1092_v60, %v1091_v50  ;;  %5200 = vmatpush3.bf16.msra.mxu1 %v5608_v52  ;;  %v649_v7 = vadd.f32 %v648_v61, %v647_v53  ;;  %v760_v8 = vrot.slane %v759_v62, 1  ;;  %v1204_v11 = vrot.slane %v1203_v0, 4  ;;  %v204_v50 = vld [vmem:[#allocation2 + $0x340] sm:$0xff]  ;;  %v5620_v61 = vld [vmem:[#allocation7 + $0x198] sm:$0xff]  }
  0xfd   :  { %v983_v10 = vadd.f32 %v982_v63, %v981_v55  ;;  %5201 = vmatprep.subr.bf16.mxu1 %v5610_v57  ;;  %v872_v13 = vrot.slane %v871_v1, 1  ;;  %v1390_v15 = vpack.c.bf16 %v1262_v4, %v1262_v4  ;;  %v1406_v16 = vpack.c.bf16 %v1278_v5, %v1278_v5  ;;  %v236_v59 = vld [vmem:[#allocation2 + $0x440] sm:$0xff] }
  0xfe   :  { %v1094_v14 = vrot.slane %v1093_v3, 2  ;;  %v761_v20 = vadd.f32 %v760_v8, %v759_v62  ;;  %v1205_v22 = vadd.f32 %v1204_v11, %v1203_v0  ;;  %v1294_v23 = vmul.f32 0.0625, %v649_v7  ;;  %v252_v60 = vld [vmem:[#allocation2 + $0x4c0] sm:$0xff] }
  0xff   :  { %v984_v21 = vrot.slane %v983_v10, 1  ;;  %v873_v26 = vadd.f32 %v872_v13, %v871_v1  ;;  %v1909_v28 = vunpack.c.l.b16 %v1390_v15  ;;  %v1925_v29 = vunpack.c.l.b16 %v1406_v16  ;;  %v268_v0 = vld [vmem:[#allocation2 + $0x540] sm:$0xff] }
 0x100   :  { %v1095_v27 = vadd.f32 %v1094_v14, %v1093_v3  ;;  %5202 = vmatpush3.bf16.msra.mxu1 %v5612_v6  ;;  %v1206_v32 = vrot.slane %v1205_v22, 2  ;;  %v1310_v33 = vmul.f32 0.0625, %v761_v20  ;;  %v1422_v34 = vpack.c.bf16 %v1294_v23, %v1294_v23  ;;  %v5622_v4 = vld [vmem:[#allocation7 + $0x1e0] sm:$0xff]  }
 0x101   :  { %v985_v31 = vadd.f32 %v984_v21, %v983_v10  ;;  %5203 = vmatprep.subr.bf16.mxu1 %v5614_v12  ;;  %v1326_v38 = vmul.f32 0.0625, %v873_v26  ;;  %v2098_v39 = vsel %vm2028_vm0, %v1925_v29, %v1909_v28  ;;  %v412_v41 = vadd.f32 %v124_v19, %v108_v17  ;;  %v284_v12 = vld [vmem:[#allocation2 + $0x5c0] sm:$0xff]  ;;  %v5626_v28 = vld [vmem:[#allocation7 + $0x1e8] sm:$0xff]  }
 0x102   :  { %v1096_v37 = vrot.slane %v1095_v27, 1  ;;  %v1207_v43 = vadd.f32 %v1206_v32, %v1205_v22  ;;  %v1438_v45 = vpack.c.bf16 %v1310_v33, %v1310_v33  ;;  %v1941_v46 = vunpack.c.l.b16 %v1422_v34  ;;  %v300_v17 = vld [vmem:[#allocation2 + $0x640] sm:$0xff]  ;;  %v5628_v33 = vld [vmem:[#allocation7 + $0x1a8] sm:$0xff]  }
 0x103   :  { %v1342_v44 = vmul.f32 0.0625, %v985_v31  ;;  %v1454_v49 = vpack.c.bf16 %v1326_v38, %v1326_v38  ;;  %v413_v52 = vrot.slane %v412_v41, 4  ;;  %v524_v53 = vadd.f32 %v156_v35, %v140_v30  ;;  %v316_v19 = vld [vmem:[#allocation2 + $0x6c0] sm:$0xff] }
 0x104   :  { %v1097_v48 = vadd.f32 %v1096_v37, %v1095_v27  ;;  %v1208_v54 = vrot.slane %v1207_v43, 1  ;;  %v1957_v57 = vunpack.c.l.b16 %v1438_v45  ;;  %v2099_v58 = vsel %vm2030_vm1, %v1941_v46, %v2098_v39  ;;  %5204 = vmatpush3.bf16.msra.mxu1 %v5616_v24  ;;  %v5624_v22 = vld [vmem:[#allocation7 + $0x1a0] sm:$0xff]  }
 0x105   :  { %v1470_v55 = vpack.c.bf16 %v1342_v44, %v1342_v44  ;;  %v1973_v63 = vunpack.c.l.b16 %v1454_v49  ;;  %v414_v1 = vadd.f32 %v413_v52, %v412_v41  ;;  %v525_v3 = vrot.slane %v524_v53, 4  ;;  %5205 = vmatprep.subr.bf16.mxu1 %v5618_v36  ;;  %v332_v35 = vld [vmem:[#allocation2 + $0x740] sm:$0xff]  ;;  %v5630_v49 = vld [vmem:[#allocation7 + $0x1f0] sm:$0xff]  }
 0x106   :  { %v1358_v62 = vmul.f32 0.0625, %v1097_v48  ;;  %v1209_v5 = vadd.f32 %v1208_v54, %v1207_v43  ;;  %v2100_v7 = vsel %vm2032_vm2, %v1957_v57, %v2099_v58  ;;  %v636_v8 = vadd.f32 %v188_v47, %v172_v40  ;;  %v348_v36 = vld [vmem:[#allocation2 + $0x7c0] sm:$0xff] }
 0x107   :  { %v1989_v6 = vunpack.c.l.b16 %v1470_v55  ;;  %v2101_v11 = vsel %vm2034_vm3, %v1973_v63, %v2100_v7  ;;  %v415_v13 = vrot.slane %v414_v1, 2  ;;  %v526_v14 = vadd.f32 %v525_v3, %v524_v53 }
 0x108   :  { %v1486_v10 = vpack.c.bf16 %v1358_v62, %v1358_v62  ;;  %v1374_v15 = vmul.f32 0.0625, %v1209_v5  ;;  %v637_v20 = vrot.slane %v636_v8, 4  ;;  %v748_v21 = vadd.f32 %v220_v51, %v204_v50  ;;  %5206 = vmatpush3.bf16.msra.mxu1 %v5620_v61  ;;  %v5634_v5 = vld [vmem:[#allocation7 + $0x1f8] sm:$0xff]  }
 0x109   :  { %v2102_v16 = vsel %vm2036_vm4, %v1989_v6, %v2101_v11  ;;  %v416_v24 = vadd.f32 %v415_v13, %v414_v1  ;;  %v527_v26 = vrot.slane %v526_v14, 2  ;;  %v860_v27 = vadd.f32 %v252_v60, %v236_v59  ;;  %5207 = vmatprep.subr.bf16.mxu1 %v5622_v4  ;;  %v5632_v59 = vld [vmem:[#allocation7 + $0x1b0] sm:$0xff]   ;;  %v5636_v11 = vld [vmem:[#allocation7 + $0x1b8] sm:$0xff]  }
 0x10a   :  { %v2005_v23 = vunpack.c.l.b16 %v1486_v10  ;;  %v1502_v29 = vpack.c.bf16 %v1374_v15, %v1374_v15  ;;  %v638_v30 = vadd.f32 %v637_v20, %v636_v8  ;;  %v749_v31 = vrot.slane %v748_v21, 4 }
 0x10b   :  { %v972_v32 = vadd.f32 %v284_v12, %v268_v0  ;;  %v417_v37 = vrot.slane %v416_v24, 1  ;;  %v528_v38 = vadd.f32 %v527_v26, %v526_v14  ;;  %v861_v39 = vrot.slane %v860_v27, 4 }
 0x10c   :  { %v2103_v34 = vsel %vm2038_vm5, %v2005_v23, %v2102_v16  ;;  %v2021_v40 = vunpack.c.l.b16 %v1502_v29  ;;  %v639_v41 = vrot.slane %v638_v30, 2  ;;  %v750_v43 = vadd.f32 %v749_v31, %v748_v21  ;;  %5208 = vmatpush3.bf16.msra.mxu1 %v5624_v22  ;;  %v107_v21 = vld [vmem:[#allocation2 + $0x38] sm:$0xff] }
 0x10d   :  { %v973_v44 = vrot.slane %v972_v32, 4  ;;  %v418_v45 = vadd.f32 %v417_v37, %v416_v24  ;;  %v529_v46 = vrot.slane %v528_v38, 1  ;;  %v862_v47 = vadd.f32 %v861_v39, %v860_v27  ;;  %5209 = vmatprep.subr.bf16.mxu1 %v5626_v28  ;;  %v123_v22 = vld [vmem:[#allocation2 + $0xb8] sm:$0xff]  ;;  %v5638_v28 = vld [vmem:[#allocation7 + $0x2c0] sm:$0xff]  }
 0x10e   :  { %v1084_v48 = vadd.f32 %v316_v19, %v300_v17  ;;  %v2104_v50 = vsel %vm2040_vm6, %v2021_v40, %v2103_v34  ;;  %v640_v51 = vadd.f32 %v639_v41, %v638_v30  ;;  %v751_v52 = vrot.slane %v750_v43, 2  ;;  %v155_v34 = vld [vmem:[#allocation2 + $0x1b8] sm:$0xff] }
 0x10f   :  { %v974_v53 = vadd.f32 %v973_v44, %v972_v32  ;;  %v6206_v54 = vpack.c.b16 %v2104_v50, %v2104_v50  ;;  %v530_v55 = vadd.f32 %v529_v46, %v528_v38  ;;  %v863_v57 = vrot.slane %v862_v47, 2  ;;  %v171_v46 = vld [vmem:[#allocation2 + $0x238] sm:$0xff] }
 0x110   :  { %v1085_v58 = vrot.slane %v1084_v48, 4  ;;  %v641_v60 = vrot.slane %v640_v51, 1  ;;  %v752_v61 = vadd.f32 %v751_v52, %v750_v43  ;;  %v1196_v63 = vadd.f32 %v348_v36, %v332_v35  ;;  %5210 = vmatpush3.bf16.msra.mxu1 %v5628_v33  ;;  %v139_v33 = vld [vmem:[#allocation2 + $0x138] sm:$0xff] }
 0x111   :  { %v975_v62 = vrot.slane %v974_v53, 2  ;;  %3139 = vmatprep.mubr.bf16.mxu0 %v6206_v54  ;;  %v864_v0 = vadd.f32 %v863_v57, %v862_v47  ;;  %v1261_v3 = vmul.f32 0.0625, %v418_v45  ;;  %v1277_v4 = vmul.f32 0.0625, %v530_v55  ;;  %5211 = vmatprep.subr.bf16.mxu1 %v5630_v49  ;;  %v187_v47 = vld [vmem:[#allocation2 + $0x2b8] sm:$0xff] }
 0x112   :  { %v1086_v1 = vadd.f32 %v1085_v58, %v1084_v48  ;;  %v642_v6 = vadd.f32 %v641_v60, %v640_v51  ;;  %v753_v7 = vrot.slane %v752_v61, 1  ;;  %v1197_v10 = vrot.slane %v1196_v63, 4  ;;  %v203_v58 = vld [vmem:[#allocation2 + $0x338] sm:$0xff] }
 0x113   :  { %v976_v8 = vadd.f32 %v975_v62, %v974_v53  ;;  %v865_v12 = vrot.slane %v864_v0, 1  ;;  %v1389_v14 = vpack.c.bf16 %v1261_v3, %v1261_v3  ;;  %v1405_v15 = vpack.c.bf16 %v1277_v4, %v1277_v4  ;;  %v251_v3 = vld [vmem:[#allocation2 + $0x4b8] sm:$0xff] }
 0x114   :  { %v1087_v13 = vrot.slane %v1086_v1, 2  ;;  %v754_v16 = vadd.f32 %v753_v7, %v752_v61  ;;  %v1198_v19 = vadd.f32 %v1197_v10, %v1196_v63  ;;  %v1293_v20 = vmul.f32 0.0625, %v642_v6  ;;  %5212 = vmatpush3.bf16.msra.mxu1 %v5632_v59  ;;  %v219_v59 = vld [vmem:[#allocation2 + $0x3b8] sm:$0xff] }
 0x115   :  { %v977_v17 = vrot.slane %v976_v8, 1  ;;  %v866_v23 = vadd.f32 %v865_v12, %v864_v0  ;;  %v1908_v26 = vunpack.c.l.b16 %v1389_v14  ;;  %v1924_v27 = vunpack.c.l.b16 %v1405_v15  ;;  %5213 = vmatprep.subr.bf16.mxu1 %v5634_v5  ;;  %v267_v7 = vld [vmem:[#allocation2 + $0x538] sm:$0xff] }
 0x116   :  { %v1088_v24 = vadd.f32 %v1087_v13, %v1086_v1  ;;  %v1199_v30 = vrot.slane %v1198_v19, 2  ;;  %v1309_v31 = vmul.f32 0.0625, %v754_v16  ;;  %v1421_v32 = vpack.c.bf16 %v1293_v20, %v1293_v20  ;;  %v235_v1 = vld [vmem:[#allocation2 + $0x438] sm:$0xff] }
 0x117   :  { %v978_v29 = vadd.f32 %v977_v17, %v976_v8  ;;  %v1325_v36 = vmul.f32 0.0625, %v866_v23  ;;  %v2091_v37 = vsel %vm2028_vm0, %v1924_v27, %v1908_v26  ;;  %v405_v38 = vadd.f32 %v123_v22, %v107_v21  ;;  %v283_v8 = vld [vmem:[#allocation2 + $0x5b8] sm:$0xff] }
 0x118   :  { %v1089_v35 = vrot.slane %v1088_v24, 1  ;;  %v1200_v39 = vadd.f32 %v1199_v30, %v1198_v19  ;;  %v1437_v41 = vpack.c.bf16 %v1309_v31, %v1309_v31  ;;  %v1940_v43 = vunpack.c.l.b16 %v1421_v32  ;;  %5214 = vmatpush3.bf16.msra.mxu1 %v5636_v11  ;;  %v299_v17 = vld [vmem:[#allocation2 + $0x638] sm:$0xff] }
 0x119   :  { %v1341_v40 = vmul.f32 0.0625, %v978_v29  ;;  %v1453_v45 = vpack.c.bf16 %v1325_v36, %v1325_v36  ;;  %v406_v48 = vrot.slane %v405_v38, 4  ;;  %v517_v49 = vadd.f32 %v155_v34, %v139_v33  ;;  %5243 = vmatprep.subr.bf16.mxu1 %v5638_v28  ;;  %v315_v23 = vld [vmem:[#allocation2 + $0x6b8] sm:$0xff]  ;;  %v5617_v34 = vld [vmem:[#allocation7 + $0x300] sm:$0xff]  }
 0x11a   :  { %v1090_v44 = vadd.f32 %v1089_v35, %v1088_v24  ;;  %v1201_v50 = vrot.slane %v1200_v39, 1  ;;  %v1956_v52 = vunpack.c.l.b16 %v1437_v41  ;;  %v2092_v53 = vsel %vm2030_vm1, %v1940_v43, %v2091_v37  ;;  %v331_v29 = vld [vmem:[#allocation2 + $0x738] sm:$0xff] }
 0x11b   :  { %v1469_v51 = vpack.c.bf16 %v1341_v40, %v1341_v40  ;;  %v1972_v57 = vunpack.c.l.b16 %v1453_v45  ;;  %v407_v60 = vadd.f32 %v406_v48, %v405_v38  ;;  %v518_v61 = vrot.slane %v517_v49, 4  ;;  %v347_v38 = vld [vmem:[#allocation2 + $0x7b8] sm:$0xff]  ;;  %v5619_v45 = vld [vmem:[#allocation7 + $0x348] sm:$0xff]  }
 0x11c   :  { %v1357_v55 = vmul.f32 0.0625, %v1090_v44  ;;  %v1202_v62 = vadd.f32 %v1201_v50, %v1200_v39  ;;  %v2093_v0 = vsel %vm2032_vm2, %v1956_v52, %v2092_v53  ;;  %v629_v4 = vadd.f32 %v187_v47, %v171_v46  ;;  %v5621_v53 = vld [vmem:[#allocation7 + $0x308] sm:$0xff]  }
 0x11d   :  { %v1988_v63 = vunpack.c.l.b16 %v1469_v51  ;;  %v2094_v6 = vsel %vm2034_vm3, %v1972_v57, %v2093_v0  ;;  %v408_v10 = vrot.slane %v407_v60, 2  ;;  %v519_v11 = vadd.f32 %v518_v61, %v517_v49 }
 0x11e   :  { %v1485_v5 = vpack.c.bf16 %v1357_v55, %v1357_v55  ;;  %v1373_v12 = vmul.f32 0.0625, %v1202_v62  ;;  %v630_v14 = vrot.slane %v629_v4, 4  ;;  %v741_v15 = vadd.f32 %v219_v59, %v203_v58 }
 0x11f   :  { %v2095_v13 = vsel %vm2036_vm4, %v1988_v63, %v2094_v6  ;;  %v409_v19 = vadd.f32 %v408_v10, %v407_v60  ;;  %v520_v20 = vrot.slane %v519_v11, 2  ;;  %v853_v21 = vadd.f32 %v251_v3, %v235_v1 }
 0x120   :  { %v2004_v16 = vunpack.c.l.b16 %v1485_v5  ;;  %v1501_v22 = vpack.c.bf16 %v1373_v12, %v1373_v12  ;;  %v631_v24 = vadd.f32 %v630_v14, %v629_v4  ;;  %v742_v26 = vrot.slane %v741_v15, 4  ;;  %v5623_v5 = vld [vmem:[#allocation7 + $0x350] sm:$0xff]  }
 0x121   :  { %v965_v27 = vadd.f32 %v283_v8, %v267_v7  ;;  %v410_v30 = vrot.slane %v409_v19, 1  ;;  %v521_v31 = vadd.f32 %v520_v20, %v519_v11  ;;  %v854_v32 = vrot.slane %v853_v21, 4  ;;  %v5625_v11 = vld [vmem:[#allocation7 + $0x310] sm:$0xff]  }
 0x122   :  { %v2096_v28 = vsel %vm2038_vm5, %v2004_v16, %v2095_v13  ;;  %v2020_v33 = vunpack.c.l.b16 %v1501_v22  ;;  %v632_v35 = vrot.slane %v631_v24, 2  ;;  %v743_v36 = vadd.f32 %v742_v26, %v741_v15  ;;  %v106_v16 = vld [vmem:[#allocation2 + $0x30] sm:$0xff] }
 0x123   :  { %v966_v37 = vrot.slane %v965_v27, 4  ;;  %v411_v39 = vadd.f32 %v410_v30, %v409_v19  ;;  %v522_v40 = vrot.slane %v521_v31, 1  ;;  %v855_v41 = vadd.f32 %v854_v32, %v853_v21  ;;  %v5627_v30 = vld [vmem:[#allocation7 + $0x358] sm:$0xff]  }
 0x124   :  { %v1077_v43 = vadd.f32 %v315_v23, %v299_v17  ;;  %v2097_v44 = vsel %vm2040_vm6, %v2020_v33, %v2096_v28  ;;  %v633_v46 = vadd.f32 %v632_v35, %v631_v24  ;;  %v744_v47 = vrot.slane %v743_v36, 2  ;;  %v122_v17 = vld [vmem:[#allocation2 + $0xb0] sm:$0xff] }
 0x125   :  { %v967_v48 = vadd.f32 %v966_v37, %v965_v27  ;;  %v6216_v49 = vpack.c.b16 %v2097_v44, %v2097_v44  ;;  %v523_v50 = vadd.f32 %v522_v40, %v521_v31  ;;  %v856_v51 = vrot.slane %v855_v41, 2  ;;  %v138_v28 = vld [vmem:[#allocation2 + $0x130] sm:$0xff] }
 0x126   :  { %v1078_v52 = vrot.slane %v1077_v43, 4  ;;  %v634_v55 = vrot.slane %v633_v46, 1  ;;  %v745_v57 = vadd.f32 %v744_v47, %v743_v36  ;;  %v1189_v59 = vadd.f32 %v347_v38, %v331_v29  ;;  %v154_v29 = vld [vmem:[#allocation2 + $0x1b0] sm:$0xff]  ;;  %v5629_v36 = vld [vmem:[#allocation7 + $0x318] sm:$0xff]  }
 0x127   :  { %v968_v58 = vrot.slane %v967_v48, 2  ;;  %3140 = vmatmul.mubr.bf16.vlgmr.msra.gmra.mrb[4].mxu0 %v6216_v49  ;;  %v857_v60 = vadd.f32 %v856_v51, %v855_v41  ;;  %v1260_v62 = vmul.f32 0.0625, %v411_v39  ;;  %v1276_v63 = vmul.f32 0.0625, %v523_v50  ;;  %v186_v41 = vld [vmem:[#allocation2 + $0x2b0] sm:$0xff] }
 0x128   :  { %v1079_v61 = vadd.f32 %v1078_v52, %v1077_v43  ;;  %5266 = vmatpush3.bf16.msra.mxu0 %v5617_v34  ;;  %v635_v0 = vadd.f32 %v634_v55, %v633_v46  ;;  %v746_v1 = vrot.slane %v745_v57, 1  ;;  %v1190_v4 = vrot.slane %v1189_v59, 4  ;;  %v170_v34 = vld [vmem:[#allocation2 + $0x230] sm:$0xff]  ;;  %v5631_v43 = vld [vmem:[#allocation7 + $0x360] sm:$0xff]  }
 0x129   :  { %v969_v3 = vadd.f32 %v968_v58, %v967_v48  ;;  %5267 = vmatprep.subr.bf16.mxu0 %v5619_v45  ;;  %v858_v6 = vrot.slane %v857_v60, 1  ;;  %v1388_v8 = vpack.c.bf16 %v1260_v62, %v1260_v62  ;;  %v1404_v10 = vpack.c.bf16 %v1276_v63, %v1276_v63  ;;  %v202_v46 = vld [vmem:[#allocation2 + $0x330] sm:$0xff] }
 0x12a   :  { %v1080_v7 = vrot.slane %v1079_v61, 2  ;;  %v747_v12 = vadd.f32 %v746_v1, %v745_v57  ;;  %v1191_v14 = vadd.f32 %v1190_v4, %v1189_v59  ;;  %v1292_v15 = vmul.f32 0.0625, %v635_v0  ;;  %v218_v55 = vld [vmem:[#allocation2 + $0x3b0] sm:$0xff] }
 0x12b   :  { %v970_v13 = vrot.slane %v969_v3, 1  ;;  %v859_v19 = vadd.f32 %v858_v6, %v857_v60  ;;  %v1907_v21 = vunpack.c.l.b16 %v1388_v8  ;;  %v1923_v22 = vunpack.c.l.b16 %v1404_v10  ;;  %v234_v59 = vld [vmem:[#allocation2 + $0x430] sm:$0xff] }
 0x12c   :  { %v1081_v20 = vadd.f32 %v1080_v7, %v1079_v61  ;;  %5268 = vmatpush3.bf16.msra.mxu0 %v5621_v53  ;;  %v1192_v24 = vrot.slane %v1191_v14, 2  ;;  %v1308_v26 = vmul.f32 0.0625, %v747_v12  ;;  %v1420_v27 = vpack.c.bf16 %v1292_v15, %v1292_v15  ;;  %v250_v60 = vld [vmem:[#allocation2 + $0x4b0] sm:$0xff] }
 0x12d   :  { %v971_v23 = vadd.f32 %v970_v13, %v969_v3  ;;  %5269 = vmatprep.subr.bf16.mxu0 %v5623_v5  ;;  %v1324_v32 = vmul.f32 0.0625, %v859_v19  ;;  %v2084_v33 = vsel %vm2028_vm0, %v1923_v22, %v1907_v21  ;;  %v398_v35 = vadd.f32 %v122_v17, %v106_v16  ;;  %v266_v3 = vld [vmem:[#allocation2 + $0x530] sm:$0xff]  ;;  %v5635_v16 = vld [vmem:[#allocation7 + $0x368] sm:$0xff]  }
 0x12e   :  { %v1082_v31 = vrot.slane %v1081_v20, 1  ;;  %v1193_v37 = vadd.f32 %v1192_v24, %v1191_v14  ;;  %v1436_v39 = vpack.c.bf16 %v1308_v26, %v1308_v26  ;;  %v1939_v40 = vunpack.c.l.b16 %v1420_v27  ;;  %v282_v7 = vld [vmem:[#allocation2 + $0x5b0] sm:$0xff] }
 0x12f   :  { %v1340_v38 = vmul.f32 0.0625, %v971_v23  ;;  %v1452_v45 = vpack.c.bf16 %v1324_v32, %v1324_v32  ;;  %v399_v47 = vrot.slane %v398_v35, 4  ;;  %v510_v48 = vadd.f32 %v154_v29, %v138_v28  ;;  %v298_v19 = vld [vmem:[#allocation2 + $0x630] sm:$0xff] }
 0x130   :  { %v1083_v44 = vadd.f32 %v1082_v31, %v1081_v20  ;;  %5270 = vmatpush3.bf16.msra.mxu0 %v5625_v11  ;;  %v1194_v50 = vrot.slane %v1193_v37, 1  ;;  %v1955_v52 = vunpack.c.l.b16 %v1436_v39  ;;  %v2085_v53 = vsel %vm2030_vm1, %v1939_v40, %v2084_v33  ;;  %v5633_v11 = vld [vmem:[#allocation7 + $0x320] sm:$0xff]   ;;  %v314_v24 = vld [vmem:[#allocation2 + $0x6b0] sm:$0xff]  ;;  %v5637_v33 = vld [vmem:[#allocation7 + $0x328] sm:$0xff]  }
 0x131   :  { %v1468_v51 = vpack.c.bf16 %v1340_v38, %v1340_v38  ;;  %5271 = vmatprep.subr.bf16.mxu0 %v5627_v30  ;;  %v1971_v58 = vunpack.c.l.b16 %v1452_v45  ;;  %v400_v61 = vadd.f32 %v399_v47, %v398_v35  ;;  %v511_v62 = vrot.slane %v510_v48, 4  ;;  %v330_v35 = vld [vmem:[#allocation2 + $0x730] sm:$0xff] }
 0x132   :  { %v1356_v57 = vmul.f32 0.0625, %v1083_v44  ;;  %v1195_v63 = vadd.f32 %v1194_v50, %v1193_v37  ;;  %v2086_v1 = vsel %vm2032_vm2, %v1955_v52, %v2085_v53  ;;  %v622_v4 = vadd.f32 %v186_v41, %v170_v34  ;;  %v346_v39 = vld [vmem:[#allocation2 + $0x7b0] sm:$0xff] }
 0x133   :  { %v1987_v0 = vunpack.c.l.b16 %v1468_v51  ;;  %v2087_v6 = vsel %vm2034_vm3, %v1971_v58, %v2086_v1  ;;  %v401_v8 = vrot.slane %v400_v61, 2  ;;  %v512_v10 = vadd.f32 %v511_v62, %v510_v48  ;;  %v5639_v45 = vld [vmem:[#allocation7 + $0x370] sm:$0xff]  }
 0x134   :  { %v1484_v5 = vpack.c.bf16 %v1356_v57, %v1356_v57  ;;  %5272 = vmatpush3.bf16.msra.mxu0 %v5629_v36  ;;  %v1372_v12 = vmul.f32 0.0625, %v1195_v63  ;;  %v623_v14 = vrot.slane %v622_v4, 4  ;;  %v734_v15 = vadd.f32 %v218_v55, %v202_v46 }
 0x135   :  { %v2088_v13 = vsel %vm2036_vm4, %v1987_v0, %v2087_v6  ;;  %5273 = vmatprep.subr.bf16.mxu0 %v5631_v43  ;;  %v402_v20 = vadd.f32 %v401_v8, %v400_v61  ;;  %v513_v21 = vrot.slane %v512_v10, 2  ;;  %v846_v22 = vadd.f32 %v250_v60, %v234_v59  ;;  %v5641_v61 = vld [vmem:[#allocation7 + $0x330] sm:$0xff]   ;;  %v5645_v8 = vld [vmem:[#allocation7 + $0x338] sm:$0xff]  }
 0x136   :  { %v2003_v17 = vunpack.c.l.b16 %v1484_v5  ;;  %v1500_v23 = vpack.c.bf16 %v1372_v12, %v1372_v12  ;;  %v624_v26 = vadd.f32 %v623_v14, %v622_v4  ;;  %v735_v27 = vrot.slane %v734_v15, 4 }
 0x137   :  { %v958_v28 = vadd.f32 %v282_v7, %v266_v3  ;;  %v403_v30 = vrot.slane %v402_v20, 1  ;;  %v514_v31 = vadd.f32 %v513_v21, %v512_v10  ;;  %v847_v32 = vrot.slane %v846_v22, 4  ;;  %v5643_v3 = vld [vmem:[#allocation7 + $0x378] sm:$0xff]  }
 0x138   :  { %v2089_v29 = vsel %vm2038_vm5, %v2003_v17, %v2088_v13  ;;  %5274 = vmatpush3.bf16.msra.mxu0 %v5633_v11  ;;  %v2019_v34 = vunpack.c.l.b16 %v1500_v23  ;;  %v625_v36 = vrot.slane %v624_v26, 2  ;;  %v736_v37 = vadd.f32 %v735_v27, %v734_v15 }
 0x139   :  { %v959_v38 = vrot.slane %v958_v28, 4  ;;  %5275 = vmatprep.subr.bf16.mxu0 %v5635_v16  ;;  %v404_v40 = vadd.f32 %v403_v30, %v402_v20  ;;  %v515_v41 = vrot.slane %v514_v31, 1  ;;  %v848_v43 = vadd.f32 %v847_v32, %v846_v22  ;;  %v129_v20 = vld [vmem:[#allocation2 + $0xe8] sm:$0xff] }
 0x13a   :  { %v1070_v44 = vadd.f32 %v314_v24, %v298_v19  ;;  %v2090_v46 = vsel %vm2040_vm6, %v2019_v34, %v2089_v29  ;;  %v626_v47 = vadd.f32 %v625_v36, %v624_v26  ;;  %v737_v48 = vrot.slane %v736_v37, 2  ;;  %v113_v19 = vld [vmem:[#allocation2 + $0x68] sm:$0xff]  ;;  %v5647_v26 = vld [vmem:[#allocation8 + $0x40] sm:$0xff]  }
 0x13b   :  { %v960_v50 = vadd.f32 %v959_v38, %v958_v28  ;;  %v6226_v51 = vpack.c.b16 %v2090_v46, %v2090_v46  ;;  %v516_v52 = vadd.f32 %v515_v41, %v514_v31  ;;  %v849_v53 = vrot.slane %v848_v43, 2  ;;  %v145_v31 = vld [vmem:[#allocation2 + $0x168] sm:$0xff] }
 0x13c   :  { %v1071_v55 = vrot.slane %v1070_v44, 4  ;;  %5276 = vmatpush3.bf16.msra.mxu0 %v5637_v33  ;;  %v627_v57 = vrot.slane %v626_v47, 1  ;;  %v738_v58 = vadd.f32 %v737_v48, %v736_v37  ;;  %v1182_v60 = vadd.f32 %v346_v39, %v330_v35  ;;  %v161_v32 = vld [vmem:[#allocation2 + $0x1e8] sm:$0xff] }
 0x13d   :  { %v961_v59 = vrot.slane %v960_v50, 2  ;;  %3099 = vmatprep.mubr.bf16.mxu1 %v6226_v51  ;;  %v850_v62 = vadd.f32 %v849_v53, %v848_v43  ;;  %v1259_v0 = vmul.f32 0.0625, %v404_v40  ;;  %v1275_v1 = vmul.f32 0.0625, %v516_v52  ;;  %5277 = vmatprep.subr.bf16.mxu0 %v5639_v45  ;;  %v177_v41 = vld [vmem:[#allocation2 + $0x268] sm:$0xff] }
 0x13e   :  { %v1072_v63 = vadd.f32 %v1071_v55, %v1070_v44  ;;  %v628_v4 = vadd.f32 %v627_v57, %v626_v47  ;;  %v739_v5 = vrot.slane %v738_v58, 1  ;;  %v1183_v7 = vrot.slane %v1182_v60, 4  ;;  %v193_v45 = vld [vmem:[#allocation2 + $0x2e8] sm:$0xff] }
 0x13f   :  { %v962_v6 = vadd.f32 %v961_v59, %v960_v50  ;;  %v851_v10 = vrot.slane %v850_v62, 1  ;;  %v1387_v12 = vpack.c.bf16 %v1259_v0, %v1259_v0  ;;  %v1403_v13 = vpack.c.bf16 %v1275_v1, %v1275_v1  ;;  %v225_v59 = vld [vmem:[#allocation2 + $0x3e8] sm:$0xff] }
 0x140   :  { %v1073_v11 = vrot.slane %v1072_v63, 2  ;;  %v740_v14 = vadd.f32 %v739_v5, %v738_v58  ;;  %v1184_v16 = vadd.f32 %v1183_v7, %v1182_v60  ;;  %v1291_v17 = vmul.f32 0.0625, %v628_v4  ;;  %5278 = vmatpush3.bf16.msra.mxu0 %v5641_v61  ;;  %v209_v58 = vld [vmem:[#allocation2 + $0x368] sm:$0xff] }
 0x141   :  { %v963_v15 = vrot.slane %v962_v6, 1  ;;  %v852_v21 = vadd.f32 %v851_v10, %v850_v62  ;;  %v1906_v23 = vunpack.c.l.b16 %v1387_v12  ;;  %v1922_v24 = vunpack.c.l.b16 %v1403_v13  ;;  %5279 = vmatprep.subr.bf16.mxu0 %v5643_v3  ;;  %v241_v1 = vld [vmem:[#allocation2 + $0x468] sm:$0xff] }
 0x142   :  { %v1074_v22 = vadd.f32 %v1073_v11, %v1072_v63  ;;  %v1185_v28 = vrot.slane %v1184_v16, 2  ;;  %v1307_v29 = vmul.f32 0.0625, %v740_v14  ;;  %v1419_v30 = vpack.c.bf16 %v1291_v17, %v1291_v17  ;;  %v257_v3 = vld [vmem:[#allocation2 + $0x4e8] sm:$0xff] }
 0x143   :  { %v964_v27 = vadd.f32 %v963_v15, %v962_v6  ;;  %v1323_v34 = vmul.f32 0.0625, %v852_v21  ;;  %v2077_v35 = vsel %vm2028_vm0, %v1922_v24, %v1906_v23  ;;  %v447_v36 = vadd.f32 %v129_v20, %v113_v19  ;;  %v273_v7 = vld [vmem:[#allocation2 + $0x568] sm:$0xff] }
 0x144   :  { %v1075_v33 = vrot.slane %v1074_v22, 1  ;;  %v1186_v37 = vadd.f32 %v1185_v28, %v1184_v16  ;;  %v1435_v39 = vpack.c.bf16 %v1307_v29, %v1307_v29  ;;  %v1938_v40 = vunpack.c.l.b16 %v1419_v30  ;;  %5280 = vmatpush3.bf16.msra.mxu0 %v5645_v8  ;;  %v289_v8 = vld [vmem:[#allocation2 + $0x5e8] sm:$0xff] }
 0x145   :  { %v1339_v38 = vmul.f32 0.0625, %v964_v27  ;;  %v1451_v44 = vpack.c.bf16 %v1323_v34, %v1323_v34  ;;  %v448_v46 = vrot.slane %v447_v36, 4  ;;  %v559_v47 = vadd.f32 %v161_v32, %v145_v31  ;;  %5309 = vmatprep.subr.bf16.mxu0 %v5647_v26  ;;  %v321_v23 = vld [vmem:[#allocation2 + $0x6e8] sm:$0xff] }
 0x146   :  { %v1076_v43 = vadd.f32 %v1075_v33, %v1074_v22  ;;  %v1187_v48 = vrot.slane %v1186_v37, 1  ;;  %v1954_v52 = vunpack.c.l.b16 %v1435_v39  ;;  %v2078_v53 = vsel %vm2030_vm1, %v1938_v40, %v2077_v35  ;;  %v305_v22 = vld [vmem:[#allocation2 + $0x668] sm:$0xff]  ;;  %v5640_v33 = vld [vmem:[#allocation7 + $0x280] sm:$0xff]  }
 0x147   :  { %v1467_v50 = vpack.c.bf16 %v1339_v38, %v1339_v38  ;;  %v1970_v57 = vunpack.c.l.b16 %v1451_v44  ;;  %v449_v60 = vadd.f32 %v448_v46, %v447_v36  ;;  %v560_v61 = vrot.slane %v559_v47, 4  ;;  %v337_v34 = vld [vmem:[#allocation2 + $0x768] sm:$0xff] }
 0x148   :  { %v1355_v55 = vmul.f32 0.0625, %v1076_v43  ;;  %v1188_v62 = vadd.f32 %v1187_v48, %v1186_v37  ;;  %v2079_v0 = vsel %vm2032_vm2, %v1954_v52, %v2078_v53  ;;  %v671_v4 = vadd.f32 %v193_v45, %v177_v41  ;;  %v353_v38 = vld [vmem:[#allocation2 + $0x7e8] sm:$0xff] }
 0x149   :  { %v1986_v63 = vunpack.c.l.b16 %v1467_v50  ;;  %v2080_v6 = vsel %vm2034_vm3, %v1970_v57, %v2079_v0  ;;  %v450_v10 = vrot.slane %v449_v60, 2  ;;  %v561_v11 = vadd.f32 %v560_v61, %v559_v47  ;;  %v5642_v45 = vld [vmem:[#allocation7 + $0x2c8] sm:$0xff]  }
 0x14a   :  { %v1483_v5 = vpack.c.bf16 %v1355_v55, %v1355_v55  ;;  %v1371_v12 = vmul.f32 0.0625, %v1188_v62  ;;  %v672_v14 = vrot.slane %v671_v4, 4  ;;  %v783_v15 = vadd.f32 %v225_v59, %v209_v58  ;;  %v5644_v57 = vld [vmem:[#allocation7 + $0x288] sm:$0xff]  }
 0x14b   :  { %v2081_v13 = vsel %vm2036_vm4, %v1986_v63, %v2080_v6  ;;  %v451_v17 = vadd.f32 %v450_v10, %v449_v60  ;;  %v562_v19 = vrot.slane %v561_v11, 2  ;;  %v895_v20 = vadd.f32 %v257_v3, %v241_v1 }
 0x14c   :  { %v2002_v16 = vunpack.c.l.b16 %v1483_v5  ;;  %v1499_v21 = vpack.c.bf16 %v1371_v12, %v1371_v12  ;;  %v673_v24 = vadd.f32 %v672_v14, %v671_v4  ;;  %v784_v26 = vrot.slane %v783_v15, 4 }
 0x14d   :  { %v1007_v27 = vadd.f32 %v289_v8, %v273_v7  ;;  %v452_v29 = vrot.slane %v451_v17, 1  ;;  %v563_v30 = vadd.f32 %v562_v19, %v561_v11  ;;  %v896_v31 = vrot.slane %v895_v20, 4  ;;  %v5646_v7 = vld [vmem:[#allocation7 + $0x2d0] sm:$0xff]   ;;  %v112_v19 = vld [vmem:[#allocation2 + $0x60] sm:$0xff] }
 0x14e   :  { %v2082_v28 = vsel %vm2038_vm5, %v2002_v16, %v2081_v13  ;;  %v2018_v32 = vunpack.c.l.b16 %v1499_v21  ;;  %v674_v35 = vrot.slane %v673_v24, 2  ;;  %v785_v36 = vadd.f32 %v784_v26, %v783_v15 }
 0x14f   :  { %v1008_v37 = vrot.slane %v1007_v27, 4  ;;  %v453_v39 = vadd.f32 %v452_v29, %v451_v17  ;;  %v564_v40 = vrot.slane %v563_v30, 1  ;;  %v897_v41 = vadd.f32 %v896_v31, %v895_v20  ;;  %v5648_v17 = vld [vmem:[#allocation7 + $0x290] sm:$0xff]   ;;  %v128_v20 = vld [vmem:[#allocation2 + $0xe0] sm:$0xff] }
 0x150   :  { %v1119_v43 = vadd.f32 %v321_v23, %v305_v22  ;;  %v2083_v44 = vsel %vm2040_vm6, %v2018_v32, %v2082_v28  ;;  %v675_v46 = vadd.f32 %v674_v35, %v673_v24  ;;  %v786_v47 = vrot.slane %v785_v36, 2  ;;  %v160_v31 = vld [vmem:[#allocation2 + $0x1e0] sm:$0xff] }
 0x151   :  { %v1009_v48 = vadd.f32 %v1008_v37, %v1007_v27  ;;  %v6236_v50 = vpack.c.b16 %v2083_v44, %v2083_v44  ;;  %v565_v52 = vadd.f32 %v564_v40, %v563_v30  ;;  %v898_v53 = vrot.slane %v897_v41, 2  ;;  %v144_v30 = vld [vmem:[#allocation2 + $0x160] sm:$0xff]  ;;  %v5650_v37 = vld [vmem:[#allocation7 + $0x2d8] sm:$0xff]  }
 0x152   :  { %v1120_v55 = vrot.slane %v1119_v43, 4  ;;  %v676_v58 = vrot.slane %v675_v46, 1  ;;  %v787_v59 = vadd.f32 %v786_v47, %v785_v36  ;;  %v1231_v61 = vadd.f32 %v353_v38, %v337_v34  ;;  %v176_v35 = vld [vmem:[#allocation2 + $0x260] sm:$0xff] }
 0x153   :  { %v1010_v60 = vrot.slane %v1009_v48, 2  ;;  %3100 = vmatmul.mubr.bf16.vlgmr.msra.gmra.mrb[8].mxu1 %v6236_v50  ;;  %v899_v62 = vadd.f32 %v898_v53, %v897_v41  ;;  %v1266_v0 = vmul.f32 0.0625, %v453_v39  ;;  %v1282_v1 = vmul.f32 0.0625, %v565_v52  ;;  %v224_v47 = vld [vmem:[#allocation2 + $0x3e0] sm:$0xff] }
 0x154   :  { %v1121_v63 = vadd.f32 %v1120_v55, %v1119_v43  ;;  %5244 = vmatpush3.bf16.msra.mxu1 %v5640_v33  ;;  %v677_v3 = vadd.f32 %v676_v58, %v675_v46  ;;  %v788_v4 = vrot.slane %v787_v59, 1  ;;  %v1232_v6 = vrot.slane %v1231_v61, 4  ;;  %v192_v43 = vld [vmem:[#allocation2 + $0x2e0] sm:$0xff] }
 0x155   :  { %v1011_v5 = vadd.f32 %v1010_v60, %v1009_v48  ;;  %5245 = vmatprep.subr.bf16.mxu1 %v5642_v45  ;;  %v900_v8 = vrot.slane %v899_v62, 1  ;;  %v1394_v11 = vpack.c.bf16 %v1266_v0, %v1266_v0  ;;  %v1410_v12 = vpack.c.bf16 %v1282_v1, %v1282_v1  ;;  %v208_v46 = vld [vmem:[#allocation2 + $0x360] sm:$0xff]  ;;  %v5652_v60 = vld [vmem:[#allocation7 + $0x298] sm:$0xff]  }
 0x156   :  { %v1122_v10 = vrot.slane %v1121_v63, 2  ;;  %v789_v13 = vadd.f32 %v788_v4, %v787_v59  ;;  %v1233_v15 = vadd.f32 %v1232_v6, %v1231_v61  ;;  %v1298_v16 = vmul.f32 0.0625, %v677_v3  ;;  %v240_v59 = vld [vmem:[#allocation2 + $0x460] sm:$0xff] }
 0x157   :  { %v1012_v14 = vrot.slane %v1011_v5, 1  ;;  %v901_v21 = vadd.f32 %v900_v8, %v899_v62  ;;  %v1913_v23 = vunpack.c.l.b16 %v1394_v11  ;;  %v1929_v24 = vunpack.c.l.b16 %v1410_v12  ;;  %v5654_v3 = vld [vmem:[#allocation7 + $0x2e0] sm:$0xff]  }
 0x158   :  { %v1123_v22 = vadd.f32 %v1122_v10, %v1121_v63  ;;  %5246 = vmatpush3.bf16.msra.mxu1 %v5644_v57  ;;  %v1234_v27 = vrot.slane %v1233_v15, 2  ;;  %v1314_v28 = vmul.f32 0.0625, %v789_v13  ;;  %v1426_v29 = vpack.c.bf16 %v1298_v16, %v1298_v16  ;;  %v256_v63 = vld [vmem:[#allocation2 + $0x4e0] sm:$0xff] }
 0x159   :  { %v1013_v26 = vadd.f32 %v1012_v14, %v1011_v5  ;;  %5247 = vmatprep.subr.bf16.mxu1 %v5646_v7  ;;  %v1330_v33 = vmul.f32 0.0625, %v901_v21  ;;  %v2126_v34 = vsel %vm2028_vm0, %v1929_v24, %v1913_v23  ;;  %v440_v36 = vadd.f32 %v128_v20, %v112_v19  ;;  %v272_v7 = vld [vmem:[#allocation2 + $0x560] sm:$0xff] }
 0x15a   :  { %v1124_v32 = vrot.slane %v1123_v22, 1  ;;  %v1235_v38 = vadd.f32 %v1234_v27, %v1233_v15  ;;  %v1442_v40 = vpack.c.bf16 %v1314_v28, %v1314_v28  ;;  %v1945_v41 = vunpack.c.l.b16 %v1426_v29  ;;  %v288_v12 = vld [vmem:[#allocation2 + $0x5e0] sm:$0xff]  ;;  %v5658_v27 = vld [vmem:[#allocation7 + $0x2e8] sm:$0xff]  }
 0x15b   :  { %v1346_v39 = vmul.f32 0.0625, %v1013_v26  ;;  %v1458_v45 = vpack.c.bf16 %v1330_v33, %v1330_v33  ;;  %v441_v48 = vrot.slane %v440_v36, 4  ;;  %v552_v52 = vadd.f32 %v160_v31, %v144_v30  ;;  %v5656_v20 = vld [vmem:[#allocation7 + $0x2a0] sm:$0xff]  }
 0x15c   :  { %v1125_v44 = vadd.f32 %v1124_v32, %v1123_v22  ;;  %v1236_v53 = vrot.slane %v1235_v38, 1  ;;  %v1961_v57 = vunpack.c.l.b16 %v1442_v40  ;;  %v2127_v58 = vsel %vm2030_vm1, %v1945_v41, %v2126_v34  ;;  %5248 = vmatpush3.bf16.msra.mxu1 %v5648_v17  ;;  %v304_v22 = vld [vmem:[#allocation2 + $0x660] sm:$0xff] }
 0x15d   :  { %v1474_v55 = vpack.c.bf16 %v1346_v39, %v1346_v39  ;;  %v1977_v62 = vunpack.c.l.b16 %v1458_v45  ;;  %v442_v0 = vadd.f32 %v441_v48, %v440_v36  ;;  %v553_v1 = vrot.slane %v552_v52, 4  ;;  %5249 = vmatprep.subr.bf16.mxu1 %v5650_v37  ;;  %v320_v29 = vld [vmem:[#allocation2 + $0x6e0] sm:$0xff] }
 0x15e   :  { %v1362_v61 = vmul.f32 0.0625, %v1125_v44  ;;  %v1237_v4 = vadd.f32 %v1236_v53, %v1235_v38  ;;  %v2128_v6 = vsel %vm2032_vm2, %v1961_v57, %v2127_v58  ;;  %v664_v8 = vadd.f32 %v192_v43, %v176_v35  ;;  %v336_v38 = vld [vmem:[#allocation2 + $0x760] sm:$0xff]  ;;  %v5660_v43 = vld [vmem:[#allocation7 + $0x2a8] sm:$0xff]  }
 0x15f   :  { %v1993_v5 = vunpack.c.l.b16 %v1474_v55  ;;  %v2129_v11 = vsel %vm2034_vm3, %v1977_v62, %v2128_v6  ;;  %v443_v13 = vrot.slane %v442_v0, 2  ;;  %v554_v14 = vadd.f32 %v553_v1, %v552_v52  ;;  %v352_v44 = vld [vmem:[#allocation2 + $0x7e0] sm:$0xff]  ;;  %v5662_v52 = vld [vmem:[#allocation7 + $0x2f0] sm:$0xff]  }
 0x160   :  { %v1490_v10 = vpack.c.bf16 %v1362_v61, %v1362_v61  ;;  %v1378_v15 = vmul.f32 0.0625, %v1237_v4  ;;  %v665_v17 = vrot.slane %v664_v8, 4  ;;  %v776_v19 = vadd.f32 %v224_v47, %v208_v46  ;;  %5250 = vmatpush3.bf16.msra.mxu1 %v5652_v60  ;;  %v5664_v4 = vld [vmem:[#allocation7 + $0x2b0] sm:$0xff]  }
 0x161   :  { %v2130_v16 = vsel %vm2036_vm4, %v1993_v5, %v2129_v11  ;;  %v444_v23 = vadd.f32 %v443_v13, %v442_v0  ;;  %v555_v24 = vrot.slane %v554_v14, 2  ;;  %v888_v26 = vadd.f32 %v256_v63, %v240_v59  ;;  %5251 = vmatprep.subr.bf16.mxu1 %v5654_v3 }
 0x162   :  { %v2009_v21 = vunpack.c.l.b16 %v1490_v10  ;;  %v1506_v28 = vpack.c.bf16 %v1378_v15, %v1378_v15  ;;  %v666_v30 = vadd.f32 %v665_v17, %v664_v8  ;;  %v777_v31 = vrot.slane %v776_v19, 4  ;;  %v5666_v10 = vld [vmem:[#allocation7 + $0x2f8] sm:$0xff]  }
 0x163   :  { %v1000_v32 = vadd.f32 %v288_v12, %v272_v7  ;;  %v445_v34 = vrot.slane %v444_v23, 1  ;;  %v556_v35 = vadd.f32 %v555_v24, %v554_v14  ;;  %v889_v36 = vrot.slane %v888_v26, 4  ;;  %v5668_v15 = vld [vmem:[#allocation7 + $0x2b8] sm:$0xff]  }
 0x164   :  { %v2131_v33 = vsel %vm2038_vm5, %v2009_v21, %v2130_v16  ;;  %v2025_v37 = vunpack.c.l.b16 %v1506_v28  ;;  %v667_v39 = vrot.slane %v666_v30, 2  ;;  %v778_v40 = vadd.f32 %v777_v31, %v776_v19  ;;  %5252 = vmatpush3.bf16.msra.mxu1 %v5656_v20  ;;  %v111_v16 = vld [vmem:[#allocation2 + $0x58] sm:$0xff]  ;;  %v5670_v28 = vld [vmem:[#allocation7 + $0x3c0] sm:$0xff]  }
 0x165   :  { %v1001_v41 = vrot.slane %v1000_v32, 4  ;;  %v446_v45 = vadd.f32 %v445_v34, %v444_v23  ;;  %v557_v46 = vrot.slane %v556_v35, 1  ;;  %v890_v47 = vadd.f32 %v889_v36, %v888_v26  ;;  %5253 = vmatprep.subr.bf16.mxu1 %v5658_v27  ;;  %v127_v27 = vld [vmem:[#allocation2 + $0xd8] sm:$0xff] }
 0x166   :  { %v1112_v48 = vadd.f32 %v320_v29, %v304_v22  ;;  %v2132_v53 = vsel %vm2040_vm6, %v2025_v37, %v2131_v33  ;;  %v668_v55 = vadd.f32 %v667_v39, %v666_v30  ;;  %v779_v57 = vrot.slane %v778_v40, 2  ;;  %v143_v37 = vld [vmem:[#allocation2 + $0x158] sm:$0xff] }
 0x167   :  { %v1002_v58 = vadd.f32 %v1001_v41, %v1000_v32  ;;  %v6246_v59 = vpack.c.b16 %v2132_v53, %v2132_v53  ;;  %v558_v60 = vadd.f32 %v557_v46, %v556_v35  ;;  %v891_v61 = vrot.slane %v890_v47, 2 }
 0x168   :  { %v1113_v62 = vrot.slane %v1112_v48, 4  ;;  %v669_v63 = vrot.slane %v668_v55, 1  ;;  %v780_v0 = vadd.f32 %v779_v57, %v778_v40  ;;  %v1224_v3 = vadd.f32 %v352_v44, %v336_v38  ;;  %5254 = vmatpush3.bf16.msra.mxu1 %v5660_v43  ;;  %v159_v38 = vld [vmem:[#allocation2 + $0x1d8] sm:$0xff] }
 0x169   :  { %v1003_v1 = vrot.slane %v1002_v58, 2  ;;  %3219 = vmatprep.mubr.bf16.mxu0 %v6246_v59  ;;  %v892_v5 = vadd.f32 %v891_v61, %v890_v47  ;;  %v1265_v7 = vmul.f32 0.0625, %v446_v45  ;;  %v1281_v8 = vmul.f32 0.0625, %v558_v60  ;;  %5255 = vmatprep.subr.bf16.mxu1 %v5662_v52  ;;  %v175_v43 = vld [vmem:[#allocation2 + $0x258] sm:$0xff] }
 0x16a   :  { %v1114_v6 = vadd.f32 %v1113_v62, %v1112_v48  ;;  %v670_v11 = vadd.f32 %v669_v63, %v668_v55  ;;  %v781_v12 = vrot.slane %v780_v0, 1  ;;  %v1225_v14 = vrot.slane %v1224_v3, 4  ;;  %v191_v52 = vld [vmem:[#allocation2 + $0x2d8] sm:$0xff] }
 0x16b   :  { %v1004_v13 = vadd.f32 %v1003_v1, %v1002_v58  ;;  %v893_v17 = vrot.slane %v892_v5, 1  ;;  %v1393_v20 = vpack.c.bf16 %v1265_v7, %v1265_v7  ;;  %v1409_v21 = vpack.c.bf16 %v1281_v8, %v1281_v8  ;;  %v207_v57 = vld [vmem:[#allocation2 + $0x358] sm:$0xff] }
 0x16c   :  { %v1115_v19 = vrot.slane %v1114_v6, 2  ;;  %v782_v22 = vadd.f32 %v781_v12, %v780_v0  ;;  %v1226_v24 = vadd.f32 %v1225_v14, %v1224_v3  ;;  %v1297_v26 = vmul.f32 0.0625, %v670_v11  ;;  %5256 = vmatpush3.bf16.msra.mxu1 %v5664_v4  ;;  %v223_v58 = vld [vmem:[#allocation2 + $0x3d8] sm:$0xff] }
 0x16d   :  { %v1005_v23 = vrot.slane %v1004_v13, 1  ;;  %v894_v29 = vadd.f32 %v893_v17, %v892_v5  ;;  %v1912_v31 = vunpack.c.l.b16 %v1393_v20  ;;  %v1928_v32 = vunpack.c.l.b16 %v1409_v21  ;;  %5257 = vmatprep.subr.bf16.mxu1 %v5666_v10  ;;  %v239_v3 = vld [vmem:[#allocation2 + $0x458] sm:$0xff] }
 0x16e   :  { %v1116_v30 = vadd.f32 %v1115_v19, %v1114_v6  ;;  %v1227_v34 = vrot.slane %v1226_v24, 2  ;;  %v1313_v35 = vmul.f32 0.0625, %v782_v22  ;;  %v1425_v36 = vpack.c.bf16 %v1297_v26, %v1297_v26  ;;  %v255_v6 = vld [vmem:[#allocation2 + $0x4d8] sm:$0xff] }
 0x16f   :  { %v1006_v33 = vadd.f32 %v1005_v23, %v1004_v13  ;;  %v1329_v40 = vmul.f32 0.0625, %v894_v29  ;;  %v2119_v41 = vsel %vm2028_vm0, %v1928_v32, %v1912_v31  ;;  %v433_v44 = vadd.f32 %v127_v27, %v111_v16  ;;  %v271_v7 = vld [vmem:[#allocation2 + $0x558] sm:$0xff] }
 0x170   :  { %v1117_v39 = vrot.slane %v1116_v30, 1  ;;  %v1228_v45 = vadd.f32 %v1227_v34, %v1226_v24  ;;  %v1441_v47 = vpack.c.bf16 %v1313_v35, %v1313_v35  ;;  %v1944_v48 = vunpack.c.l.b16 %v1425_v36  ;;  %5258 = vmatpush3.bf16.msra.mxu1 %v5668_v15  ;;  %v287_v17 = vld [vmem:[#allocation2 + $0x5d8] sm:$0xff] }
 0x171   :  { %v1345_v46 = vmul.f32 0.0625, %v1006_v33  ;;  %v1457_v55 = vpack.c.bf16 %v1329_v40, %v1329_v40  ;;  %v434_v60 = vrot.slane %v433_v44, 4  ;;  %v545_v61 = vadd.f32 %v159_v38, %v143_v37  ;;  %5287 = vmatprep.subr.bf16.mxu1 %v5670_v28  ;;  %v303_v27 = vld [vmem:[#allocation2 + $0x658] sm:$0xff] }
 0x172   :  { %v1118_v53 = vadd.f32 %v1117_v39, %v1116_v30  ;;  %v1229_v62 = vrot.slane %v1228_v45, 1  ;;  %v1960_v0 = vunpack.c.l.b16 %v1441_v47  ;;  %v2120_v1 = vsel %vm2030_vm1, %v1944_v48, %v2119_v41  ;;  %v319_v32 = vld [vmem:[#allocation2 + $0x6d8] sm:$0xff] }
 0x173   :  { %v1473_v63 = vpack.c.bf16 %v1345_v46, %v1345_v46  ;;  %v1976_v5 = vunpack.c.l.b16 %v1457_v55  ;;  %v435_v8 = vadd.f32 %v434_v60, %v433_v44  ;;  %v546_v10 = vrot.slane %v545_v61, 4  ;;  %v335_v37 = vld [vmem:[#allocation2 + $0x758] sm:$0xff] }
 0x174   :  { %v1361_v4 = vmul.f32 0.0625, %v1118_v53  ;;  %v1230_v11 = vadd.f32 %v1229_v62, %v1228_v45  ;;  %v2121_v13 = vsel %vm2032_vm2, %v1960_v0, %v2120_v1  ;;  %v657_v14 = vadd.f32 %v191_v52, %v175_v43  ;;  %v351_v46 = vld [vmem:[#allocation2 + $0x7d8] sm:$0xff] }
 0x175   :  { %v1992_v12 = vunpack.c.l.b16 %v1473_v63  ;;  %v2122_v16 = vsel %vm2034_vm3, %v1976_v5, %v2121_v13  ;;  %v436_v19 = vrot.slane %v435_v8, 2  ;;  %v547_v20 = vadd.f32 %v546_v10, %v545_v61  ;;  %v5651_v63 = vld [vmem:[#allocation8 + $0x48] sm:$0xff]   ;;  %v5655_v10 = vld [vmem:[#allocation8 + $0x50] sm:$0xff]  }
 0x176   :  { %v1489_v15 = vpack.c.bf16 %v1361_v4, %v1361_v4  ;;  %v1377_v21 = vmul.f32 0.0625, %v1230_v11  ;;  %v658_v23 = vrot.slane %v657_v14, 4  ;;  %v769_v24 = vadd.f32 %v223_v58, %v207_v57  ;;  %v5649_v57 = vld [vmem:[#allocation8] sm:$0xff]  }
 0x177   :  { %v2123_v22 = vsel %vm2036_vm4, %v1992_v12, %v2122_v16  ;;  %v437_v28 = vadd.f32 %v436_v19, %v435_v8  ;;  %v548_v29 = vrot.slane %v547_v20, 2  ;;  %v881_v30 = vadd.f32 %v255_v6, %v239_v3  ;;  %v5653_v8 = vld [vmem:[#allocation8 + $0x8] sm:$0xff]  }
 0x178   :  { %v2008_v26 = vunpack.c.l.b16 %v1489_v15  ;;  %v1505_v31 = vpack.c.bf16 %v1377_v21, %v1377_v21  ;;  %v659_v33 = vadd.f32 %v658_v23, %v657_v14  ;;  %v770_v34 = vrot.slane %v769_v24, 4 }
 0x179   :  { %v993_v35 = vadd.f32 %v287_v17, %v271_v7  ;;  %v438_v38 = vrot.slane %v437_v28, 1  ;;  %v549_v39 = vadd.f32 %v548_v29, %v547_v20  ;;  %v882_v40 = vrot.slane %v881_v30, 4 }
 0x17a   :  { %v2124_v36 = vsel %vm2038_vm5, %v2008_v26, %v2123_v22  ;;  %v2024_v41 = vunpack.c.l.b16 %v1505_v31  ;;  %v660_v43 = vrot.slane %v659_v33, 2  ;;  %v771_v44 = vadd.f32 %v770_v34, %v769_v24  ;;  %v5657_v24 = vld [vmem:[#allocation8 + $0x10] sm:$0xff]  }
 0x17b   :  { %v994_v45 = vrot.slane %v993_v35, 4  ;;  %v439_v47 = vadd.f32 %v438_v38, %v437_v28  ;;  %v550_v48 = vrot.slane %v549_v39, 1  ;;  %v883_v52 = vadd.f32 %v882_v40, %v881_v30  ;;  %v110_v30 = vld [vmem:[#allocation2 + $0x50] sm:$0xff] }
 0x17c   :  { %v1105_v53 = vadd.f32 %v319_v32, %v303_v27  ;;  %v2125_v55 = vsel %vm2040_vm6, %v2024_v41, %v2124_v36  ;;  %v661_v58 = vadd.f32 %v660_v43, %v659_v33  ;;  %v772_v60 = vrot.slane %v771_v44, 2  ;;  %v126_v31 = vld [vmem:[#allocation2 + $0xd0] sm:$0xff]  ;;  %v5659_v32 = vld [vmem:[#allocation8 + $0x58] sm:$0xff]  }
 0x17d   :  { %v995_v61 = vadd.f32 %v994_v45, %v993_v35  ;;  %v6256_v62 = vpack.c.b16 %v2125_v55, %v2125_v55  ;;  %v551_v0 = vadd.f32 %v550_v48, %v549_v39  ;;  %v884_v1 = vrot.slane %v883_v52, 2  ;;  %v142_v40 = vld [vmem:[#allocation2 + $0x150] sm:$0xff]  ;;  %v5661_v48 = vld [vmem:[#allocation8 + $0x18] sm:$0xff]  }
 0x17e   :  { %v1106_v3 = vrot.slane %v1105_v53, 4  ;;  %v662_v4 = vrot.slane %v661_v58, 1  ;;  %v773_v5 = vadd.f32 %v772_v60, %v771_v44  ;;  %v1217_v7 = vadd.f32 %v351_v46, %v335_v37  ;;  %v158_v41 = vld [vmem:[#allocation2 + $0x1d0] sm:$0xff]  ;;  %v5663_v60 = vld [vmem:[#allocation8 + $0x60] sm:$0xff]  }
 0x17f   :  { %v996_v6 = vrot.slane %v995_v61, 2  ;;  %3220 = vmatmul.mubr.bf16.vlgmr.msra.gmra.mrb[8].mxu0 %v6256_v62  ;;  %v885_v11 = vadd.f32 %v884_v1, %v883_v52  ;;  %v1264_v13 = vmul.f32 0.0625, %v439_v47  ;;  %v1280_v14 = vmul.f32 0.0625, %v551_v0  ;;  %v174_v46 = vld [vmem:[#allocation2 + $0x250] sm:$0xff] }
 0x180   :  { %v1107_v12 = vadd.f32 %v1106_v3, %v1105_v53  ;;  %5310 = vmatpush3.bf16.msra.mxu0 %v5649_v57  ;;  %v663_v15 = vadd.f32 %v662_v4, %v661_v58  ;;  %v774_v16 = vrot.slane %v773_v5, 1  ;;  %v1218_v19 = vrot.slane %v1217_v7, 4  ;;  %4331 = vmatprep.mubr.bf16.mxu0 %v6146_v42  ;;  %v190_v58 = vld [vmem:[#allocation2 + $0x2d0] sm:$0xff] }
 0x181   :  { %v997_v17 = vadd.f32 %v996_v6, %v995_v61  ;;  %5311 = vmatprep.subr.bf16.mxu0 %v5651_v63  ;;  %v886_v20 = vrot.slane %v885_v11, 1  ;;  %v1392_v22 = vpack.c.bf16 %v1264_v13, %v1264_v13  ;;  %v1408_v23 = vpack.c.bf16 %v1280_v14, %v1280_v14  ;;  %v206_v0 = vld [vmem:[#allocation2 + $0x350] sm:$0xff] }
 0x182   :  { %v1108_v21 = vrot.slane %v1107_v12, 2  ;;  %v775_v26 = vadd.f32 %v774_v16, %v773_v5  ;;  %v1219_v28 = vadd.f32 %v1218_v19, %v1217_v7  ;;  %v1296_v29 = vmul.f32 0.0625, %v663_v15  ;;  %v222_v1 = vld [vmem:[#allocation2 + $0x3d0] sm:$0xff] }
 0x183   :  { %v998_v27 = vrot.slane %v997_v17, 1  ;;  %v887_v33 = vadd.f32 %v886_v20, %v885_v11  ;;  %v1911_v35 = vunpack.c.l.b16 %v1392_v22  ;;  %v1927_v36 = vunpack.c.l.b16 %v1408_v23  ;;  %v254_v13 = vld [vmem:[#allocation2 + $0x4d0] sm:$0xff] }
 0x184   :  { %v1109_v34 = vadd.f32 %v1108_v21, %v1107_v12  ;;  %5312 = vmatpush3.bf16.msra.mxu0 %v5653_v8  ;;  %v1220_v42 = vrot.slane %v1219_v28, 2  ;;  %v1312_v38 = vmul.f32 0.0625, %v775_v26  ;;  %v1424_v39 = vpack.c.bf16 %v1296_v29, %v1296_v29  ;;  %v270_v14 = vld [vmem:[#allocation2 + $0x550] sm:$0xff]  ;;  %v5667_v29 = vld [vmem:[#allocation8 + $0x68] sm:$0xff]  }
 0x185   :  { %v999_v37 = vadd.f32 %v998_v27, %v997_v17  ;;  %5313 = vmatprep.subr.bf16.mxu0 %v5655_v10  ;;  %v1328_v44 = vmul.f32 0.0625, %v887_v33  ;;  %v2112_v45 = vsel %vm2028_vm0, %v1927_v36, %v1911_v35  ;;  %v426_v47 = vadd.f32 %v126_v31, %v110_v30  ;;  %v238_v10 = vld [vmem:[#allocation2 + $0x450] sm:$0xff] }
 0x186   :  { %v1110_v43 = vrot.slane %v1109_v34, 1  ;;  %v1221_v52 = vadd.f32 %v1220_v42, %v1219_v28  ;;  %v1440_v55 = vpack.c.bf16 %v1312_v38, %v1312_v38  ;;  %v1943_v57 = vunpack.c.l.b16 %v1424_v39  ;;  %v5665_v28 = vld [vmem:[#allocation8 + $0x20] sm:$0xff]   ;;  %v302_v35 = vld [vmem:[#allocation2 + $0x650] sm:$0xff]  ;;  %v5669_v38 = vld [vmem:[#allocation8 + $0x28] sm:$0xff]  }
 0x187   :  { %v1344_v53 = vmul.f32 0.0625, %v999_v37  ;;  %v1456_v63 = vpack.c.bf16 %v1328_v44, %v1328_v44  ;;  %v427_v3 = vrot.slane %v426_v47, 4  ;;  %v538_v4 = vadd.f32 %v158_v41, %v142_v40  ;;  %v318_v40 = vld [vmem:[#allocation2 + $0x6d0] sm:$0xff] }
 0x188   :  { %v1111_v61 = vadd.f32 %v1110_v43, %v1109_v34  ;;  %5314 = vmatpush3.bf16.msra.mxu0 %v5657_v24  ;;  %v1222_v5 = vrot.slane %v1221_v52, 1  ;;  %v1959_v7 = vunpack.c.l.b16 %v1440_v55  ;;  %v2113_v8 = vsel %vm2030_vm1, %v1943_v57, %v2112_v45  ;;  %v286_v24 = vld [vmem:[#allocation2 + $0x5d0] sm:$0xff] }
 0x189   :  { %v1472_v6 = vpack.c.bf16 %v1344_v53, %v1344_v53  ;;  %5315 = vmatprep.subr.bf16.mxu0 %v5659_v32  ;;  %v1975_v12 = vunpack.c.l.b16 %v1456_v63  ;;  %v428_v15 = vadd.f32 %v427_v3, %v426_v47  ;;  %v539_v16 = vrot.slane %v538_v4, 4  ;;  %v350_v47 = vld [vmem:[#allocation2 + $0x7d0] sm:$0xff] }
 0x18a   :  { %v1360_v11 = vmul.f32 0.0625, %v1111_v61  ;;  %v1223_v17 = vadd.f32 %v1222_v5, %v1221_v52  ;;  %v2114_v20 = vsel %vm2032_vm2, %v1959_v7, %v2113_v8  ;;  %v650_v21 = vadd.f32 %v190_v58, %v174_v46  ;;  %v334_v46 = vld [vmem:[#allocation2 + $0x750] sm:$0xff] }
 0x18b   :  { %v1991_v19 = vunpack.c.l.b16 %v1472_v6  ;;  %v2115_v23 = vsel %vm2034_vm3, %v1975_v12, %v2114_v20  ;;  %v429_v26 = vrot.slane %v428_v15, 2  ;;  %v540_v27 = vadd.f32 %v539_v16, %v538_v4  ;;  %v5671_v3 = vld [vmem:[#allocation8 + $0x70] sm:$0xff]  }
 0x18c   :  { %v1488_v22 = vpack.c.bf16 %v1360_v11, %v1360_v11  ;;  %5316 = vmatpush3.bf16.msra.mxu0 %v5661_v48  ;;  %v1376_v30 = vmul.f32 0.0625, %v1223_v17  ;;  %v651_v32 = vrot.slane %v650_v21, 4  ;;  %v762_v33 = vadd.f32 %v222_v1, %v206_v0 }
 0x18d   :  { %v2116_v31 = vsel %vm2036_vm4, %v1991_v19, %v2115_v23  ;;  %5317 = vmatprep.subr.bf16.mxu0 %v5663_v60  ;;  %v430_v36 = vadd.f32 %v429_v26, %v428_v15  ;;  %v541_v37 = vrot.slane %v540_v27, 2  ;;  %v874_v42 = vadd.f32 %v254_v13, %v238_v10  ;;  %v5673_v13 = vld [vmem:[#allocation8 + $0x30] sm:$0xff]   ;;  %v5675_v23 = vld [vmem:[#allocation8 + $0x78] sm:$0xff]  }
 0x18e   :  { %v2007_v34 = vunpack.c.l.b16 %v1488_v22  ;;  %v1504_v39 = vpack.c.bf16 %v1376_v30, %v1376_v30  ;;  %v652_v41 = vadd.f32 %v651_v32, %v650_v21  ;;  %v763_v43 = vrot.slane %v762_v33, 4  ;;  %v115_v30 = vld [vmem:[#allocation2 + $0x78] sm:$0xff] }
 0x18f   :  { %v986_v44 = vadd.f32 %v286_v24, %v270_v14  ;;  %v431_v48 = vrot.slane %v430_v36, 1  ;;  %v542_v52 = vadd.f32 %v541_v37, %v540_v27  ;;  %v875_v53 = vrot.slane %v874_v42, 4 }
 0x190   :  { %v2117_v45 = vsel %vm2038_vm5, %v2007_v34, %v2116_v31  ;;  %5318 = vmatpush3.bf16.msra.mxu0 %v5665_v28  ;;  %v2023_v55 = vunpack.c.l.b16 %v1504_v39  ;;  %v653_v57 = vrot.slane %v652_v41, 2  ;;  %v764_v58 = vadd.f32 %v763_v43, %v762_v33  ;;  %v131_v39 = vld [vmem:[#allocation2 + $0xf8] sm:$0xff] }
 0x191   :  { %v987_v60 = vrot.slane %v986_v44, 4  ;;  %5319 = vmatprep.subr.bf16.mxu0 %v5667_v29  ;;  %v432_v61 = vadd.f32 %v431_v48, %v430_v36  ;;  %v543_v63 = vrot.slane %v542_v52, 1  ;;  %v876_v0 = vadd.f32 %v875_v53, %v874_v42  ;;  %v5677_v29 = vld [vmem:[#allocation8 + $0x38] sm:$0xff]  }
 0x192   :  { %v1098_v1 = vadd.f32 %v318_v40, %v302_v35  ;;  %v2118_v4 = vsel %vm2040_vm6, %v2023_v55, %v2117_v45  ;;  %v654_v5 = vadd.f32 %v653_v57, %v652_v41  ;;  %v765_v6 = vrot.slane %v764_v58, 2  ;;  %v147_v53 = vld [vmem:[#allocation2 + $0x178] sm:$0xff] }
 0x193   :  { %v988_v7 = vadd.f32 %v987_v60, %v986_v44  ;;  %v6267_v8 = vpack.c.b16 %v2118_v4, %v2118_v4  ;;  %v544_v10 = vadd.f32 %v543_v63, %v542_v52  ;;  %v877_v11 = vrot.slane %v876_v0, 2  ;;  %v5681_v52 = vld [vmem:[#allocation8 + $0x100] sm:$0xff]   ;;  %v163_v55 = vld [vmem:[#allocation2 + $0x1f8] sm:$0xff] }
 0x194   :  { %v1099_v12 = vrot.slane %v1098_v1, 4  ;;  %5320 = vmatpush3.bf16.msra.mxu0 %v5669_v38  ;;  %v655_v14 = vrot.slane %v654_v5, 1  ;;  %v766_v15 = vadd.f32 %v765_v6, %v764_v58  ;;  %v1210_v17 = vadd.f32 %v350_v47, %v334_v46  ;;  %v5679_v38 = vld [vmem:[#allocation8 + $0x140] sm:$0xff]   ;;  %v179_v63 = vld [vmem:[#allocation2 + $0x278] sm:$0xff] }
 0x195   :  { %v989_v16 = vrot.slane %v988_v7, 2  ;;  %3179 = vmatprep.mubr.bf16.mxu1 %v6267_v8  ;;  %v878_v19 = vadd.f32 %v877_v11, %v876_v0  ;;  %v1263_v21 = vmul.f32 0.0625, %v432_v61  ;;  %v1279_v22 = vmul.f32 0.0625, %v544_v10  ;;  %5321 = vmatprep.subr.bf16.mxu0 %v5671_v3  ;;  %v5683_v61 = vld [vmem:[#allocation8 + $0x148] sm:$0xff]   ;;  %v195_v6 = vld [vmem:[#allocation2 + $0x2f8] sm:$0xff] }
 0x196   :  { %v1100_v20 = vadd.f32 %v1099_v12, %v1098_v1  ;;  %v656_v24 = vadd.f32 %v655_v14, %v654_v5  ;;  %v767_v26 = vrot.slane %v766_v15, 1  ;;  %v1211_v28 = vrot.slane %v1210_v17, 4  ;;  %v211_v11 = vld [vmem:[#allocation2 + $0x378] sm:$0xff] }
 0x197   :  { %v990_v27 = vadd.f32 %v989_v16, %v988_v7  ;;  %v879_v31 = vrot.slane %v878_v19, 1  ;;  %v1391_v33 = vpack.c.bf16 %v1263_v21, %v1263_v21  ;;  %v1407_v34 = vpack.c.bf16 %v1279_v22, %v1279_v22  ;;  %v227_v12 = vld [vmem:[#allocation2 + $0x3f8] sm:$0xff] }
 0x198   :  { %v1101_v32 = vrot.slane %v1100_v20, 2  ;;  %v768_v35 = vadd.f32 %v767_v26, %v766_v15  ;;  %v1212_v37 = vadd.f32 %v1211_v28, %v1210_v17  ;;  %v1295_v42 = vmul.f32 0.0625, %v656_v24  ;;  %5322 = vmatpush3.bf16.msra.mxu0 %v5673_v13  ;;  %v243_v21 = vld [vmem:[#allocation2 + $0x478] sm:$0xff]  ;;  %v5687_v24 = vld [vmem:[#allocation8 + $0x150] sm:$0xff]  }
 0x199   :  { %v991_v36 = vrot.slane %v990_v27, 1  ;;  %v880_v40 = vadd.f32 %v879_v31, %v878_v19  ;;  %v1910_v43 = vunpack.c.l.b16 %v1391_v33  ;;  %v1926_v44 = vunpack.c.l.b16 %v1407_v34  ;;  %5323 = vmatprep.subr.bf16.mxu0 %v5675_v23  ;;  %v259_v26 = vld [vmem:[#allocation2 + $0x4f8] sm:$0xff] }
 0x19a   :  { %v1102_v41 = vadd.f32 %v1101_v32, %v1100_v20  ;;  %v1213_v46 = vrot.slane %v1212_v37, 2  ;;  %v1311_v47 = vmul.f32 0.0625, %v768_v35  ;;  %v1423_v48 = vpack.c.bf16 %v1295_v42, %v1295_v42  ;;  %v5685_v20 = vld [vmem:[#allocation8 + $0x108] sm:$0xff]  }
 0x19b   :  { %v992_v45 = vadd.f32 %v991_v36, %v990_v27  ;;  %v1327_v58 = vmul.f32 0.0625, %v880_v40  ;;  %v2105_v60 = vsel %vm2028_vm0, %v1926_v44, %v1910_v43  ;;  %v461_v0 = vadd.f32 %v131_v39, %v115_v30  ;;  %v275_v27 = vld [vmem:[#allocation2 + $0x578] sm:$0xff]  ;;  %v5689_v39 = vld [vmem:[#allocation8 + $0x110] sm:$0xff]  }
 0x19c   :  { %v1103_v57 = vrot.slane %v1102_v41, 1  ;;  %v1214_v1 = vadd.f32 %v1213_v46, %v1212_v37  ;;  %v1439_v4 = vpack.c.bf16 %v1311_v47, %v1311_v47  ;;  %v1942_v5 = vunpack.c.l.b16 %v1423_v48  ;;  %5324 = vmatpush3.bf16.msra.mxu0 %v5677_v29  ;;  %v291_v36 = vld [vmem:[#allocation2 + $0x5f8] sm:$0xff] }
 0x19d   :  { %v1343_v3 = vmul.f32 0.0625, %v992_v45  ;;  %v1455_v10 = vpack.c.bf16 %v1327_v58, %v1327_v58  ;;  %5353 = vmatprep.subr.bf16.mxu0 %v5679_v38  ;;  %v462_v13 = vrot.slane %v461_v0, 4  ;;  %v573_v14 = vadd.f32 %v163_v55, %v147_v53  ;;  %v5691_v44 = vld [vmem:[#allocation8 + $0x158] sm:$0xff]  }
 0x19e   :  { %v1104_v7 = vadd.f32 %v1103_v57, %v1102_v41  ;;  %v1215_v15 = vrot.slane %v1214_v1, 1  ;;  %v1958_v17 = vunpack.c.l.b16 %v1439_v4  ;;  %v2106_v19 = vsel %vm2030_vm1, %v1942_v5, %v2105_v60  ;;  %v307_v45 = vld [vmem:[#allocation2 + $0x678] sm:$0xff] }
 0x19f   :  { %v1471_v16 = vpack.c.bf16 %v1343_v3, %v1343_v3  ;;  %v1974_v23 = vunpack.c.l.b16 %v1455_v10  ;;  %4332 = vmatmul.mubr.bf16.vlgmr.msra.gmra.mrb[12].mxu0 %v6156_v25  ;;  %v463_v28 = vadd.f32 %v462_v13, %v461_v0  ;;  %v574_v29 = vrot.slane %v573_v14, 4  ;;  %v339_v60 = vld [vmem:[#allocation2 + $0x778] sm:$0xff]  ;;  %v5672_v3 = vld [vmem:[#allocation7 + $0x380] sm:$0xff]  }
 0x1a0   :  { %v1359_v22 = vmul.f32 0.0625, %v1104_v7  ;;  %v1216_v30 = vadd.f32 %v1215_v15, %v1214_v1  ;;  %v2107_v32 = vsel %vm2032_vm2, %v1958_v17, %v2106_v19  ;;  %5354 = vmatpush3.bf16.msra.mxu0 %v5681_v52  ;;  %v685_v33 = vadd.f32 %v195_v6, %v179_v63  ;;  %4411 = vmatprep.mubr.bf16.mxu0 %v6166_v18  ;;  %v323_v52 = vld [vmem:[#allocation2 + $0x6f8] sm:$0xff] }
 0x1a1   :  { %v1990_v31 = vunpack.c.l.b16 %v1471_v16  ;;  %v2108_v35 = vsel %vm2034_vm3, %v1974_v23, %v2107_v32  ;;  %5355 = vmatprep.subr.bf16.mxu0 %v5683_v61  ;;  %v464_v37 = vrot.slane %v463_v28, 2  ;;  %v575_v25 = vadd.f32 %v574_v29, %v573_v14  ;;  %v355_v7 = vld [vmem:[#allocation2 + $0x7f8] sm:$0xff]  ;;  %v6281_v32 = vpop.f32.mrb[0].mxu1 }
 0x1a2   :  { %v1487_v34 = vpack.c.bf16 %v1359_v22, %v1359_v22  ;;  %v1375_v42 = vmul.f32 0.0625, %v1216_v30  ;;  %v686_v40 = vrot.slane %v685_v33, 4  ;;  %v797_v41 = vadd.f32 %v227_v12, %v211_v11  ;;  %v5693_v15 = vld [vmem:[#allocation8 + $0x118] sm:$0xff]   ;;  %v5695_v22 = vld [vmem:[#allocation8 + $0x160] sm:$0xff]  }
 0x1a3   :  { %v2109_v38 = vsel %vm2036_vm4, %v1990_v31, %v2108_v35  ;;  %v465_v46 = vadd.f32 %v464_v37, %v463_v28  ;;  %v576_v47 = vrot.slane %v575_v25, 2  ;;  %v909_v48 = vadd.f32 %v259_v26, %v243_v21  ;;  %v5674_v21 = vld [vmem:[#allocation7 + $0x3c8] sm:$0xff]  }
 0x1a4   :  { %v2006_v43 = vunpack.c.l.b16 %v1487_v34  ;;  %v1503_v18 = vpack.c.bf16 %v1375_v42, %v1375_v42  ;;  %5356 = vmatpush3.bf16.msra.mxu0 %v5685_v20  ;;  %v687_v53 = vadd.f32 %v686_v40, %v685_v33  ;;  %v798_v55 = vrot.slane %v797_v41, 4  ;;  %v5678_v33 = vld [vmem:[#allocation7 + $0x3d0] sm:$0xff]   ;;  %v5697_v34 = vld [vmem:[#allocation8 + $0x120] sm:$0xff]   ;;  %v5699_v35 = vld [vmem:[#allocation8 + $0x168] sm:$0xff]  }
 0x1a5   :  { %v1021_v57 = vadd.f32 %v291_v36, %v275_v27  ;;  %5357 = vmatprep.subr.bf16.mxu0 %v5687_v24  ;;  %v466_v61 = vrot.slane %v465_v46, 1  ;;  %v577_v63 = vadd.f32 %v576_v47, %v575_v25  ;;  %v910_v0 = vrot.slane %v909_v48, 4  ;;  %v5676_v27 = vld [vmem:[#allocation7 + $0x388] sm:$0xff]  }
 0x1a6   :  { %v2110_v58 = vsel %vm2038_vm5, %v2006_v43, %v2109_v38  ;;  %v2022_v1 = vunpack.c.l.b16 %v1503_v18  ;;  %v688_v4 = vrot.slane %v687_v53, 2  ;;  %v799_v5 = vadd.f32 %v798_v55, %v797_v41  ;;  %v6284_v38 = vpop.f32.mrb[1].mxu1 }
 0x1a7   :  { %v1022_v6 = vrot.slane %v1021_v57, 4  ;;  %v467_v10 = vadd.f32 %v466_v61, %v465_v46  ;;  %v578_v11 = vrot.slane %v577_v63, 1  ;;  %v911_v12 = vadd.f32 %v910_v0, %v909_v48  ;;  %v146_v61 = vld [vmem:[#allocation2 + $0x170] sm:$0xff]  ;;  %v5682_v0 = vld [vmem:[#allocation7 + $0x3d8] sm:$0xff]  }
 0x1a8   :  { %v1133_v13 = vadd.f32 %v323_v52, %v307_v45  ;;  %v2111_v14 = vsel %vm2040_vm6, %v2022_v1, %v2110_v58  ;;  %5358 = vmatpush3.bf16.msra.mxu0 %v5689_v39  ;;  %v689_v16 = vadd.f32 %v688_v4, %v687_v53  ;;  %v800_v17 = vrot.slane %v799_v5, 2  ;;  %v130_v45 = vld [vmem:[#allocation2 + $0xf0] sm:$0xff]  ;;  %v5701_v53 = vld [vmem:[#allocation8 + $0x128] sm:$0xff]  }
 0x1a9   :  { %v1023_v19 = vadd.f32 %v1022_v6, %v1021_v57  ;;  %v6279_v20 = vpack.c.b16 %v2111_v14, %v2111_v14  ;;  %5359 = vmatprep.subr.bf16.mxu0 %v5691_v44  ;;  %v579_v23 = vadd.f32 %v578_v11, %v577_v63  ;;  %v912_v24 = vrot.slane %v911_v12, 2  ;;  %v114_v44 = vld [vmem:[#allocation2 + $0x70] sm:$0xff]  ;;  %v5152_v63 = vpop.f32.mrb[2].mxu1 }
 0x1aa   :  { %v1134_v26 = vrot.slane %v1133_v13, 4  ;;  %v690_v28 = vrot.slane %v689_v16, 1  ;;  %v801_v29 = vadd.f32 %v800_v17, %v799_v5  ;;  %v1245_v31 = vadd.f32 %v355_v7, %v339_v60  ;;  %v5680_v52 = vld [vmem:[#allocation7 + $0x390] sm:$0xff]   ;;  %v5153_v7 = vpop.f32.mrb[3].mxu1 }
 0x1ab   :  { %v1024_v30 = vrot.slane %v1023_v19, 2  ;;  %3180 = vmatmul.mubr.bf16.vlgmr.msra.gmra.mrb[12].mxu1 %v6279_v20  ;;  %v913_v36 = vadd.f32 %v912_v24, %v911_v12  ;;  %v1268_v25 = vmul.f32 0.0625, %v467_v10  ;;  %v1284_v42 = vmul.f32 0.0625, %v579_v23  ;;  %v162_v6 = vld [vmem:[#allocation2 + $0x1f0] sm:$0xff]  ;;  %v5684_v23 = vld [vmem:[#allocation7 + $0x398] sm:$0xff]  }
 0x1ac   :  { %v1135_v37 = vadd.f32 %v1134_v26, %v1133_v13  ;;  %5288 = vmatpush3.bf16.msra.mxu1 %v5672_v3  ;;  %5360 = vmatpush3.bf16.msra.mxu0 %v5693_v15  ;;  %v691_v39 = vadd.f32 %v690_v28, %v689_v16  ;;  %v802_v40 = vrot.slane %v801_v29, 1  ;;  %v1246_v43 = vrot.slane %v1245_v31, 4  ;;  %v178_v17 = vld [vmem:[#allocation2 + $0x270] sm:$0xff] }
 0x1ad   :  { %v1025_v41 = vadd.f32 %v1024_v30, %v1023_v19  ;;  %5289 = vmatprep.subr.bf16.mxu1 %v5674_v21  ;;  %5361 = vmatprep.subr.bf16.mxu0 %v5695_v22  ;;  %v914_v46 = vrot.slane %v913_v36, 1  ;;  %v1396_v48 = vpack.c.bf16 %v1268_v25, %v1268_v25  ;;  %v1412_v18 = vpack.c.bf16 %v1284_v42, %v1284_v42  ;;  %v194_v19 = vld [vmem:[#allocation2 + $0x2f0] sm:$0xff]  ;;  %v5686_v30 = vld [vmem:[#allocation7 + $0x3e0] sm:$0xff]  }
 0x1ae   :  { %v1136_v47 = vrot.slane %v1135_v37, 2  ;;  %v803_v55 = vadd.f32 %v802_v40, %v801_v29  ;;  %v1247_v58 = vadd.f32 %v1246_v43, %v1245_v31  ;;  %v1300_v60 = vmul.f32 0.0625, %v691_v39  ;;  %v5703_v22 = vld [vmem:[#allocation8 + $0x170] sm:$0xff]   ;;  %v6287_v29 = vpop.f32.mrb[0].mxu0 }
 0x1af   :  { %v1026_v57 = vrot.slane %v1025_v41, 1  ;;  %v915_v1 = vadd.f32 %v914_v46, %v913_v36  ;;  %v1915_v4 = vunpack.c.l.b16 %v1396_v48  ;;  %v1931_v5 = vunpack.c.l.b16 %v1412_v18  ;;  %v258_v43 = vld [vmem:[#allocation2 + $0x4f0] sm:$0xff] }
 0x1b0   :  { %v1137_v3 = vadd.f32 %v1136_v47, %v1135_v37  ;;  %5290 = vmatpush3.bf16.msra.mxu1 %v5676_v27  ;;  %5362 = vmatpush3.bf16.msra.mxu0 %v5697_v34  ;;  %v1248_v11 = vrot.slane %v1247_v58, 2  ;;  %v1316_v12 = vmul.f32 0.0625, %v803_v55  ;;  %v1428_v13 = vpack.c.bf16 %v1300_v60, %v1300_v60  ;;  %v274_v47 = vld [vmem:[#allocation2 + $0x570] sm:$0xff]  ;;  %v5707_v55 = vld [vmem:[#allocation8 + $0x178] sm:$0xff]  }
 0x1b1   :  { %v1027_v10 = vadd.f32 %v1026_v57, %v1025_v41  ;;  %5291 = vmatprep.subr.bf16.mxu1 %v5678_v33  ;;  %5363 = vmatprep.subr.bf16.mxu0 %v5699_v35  ;;  %v1332_v15 = vmul.f32 0.0625, %v915_v1  ;;  %v2140_v16 = vsel %vm2028_vm0, %v1931_v5, %v1915_v4  ;;  %v454_v21 = vadd.f32 %v130_v45, %v114_v44  ;;  %v210_v33 = vld [vmem:[#allocation2 + $0x370] sm:$0xff]  ;;  %v6290_v57 = vpop.f32.mrb[1].mxu0 }
 0x1b2   :  { %v1138_v14 = vrot.slane %v1137_v3, 1  ;;  %v1249_v24 = vadd.f32 %v1248_v11, %v1247_v58  ;;  %v1444_v28 = vpack.c.bf16 %v1316_v12, %v1316_v12  ;;  %v1947_v27 = vunpack.c.l.b16 %v1428_v13  ;;  %v226_v35 = vld [vmem:[#allocation2 + $0x3f0] sm:$0xff]  ;;  %v5196_v1 = vpop.f32.mrb[2].mxu0 }
 0x1b3   :  { %v1348_v26 = vmul.f32 0.0625, %v1027_v10  ;;  %v1460_v34 = vpack.c.bf16 %v1332_v15, %v1332_v15  ;;  %v455_v36 = vrot.slane %v454_v21, 4  ;;  %v566_v37 = vadd.f32 %v162_v6, %v146_v61  ;;  %v242_v41 = vld [vmem:[#allocation2 + $0x470] sm:$0xff]  ;;  %v5197_v7 = vpop.f32.mrb[3].mxu0 }
 0x1b4   :  { %v1139_v31 = vadd.f32 %v1138_v14, %v1137_v3  ;;  %5292 = vmatpush3.bf16.msra.mxu1 %v5680_v52  ;;  %5364 = vmatpush3.bf16.msra.mxu0 %v5701_v53  ;;  %v1250_v25 = vrot.slane %v1249_v24, 1  ;;  %v1963_v39 = vunpack.c.l.b16 %v1444_v28  ;;  %v2141_v40 = vsel %vm2030_vm1, %v1947_v27, %v2140_v16  ;;  %v5705_v44 = vld [vmem:[#allocation8 + $0x130] sm:$0xff]   ;;  %v5688_v52 = vld [vmem:[#allocation7 + $0x3a0] sm:$0xff]   ;;  %v5690_v3 = vld [vmem:[#allocation7 + $0x3e8] sm:$0xff]  }
 0x1b5   :  { %v1476_v42 = vpack.c.bf16 %v1348_v26, %v1348_v26  ;;  %5293 = vmatprep.subr.bf16.mxu1 %v5682_v0  ;;  %v1979_v46 = vunpack.c.l.b16 %v1460_v34  ;;  %v456_v48 = vadd.f32 %v455_v36, %v454_v21  ;;  %v567_v18 = vrot.slane %v566_v37, 4  ;;  %5365 = vmatprep.subr.bf16.mxu0 %v5703_v22  ;;  %v290_v61 = vld [vmem:[#allocation2 + $0x5f0] sm:$0xff]  ;;  %v5709_v16 = vld [vmem:[#allocation8 + $0x138] sm:$0xff]   ;;  %v5692_v26 = vld [vmem:[#allocation7 + $0x3a8] sm:$0xff]  }
 0x1b6   :  { %v1364_v45 = vmul.f32 0.0625, %v1139_v31  ;;  %v1251_v53 = vadd.f32 %v1250_v25, %v1249_v24  ;;  %v2142_v60 = vsel %vm2032_vm2, %v1963_v39, %v2141_v40  ;;  %v678_v63 = vadd.f32 %v194_v19, %v178_v17  ;;  %v306_v12 = vld [vmem:[#allocation2 + $0x670] sm:$0xff]  ;;  %v5711_v24 = vld [vmem:[#allocation8 + $0x240] sm:$0xff]   ;;  %v5717_v7 = vld [vmem:[#allocation8 + $0x208] sm:$0xff]  }
 0x1b7   :  { %v1995_v58 = vunpack.c.l.b16 %v1476_v42  ;;  %v2143_v0 = vsel %vm2034_vm3, %v1979_v46, %v2142_v60  ;;  %v457_v5 = vrot.slane %v456_v48, 2  ;;  %v568_v6 = vadd.f32 %v567_v18, %v566_v37  ;;  %v322_v13 = vld [vmem:[#allocation2 + $0x6f0] sm:$0xff]  ;;  %v5713_v34 = vld [vmem:[#allocation8 + $0x200] sm:$0xff]   ;;  %v5698_v60 = vld [vmem:[#allocation7 + $0x3f8] sm:$0xff]  }
 0x1b8   :  { %v1492_v4 = vpack.c.bf16 %v1364_v45, %v1364_v45  ;;  %5294 = vmatpush3.bf16.msra.mxu1 %v5684_v23  ;;  %v1380_v10 = vmul.f32 0.0625, %v1251_v53  ;;  %v679_v14 = vrot.slane %v678_v63, 4  ;;  %v790_v15 = vadd.f32 %v226_v35, %v210_v33  ;;  %5366 = vmatpush3.bf16.msra.mxu0 %v5705_v44  ;;  %v5694_v40 = vld [vmem:[#allocation7 + $0x3f0] sm:$0xff]  }
 0x1b9   :  { %v2144_v11 = vsel %vm2036_vm4, %v1995_v58, %v2143_v0  ;;  %5295 = vmatprep.subr.bf16.mxu1 %v5686_v30  ;;  %v458_v19 = vadd.f32 %v457_v5, %v456_v48  ;;  %v569_v21 = vrot.slane %v568_v6, 2  ;;  %v902_v22 = vadd.f32 %v258_v43, %v242_v41  ;;  %5367 = vmatprep.subr.bf16.mxu0 %v5707_v55  ;;  %v338_v41 = vld [vmem:[#allocation2 + $0x770] sm:$0xff] }
 0x1ba   :  { %v2011_v17 = vunpack.c.l.b16 %v1492_v4  ;;  %v1508_v28 = vpack.c.bf16 %v1380_v10, %v1380_v10  ;;  %v680_v27 = vadd.f32 %v679_v14, %v678_v63  ;;  %v791_v23 = vrot.slane %v790_v15, 4  ;;  %v354_v43 = vld [vmem:[#allocation2 + $0x7f0] sm:$0xff] }
 0x1bb   :  { %v1014_v31 = vadd.f32 %v290_v61, %v274_v47  ;;  %v459_v37 = vrot.slane %v458_v19, 1  ;;  %v570_v25 = vadd.f32 %v569_v21, %v568_v6  ;;  %v903_v33 = vrot.slane %v902_v22, 4  ;;  %v5696_v58 = vld [vmem:[#allocation7 + $0x3b0] sm:$0xff]  }
 0x1bc   :  { %v2145_v36 = vsel %vm2038_vm5, %v2011_v17, %v2144_v11  ;;  %5296 = vmatpush3.bf16.msra.mxu1 %v5688_v52  ;;  %v2027_v35 = vunpack.c.l.b16 %v1508_v28  ;;  %v681_v30 = vrot.slane %v680_v27, 2  ;;  %v792_v42 = vadd.f32 %v791_v23, %v790_v15  ;;  %5368 = vmatpush3.bf16.msra.mxu0 %v5709_v16  ;;  %v5715_v52 = vld [vmem:[#allocation8 + $0x248] sm:$0xff]   ;;  %v5719_v10 = vld [vmem:[#allocation8 + $0x250] sm:$0xff]  }
 0x1bd   :  { %v1015_v39 = vrot.slane %v1014_v31, 4  ;;  %5297 = vmatprep.subr.bf16.mxu1 %v5690_v3  ;;  %v460_v44 = vadd.f32 %v459_v37, %v458_v19  ;;  %v571_v45 = vrot.slane %v570_v25, 1  ;;  %v904_v46 = vadd.f32 %v903_v33, %v902_v22  ;;  %5397 = vmatprep.subr.bf16.mxu0 %v5711_v24  ;;  %v5721_v28 = vld [vmem:[#allocation8 + $0x210] sm:$0xff]  }
 0x1be   :  { %v1126_v47 = vadd.f32 %v322_v13, %v306_v12  ;;  %v2146_v48 = vsel %vm2040_vm6, %v2027_v35, %v2145_v36  ;;  %v682_v18 = vadd.f32 %v681_v30, %v680_v27  ;;  %v793_v55 = vrot.slane %v792_v42, 2  ;;  %v5702_v35 = vld [vmem:[#allocation8 + $0xc0] sm:$0xff]  }
 0x1bf   :  { %v1016_v53 = vadd.f32 %v1015_v39, %v1014_v31  ;;  %v6297_v61 = vpack.c.b16 %v2146_v48, %v2146_v48  ;;  %v572_v63 = vadd.f32 %v571_v45, %v570_v25  ;;  %v905_v1 = vrot.slane %v904_v46, 2  ;;  %4412 = vmatmul.mubr.bf16.vlgmr.msra.gmra.mrb[16].mxu0 %v6176_v9  ;;  %v5700_v9 = vld [vmem:[#allocation7 + $0x3b8] sm:$0xff]  }
 0x1c0   :  { %v1127_v3 = vrot.slane %v1126_v47, 4  ;;  %5298 = vmatpush3.bf16.msra.mxu1 %v5692_v26  ;;  %v683_v4 = vrot.slane %v682_v18, 1  ;;  %v794_v0 = vadd.f32 %v793_v55, %v792_v42  ;;  %v1238_v6 = vadd.f32 %v354_v43, %v338_v41  ;;  %5398 = vmatpush3.bf16.msra.mxu0 %v5713_v34  ;;  %v5725_v55 = vld [vmem:[#allocation8 + $0x218] sm:$0xff]  }
 0x1c1   :  { %v1017_v5 = vrot.slane %v1016_v53, 2  ;;  %5299 = vmatprep.subr.bf16.mxu1 %v5694_v40  ;;  %3259 = vmatprep.mubr.bf16.mxu1 %v6297_v61  ;;  %v906_v11 = vadd.f32 %v905_v1, %v904_v46  ;;  %v1267_v13 = vmul.f32 0.0625, %v460_v44  ;;  %v1283_v14 = vmul.f32 0.0625, %v572_v63 }
 0x1c2   :  { %v1128_v12 = vadd.f32 %v1127_v3, %v1126_v47  ;;  %v684_v15 = vadd.f32 %v683_v4, %v682_v18  ;;  %v795_v16 = vrot.slane %v794_v0, 1  ;;  %v1239_v19 = vrot.slane %v1238_v6, 4  ;;  %5399 = vmatprep.subr.bf16.mxu0 %v5715_v52  ;;  %4491 = vmatprep.mubr.bf16.mxu0 %v6206_v54  ;;  %v5723_v54 = vld [vmem:[#allocation8 + $0x258] sm:$0xff]  }
 0x1c3   :  { %v1018_v17 = vadd.f32 %v1017_v5, %v1016_v53  ;;  %v907_v21 = vrot.slane %v906_v11, 1  ;;  %v1395_v24 = vpack.c.bf16 %v1267_v13, %v1267_v13  ;;  %v1411_v26 = vpack.c.bf16 %v1283_v14, %v1283_v14  ;;  %v4867_v13 = vld [vmem:[%s6391_s3] ss:$0 sm:$0xff]  ;;  %s6006_s3 = smov [#allocation11]  }
 0x1c4   :  { %v1129_v22 = vrot.slane %v1128_v12, 2  ;;  %5300 = vmatpush3.bf16.msra.mxu1 %v5696_v58  ;;  %v796_v27 = vadd.f32 %v795_v16, %v794_v0  ;;  %v1240_v31 = vadd.f32 %v1239_v19, %v1238_v6  ;;  %v1299_v34 = vmul.f32 0.0625, %v684_v15  ;;  %5400 = vmatpush3.bf16.msra.mxu0 %v5717_v7  ;;  %v5727_v58 = vld [vmem:[#allocation8 + $0x260] sm:$0xff]   ;;  %v5733_v19 = vld [vmem:[#allocation8 + $0x228] sm:$0xff]   ;;  %s4827_s14 = sshll.u32 %s6006_s3, 4  ;;  %s4828_s14 = int_to_ptr.vmem [resolvable:$true] %s4827_s14 }
 0x1c5   :  { %v1019_v23 = vrot.slane %v1018_v17, 1  ;;  %5301 = vmatprep.subr.bf16.mxu1 %v5698_v60  ;;  %v908_v36 = vadd.f32 %v907_v21, %v906_v11  ;;  %v1914_v25 = vunpack.c.l.b16 %v1395_v24  ;;  %v1930_v33 = vunpack.c.l.b16 %v1411_v26  ;;  %5401 = vmatprep.subr.bf16.mxu0 %v5719_v10  ;;  %v5729_v7 = vld [vmem:[#allocation8 + $0x220] sm:$0xff]   ;;  %v5731_v10 = vld [vmem:[#allocation8 + $0x268] sm:$0xff]   ;;  %v5735_v26 = vld [vmem:[#allocation8 + $0x270] sm:$0xff]   ;;  %s5920_s13 = scalar_lea.vmem %s4828_s14, 128  ;;  %p5925_p13 = scmp.lt.s32.totalorder %s4828_s14, %s4828_s14 }
 0x1c6   :  { %v1130_v37 = vadd.f32 %v1129_v22, %v1128_v12  ;;  %v1241_v42 = vrot.slane %v1240_v31, 2  ;;  %v1315_v39 = vmul.f32 0.0625, %v796_v27  ;;  %v1427_v40 = vpack.c.bf16 %v1299_v34, %v1299_v34  ;;  %v5704_v34 = vld [vmem:[#allocation8 + $0x80] sm:$0xff]   ;;  %p5921_p12 = scmp.ne.s32.totalorder %s4828_s14, %s5920_s13  ;;  %p5926_p0 = scmp.lt.s32.totalorder %s5920_s13, %s5920_s13 }
 0x1c7   :  { %v1020_v30 = vadd.f32 %v1019_v23, %v1018_v17  ;;  %v1331_v43 = vmul.f32 0.0625, %v908_v36  ;;  %v2133_v44 = vsel %vm2028_vm0, %v1930_v33, %v1914_v25  ;;  %v5151_v45 = vadd.f32 %v6284_v38, %v6281_v32  ;;  %v5706_v25 = vld [vmem:[#allocation8 + $0xc8] sm:$0xff]   ;;  %v5737_v33 = vld [vmem:[#allocation8 + $0x230] sm:$0xff]  }
 0x1c8   :  { %v1131_v41 = vrot.slane %v1130_v37, 1  ;;  %5302 = vmatpush3.bf16.msra.mxu1 %v5700_v9  ;;  %v1242_v46 = vadd.f32 %v1241_v42, %v1240_v31  ;;  %v1443_v48 = vpack.c.bf16 %v1315_v39, %v1315_v39  ;;  %v1946_v18 = vunpack.c.l.b16 %v1427_v40  ;;  %5402 = vmatpush3.bf16.msra.mxu0 %v5721_v28  ;;  %v5741_v42 = vld [vmem:[#allocation8 + $0x238] sm:$0xff]   ;;  %v5743_v39 = vld [vmem:[#allocation8 + $0x340] sm:$0xff]   ;;  %v5712_v40 = vld [vmem:[#allocation8 + $0x90] sm:$0xff]   ;;  %p5927_p1 = por %p5926_p0, %p5925_p13 }
 0x1c9   :  { %v1347_v47 = vmul.f32 0.0625, %v1020_v30  ;;  %v1459_v52 = vpack.c.bf16 %v1331_v43, %v1331_v43  ;;  %5331 = vmatprep.subr.bf16.mxu1 %v5702_v35  ;;  %5403 = vmatprep.subr.bf16.mxu0 %v5723_v54  ;;  %v5195_v32 = vadd.f32 %v6290_v57, %v6287_v29  ;;  %v2982_v9 = vadd.f32 %v5151_v45, %v4867_v13  ;;  %v5739_v35 = vld [vmem:[#allocation8 + $0x278] sm:$0xff]   ;;  %v5708_v54 = vld [vmem:[#allocation8 + $0x88] sm:$0xff]   ;;  %v5710_v30 = vld [vmem:[#allocation8 + $0xd0] sm:$0xff]  }
 0x1ca   :  { %v1132_v53 = vadd.f32 %v1131_v41, %v1130_v37  ;;  %v1243_v60 = vrot.slane %v1242_v46, 1  ;;  %v1962_v1 = vunpack.c.l.b16 %v1443_v48  ;;  %v2134_v3 = vsel %vm2030_vm1, %v1946_v18, %v2133_v44  ;;  %v5714_v41 = vld [vmem:[#allocation8 + $0xd8] sm:$0xff]   ;;  %v5745_v43 = vld [vmem:[#allocation8 + $0x300] sm:$0xff]   ;;  %v5747_v44 = vld [vmem:[#allocation8 + $0x348] sm:$0xff]   ;;  %p5928_p2 = pnand %p5927_p1, %p5921_p12 }
 0x1cb   :  { %v1475_v63 = vpack.c.bf16 %v1347_v47, %v1347_v47  ;;  %v1978_v0 = vunpack.c.l.b16 %v1459_v52  ;;  %v5716_v45 = vld [vmem:[#allocation8 + $0x98] sm:$0xff]   ;;  %v5751_v47 = vld [vmem:[#allocation8 + $0x350] sm:$0xff]   ;;  %v5720_v48 = vld [vmem:[#allocation8 + $0xa0] sm:$0xff]  }
 0x1cc   :  { %v1363_v4 = vmul.f32 0.0625, %v1132_v53  ;;  %v1244_v38 = vadd.f32 %v1243_v60, %v1242_v46  ;;  %v2135_v6 = vsel %vm2032_vm2, %v1962_v1, %v2134_v3  ;;  %5404 = vmatpush3.bf16.msra.mxu0 %v5725_v55  ;;  %v5749_v46 = vld [vmem:[#allocation8 + $0x308] sm:$0xff]   ;;  %v5753_v55 = vld [vmem:[#allocation8 + $0x310] sm:$0xff]   ;;  %v5755_v53 = vld [vmem:[#allocation8 + $0x358] sm:$0xff]  }
 0x1cd   :  { %v1994_v5 = vunpack.c.l.b16 %v1475_v63  ;;  %v2136_v12 = vsel %vm2034_vm3, %v1978_v0, %v2135_v6  ;;  %5405 = vmatprep.subr.bf16.mxu0 %v5727_v58  ;;  %v5722_v18 = vld [vmem:[#allocation8 + $0xe8] sm:$0xff]   ;;  %v5757_v58 = vld [vmem:[#allocation8 + $0x318] sm:$0xff]   ;;  %v5759_v60 = vld [vmem:[#allocation8 + $0x360] sm:$0xff]  }
 0x1ce   :  { %v1491_v11 = vpack.c.bf16 %v1363_v4, %v1363_v4  ;;  %v1379_v14 = vmul.f32 0.0625, %v1244_v38  ;;  %v5171_v16 = vpop.f32.mrb[4].mxu1  ;;  %v5724_v52 = vld [vmem:[#allocation8 + $0xa8] sm:$0xff]   ;;  %v5728_v63 = vld [vmem:[#allocation8 + $0xb0] sm:$0xff]   ;;  %v5761_v1 = vld [vmem:[#allocation8 + $0x320] sm:$0xff]  }
 0x1cf   :  { %v2137_v15 = vsel %vm2036_vm4, %v1994_v5, %v2136_v12  ;;  %v5172_v57 = vpop.f32.mrb[5].mxu1  ;;  %v5763_v3 = vld [vmem:[#allocation8 + $0x368] sm:$0xff]   ;;  %v5732_v4 = vld [vmem:[#allocation8 + $0xb8] sm:$0xff]   ;;  %v5734_v0 = vld [vmem:[#allocation8 + $0x1c0] sm:$0xff]  }
 0x1d0   :  { %v2010_v29 = vunpack.c.l.b16 %v1491_v11  ;;  %v1507_v17 = vpack.c.bf16 %v1379_v14, %v1379_v14  ;;  %5406 = vmatpush3.bf16.msra.mxu0 %v5729_v7  ;;  %v5173_v21 = vadd.f32 %v5172_v57, %v5171_v16  ;;  %v5174_v22 = vpop.f32.mrb[6].mxu1  ;;  %v5767_v38 = vld [vmem:[#allocation8 + $0x370] sm:$0xff]   ;;  %v5736_v5 = vld [vmem:[#allocation8 + $0x180] sm:$0xff]   ;;  %v5738_v6 = vld [vmem:[#allocation8 + $0x1c8] sm:$0xff]  }
 0x1d1   :  { %5407 = vmatprep.subr.bf16.mxu0 %v5731_v10  ;;  %v5175_v28 = vpop.f32.mrb[7].mxu1  ;;  %v5769_v7 = vld [vmem:[#allocation8 + $0x330] sm:$0xff]   ;;  %v5771_v10 = vld [vmem:[#allocation8 + $0x378] sm:$0xff]   ;;  %v5740_v11 = vld [vmem:[#allocation8 + $0x188] sm:$0xff]  }
 0x1d2   :  { %v2138_v24 = vsel %vm2038_vm5, %v2010_v29, %v2137_v15  ;;  %v2026_v27 = vunpack.c.l.b16 %v1507_v17  ;;  %v3022_v23 = vadd.f32 %v5173_v21, %v2982_v9  ;;  %v5742_v12 = vld [vmem:[#allocation8 + $0x1d0] sm:$0xff]   ;;  %v5773_v13 = vld [vmem:[#allocation8 + $0x338] sm:$0xff]   ;;  %v5775_v14 = vld [vmem:[#allocation10] sm:$0xff]  }
 0x1d3   :  { %v4620_v16 = vld [vmem:[#allocation5] sm:$0xff]  ;;  %v4621_v29 = vld [vmem:[#allocation5 + $0x8] sm:$0xff]  ;;  %v5744_v17 = vld [vmem:[#allocation8 + $0x190] sm:$0xff]  }
 0x1d4   :  { %v2139_v31 = vsel %vm2040_vm6, %v2026_v27, %v2138_v24  ;;  %5408 = vmatpush3.bf16.msra.mxu0 %v5733_v19  ;;  %v6316_v36 = vadd.f32 %v5195_v32, %v3022_v23  ;;  %v5765_v32 = vld [vmem:[#allocation8 + $0x328] sm:$0xff]   ;;  %v4636_v22 = vpack.c.bf16 %v4621_v29, %v4620_v16  ;;  %v5748_v24 = vld [vmem:[#allocation8 + $0x198] sm:$0xff]   ;;  %v5781_v28 = vld [vmem:[#allocation10 + $0x10] sm:$0xff]  }
 0x1d5   :  { %v6318_v37 = vpack.c.b16 %v2139_v31, %v2139_v31  ;;  %5409 = vmatprep.subr.bf16.mxu0 %v5735_v26  ;;  %v5750_v26 = vld [vmem:[#allocation8 + $0x1e0] sm:$0xff]   ;;  %v5754_v23 = vld [vmem:[#allocation8 + $0x1e8] sm:$0xff]   ;;  %v5784_v31 = vld [vmem:[#allocation10 + $0x18] sm:$0xff]  }
 0x1d6   :  { %v5752_v27 = vld [vmem:[#allocation8 + $0x1a0] sm:$0xff]   ;;  %v5788_v16 = vld [vmem:[#allocation8 + $0x2b0] sm:$0xff]  }
 0x1d7   :  { %3260 = vmatmul.mubr.bf16.vlgmr.msra.gmra.mrb[16].mxu1 %v6318_v37 }
 0x1d8   :  { %5332 = vmatpush3.bf16.msra.mxu1 %v5704_v34  ;;  %4371 = vmatprep.mubr.bf16.mxu1 %v6186_v2  ;;  %v5718_v2 = vld [vmem:[#allocation8 + $0xe0] sm:$0xff]   ;;  %v5756_v34 = vld [vmem:[#allocation8 + $0x1a8] sm:$0xff]  }
 0x1d9   :  { %5333 = vmatprep.subr.bf16.mxu1 %v5706_v25  ;;  %5410 = vmatpush3.bf16.msra.mxu0 %v5737_v33  ;;  %v5758_v25 = vld [vmem:[#allocation8 + $0x1f0] sm:$0xff]  }
 0x1da   :  { %5411 = vmatprep.subr.bf16.mxu0 %v5739_v35  ;;  %v5760_v33 = vld [vmem:[#allocation8 + $0x1b0] sm:$0xff]   ;;  %v5762_v35 = vld [vmem:[#allocation8 + $0x1f8] sm:$0xff]  }
 0x1dc   :  { %5334 = vmatpush3.bf16.msra.mxu1 %v5708_v54  ;;  %v5790_v54 = vld [vmem:[#allocation10 + $0x28] sm:$0xff]  }
 0x1dd   :  { %5335 = vmatprep.subr.bf16.mxu1 %v5710_v30  ;;  %5412 = vmatpush3.bf16.msra.mxu0 %v5741_v42  ;;  %v5764_v30 = vld [vmem:[#allocation8 + $0x1b8] sm:$0xff]   ;;  %v5766_v42 = vld [vmem:[#allocation8 + $0x2c0] sm:$0xff]  }
 0x1de   :  { %5441 = vmatprep.subr.bf16.mxu0 %v5743_v39  ;;  %v5793_v39 = vld [vmem:[#allocation10 + $0x30] sm:$0xff]  }
 0x1e0   :  { %5336 = vmatpush3.bf16.msra.mxu1 %v5712_v40  ;;  %4492 = vmatmul.mubr.bf16.vlgmr.msra.gmra.mrb[20].mxu0 %v6216_v49  ;;  %v5726_v49 = vld [vmem:[#allocation8 + $0xf0] sm:$0xff]   ;;  %v5768_v40 = vld [vmem:[#allocation8 + $0x280] sm:$0xff]  }
 0x1e1   :  { %5337 = vmatprep.subr.bf16.mxu1 %v5714_v41  ;;  %5442 = vmatpush3.bf16.msra.mxu0 %v5745_v43  ;;  %v5770_v41 = vld [vmem:[#allocation8 + $0x2c8] sm:$0xff]   ;;  %v5796_v43 = vld [vmem:[#allocation10 + $0x38] sm:$0xff]  }
 0x1e2   :  { %5443 = vmatprep.subr.bf16.mxu0 %v5747_v44  ;;  %4571 = vmatprep.mubr.bf16.mxu0 %v6246_v59  ;;  %v5730_v59 = vld [vmem:[#allocation8 + $0xf8] sm:$0xff]   ;;  %v5772_v44 = vld [vmem:[#allocation8 + $0x288] sm:$0xff]  }
 0x1e4   :  { %5338 = vmatpush3.bf16.msra.mxu1 %v5716_v45  ;;  %v5774_v45 = vld [vmem:[#allocation8 + $0x2d0] sm:$0xff]  }
 0x1e5   :  { %5339 = vmatprep.subr.bf16.mxu1 %v5718_v2  ;;  %5444 = vmatpush3.bf16.msra.mxu0 %v5749_v46  ;;  %v4622_v2 = vld [vmem:[#allocation5 + $0x10] sm:$0xff]  ;;  %v4623_v46 = vld [vmem:[#allocation5 + $0x18] sm:$0xff] }
 0x1e6   :  { %5445 = vmatprep.subr.bf16.mxu0 %v5751_v47  ;;  %v4624_v47 = vld [vmem:[#allocation5 + $0x20] sm:$0xff] }
 0x1e8   :  { %5340 = vmatpush3.bf16.msra.mxu1 %v5720_v48  ;;  %v4625_v48 = vld [vmem:[#allocation5 + $0x28] sm:$0xff] }
 0x1e9   :  { %5341 = vmatprep.subr.bf16.mxu1 %v5722_v18  ;;  %5446 = vmatpush3.bf16.msra.mxu0 %v5753_v55  ;;  %v5776_v18 = vld [vmem:[#allocation8 + $0x290] sm:$0xff]   ;;  %v4637_v55 = vpack.c.bf16 %v4623_v46, %v4622_v2 }
 0x1ea   :  { %5447 = vmatprep.subr.bf16.mxu0 %v5755_v53  ;;  %v5777_v53 = vld [vmem:[#allocation8 + $0x2d8] sm:$0xff]  }
 0x1ec   :  { %5342 = vmatpush3.bf16.msra.mxu1 %v5724_v52  ;;  %v4638_v52 = vpack.c.bf16 %v4625_v48, %v4624_v47 }
 0x1ed   :  { %5343 = vmatprep.subr.bf16.mxu1 %v5726_v49  ;;  %5448 = vmatpush3.bf16.msra.mxu0 %v5757_v58  ;;  %v4626_v49 = vld [vmem:[#allocation5 + $0x30] sm:$0xff]  ;;  %v4627_v58 = vld [vmem:[#allocation5 + $0x38] sm:$0xff] }
 0x1ee   :  { %5449 = vmatprep.subr.bf16.mxu0 %v5759_v60  ;;  %v4628_v60 = vld [vmem:[#allocation5 + $0x40] sm:$0xff] }
 0x1f0   :  { %5344 = vmatpush3.bf16.msra.mxu1 %v5728_v63  ;;  %v4629_v63 = vld [vmem:[#allocation5 + $0x48] sm:$0xff] }
 0x1f1   :  { %5345 = vmatprep.subr.bf16.mxu1 %v5730_v59  ;;  %5450 = vmatpush3.bf16.msra.mxu0 %v5761_v1  ;;  %v5782_v59 = vld [vmem:[#allocation8 + $0x2a0] sm:$0xff]   ;;  %v4639_v1 = vpack.c.bf16 %v4627_v58, %v4626_v49 }
 0x1f2   :  { %5451 = vmatprep.subr.bf16.mxu0 %v5763_v3  ;;  %v5783_v3 = vld [vmem:[#allocation8 + $0x2e8] sm:$0xff]  }
 0x1f4   :  { %5346 = vmatpush3.bf16.msra.mxu1 %v5732_v4  ;;  %v4640_v4 = vpack.c.bf16 %v4629_v63, %v4628_v60 }
 0x1f5   :  { %5375 = vmatprep.subr.bf16.mxu1 %v5734_v0  ;;  %5452 = vmatpush3.bf16.msra.mxu0 %v5765_v32 }
 0x1f6   :  { %5453 = vmatprep.subr.bf16.mxu0 %v5767_v38  ;;  %v5785_v38 = vld [vmem:[#allocation8 + $0x2a8] sm:$0xff]  }
 0x1f7   :  { %4372 = vmatmul.mubr.bf16.vlgmr.msra.gmra.mrb[20].mxu1 %v6196_v56  ;;  %v5746_v56 = vld [vmem:[#allocation8 + $0x1d8] sm:$0xff]  }
 0x1f8   :  { %5376 = vmatpush3.bf16.msra.mxu1 %v5736_v5  ;;  %4451 = vmatprep.mubr.bf16.mxu1 %v6226_v51  ;;  %v5778_v51 = vld [vmem:[#allocation10 + $0x8] sm:$0xff]  }
 0x1f9   :  { %5377 = vmatprep.subr.bf16.mxu1 %v5738_v6  ;;  %5454 = vmatpush3.bf16.msra.mxu0 %v5769_v7  ;;  %v5786_v7 = vld [vmem:[#allocation8 + $0x2f0] sm:$0xff]  }
 0x1fa   :  { %5455 = vmatprep.subr.bf16.mxu0 %v5771_v10  ;;  %v5237_v15 = vpop.f32.mrb[4].mxu0  ;;  %v4630_v10 = vld [vmem:[#allocation5 + $0x50] sm:$0xff] }
 0x1fb   :  { %v5238_v57 = vpop.f32.mrb[5].mxu0 }
 0x1fc   :  { %5378 = vmatpush3.bf16.msra.mxu1 %v5740_v11  ;;  %v6326_v19 = vadd.f32 %v5238_v57, %v5237_v15  ;;  %v5240_v9 = vpop.f32.mrb[6].mxu0  ;;  %v4631_v11 = vld [vmem:[#allocation5 + $0x58] sm:$0xff] }
 0x1fd   :  { %5379 = vmatprep.subr.bf16.mxu1 %v5742_v12  ;;  %5456 = vmatpush3.bf16.msra.mxu0 %v5773_v13  ;;  %v5241_v21 = vpop.f32.mrb[7].mxu0  ;;  %v4632_v13 = vld [vmem:[#allocation5 + $0x60] sm:$0xff]  ;;  %v4641_v29 = vpack.c.bf16 %v4631_v11, %v4630_v10 }
 0x1fe   :  { %5501 = vmatprep.subr.bf16.mxu0 %v5775_v14  ;;  %v5792_v21 = vld [vmem:[#allocation8 + $0x3c0] sm:$0xff]  }
 0x200   :  { %5380 = vmatpush3.bf16.msra.mxu1 %v5744_v17  ;;  %4572 = vmatmul.mubr.bf16.vlgmr.msra.gmra.mrb[24].mxu0 %v6256_v62  ;;  %v5787_v62 = vld [vmem:[#allocation10 + $0x20] sm:$0xff]   ;;  %v5789_v17 = vld [vmem:[#allocation8 + $0x2f8] sm:$0xff]  }
 0x201   :  { %5381 = vmatprep.subr.bf16.mxu1 %v5746_v56  ;;  %5502 = vmatpush3.bf16.msra.mxu0 %v5775_v14  ;;  %v4633_v14 = vld [vmem:[#allocation5 + $0x68] sm:$0xff]  ;;  %v5791_v56 = vld [vmem:[#allocation8 + $0x2b8] sm:$0xff]  }
 0x202   :  { %5503 = vmatprep.subr.bf16.mxu0 %v5778_v51  ;;  %5517 = vmatprep.mubr.bf16.mxu0 %v4636_v22  ;;  %v4642_v9 = vpack.c.bf16 %v4633_v14, %v4632_v13  ;;  %v4635_v22 = vld [vmem:[#allocation5 + $0x78] sm:$0xff] }
 0x204   :  { %5382 = vmatpush3.bf16.msra.mxu1 %v5748_v24  ;;  %v5794_v24 = vld [vmem:[#allocation8 + $0x380] sm:$0xff]  }
 0x205   :  { %5383 = vmatprep.subr.bf16.mxu1 %v5750_v26  ;;  %5504 = vmatpush3.bf16.msra.mxu0 %v5778_v51  ;;  %v4634_v51 = vld [vmem:[#allocation5 + $0x70] sm:$0xff] }
 0x206   :  { %5505 = vmatprep.subr.bf16.mxu0 %v5781_v28  ;;  %v4643_v26 = vpack.c.bf16 %v4635_v22, %v4634_v51 }
 0x208   :  { %5384 = vmatpush3.bf16.msra.mxu1 %v5752_v27  ;;  %v5799_v27 = vld [vmem:[#allocation8 + $0x390] sm:$0xff]  }
 0x209   :  { %5385 = vmatprep.subr.bf16.mxu1 %v5754_v23  ;;  %5506 = vmatpush3.bf16.msra.mxu0 %v5781_v28  ;;  %v5798_v28 = vld [vmem:[#allocation8 + $0x3d0] sm:$0xff]   ;;  %v5800_v23 = vld [vmem:[#allocation8 + $0x3d8] sm:$0xff]  }
 0x20a   :  { %5507 = vmatprep.subr.bf16.mxu0 %v5784_v31 }
 0x20c   :  { %5386 = vmatpush3.bf16.msra.mxu1 %v5756_v34  ;;  %v5802_v34 = vld [vmem:[#allocation8 + $0x3e0] sm:$0xff]  }
 0x20d   :  { %5387 = vmatprep.subr.bf16.mxu1 %v5758_v25  ;;  %5508 = vmatpush3.bf16.msra.mxu0 %v5784_v31  ;;  %v5801_v31 = vld [vmem:[#allocation8 + $0x398] sm:$0xff]   ;;  %v5803_v25 = vld [vmem:[#allocation8 + $0x3a0] sm:$0xff]  }
 0x20e   :  { %5509 = vmatprep.subr.bf16.mxu0 %v5787_v62 }
 0x210   :  { %5388 = vmatpush3.bf16.msra.mxu1 %v5760_v33  ;;  %v5806_v33 = vld [vmem:[#allocation8 + $0x3f0] sm:$0xff]  }
 0x211   :  { %5389 = vmatprep.subr.bf16.mxu1 %v5762_v35  ;;  %5510 = vmatpush3.bf16.msra.mxu0 %v5787_v62  ;;  %v5804_v62 = vld [vmem:[#allocation8 + $0x3e8] sm:$0xff]   ;;  %v5808_v35 = vld [vmem:[#allocation8 + $0x3f8] sm:$0xff]  }
 0x212   :  { %5511 = vmatprep.subr.bf16.mxu0 %v5790_v54 }
 0x214   :  { %5390 = vmatpush3.bf16.msra.mxu1 %v5764_v30 }
 0x215   :  { %5419 = vmatprep.subr.bf16.mxu1 %v5766_v42  ;;  %5512 = vmatpush3.bf16.msra.mxu0 %v5790_v54  ;;  %v5809_v54 = vld [vmem:[#allocation8 + $0x3b8] sm:$0xff]  }
 0x216   :  { %5513 = vmatprep.subr.bf16.mxu0 %v5793_v39 }
 0x217   :  { %4452 = vmatmul.mubr.bf16.vlgmr.msra.gmra.mrb[24].mxu1 %v6236_v50  ;;  %v5779_v50 = vld [vmem:[#allocation8 + $0x298] sm:$0xff]  }
 0x218   :  { %5420 = vmatpush3.bf16.msra.mxu1 %v5768_v40  ;;  %4531 = vmatprep.mubr.bf16.mxu1 %v6267_v8  ;;  %v5780_v8 = vld [vmem:[#allocation8 + $0x2e0] sm:$0xff]  }
 0x219   :  { %5421 = vmatprep.subr.bf16.mxu1 %v5770_v41  ;;  %5514 = vmatpush3.bf16.msra.mxu0 %v5793_v39 }
 0x21a   :  { %5515 = vmatprep.subr.bf16.mxu0 %v5796_v43 }
 0x21c   :  { %5422 = vmatpush3.bf16.msra.mxu1 %v5772_v44 }
 0x21d   :  { %5423 = vmatprep.subr.bf16.mxu1 %v5774_v45  ;;  %5516 = vmatpush3.bf16.msra.mxu0 %v5796_v43 }
 0x220   :  { %5424 = vmatpush3.bf16.msra.mxu1 %v5776_v18  ;;  %5518 = vmatmul.mubr.bf16.vlgmr.msra.gmra.mrb[28].mxu0 %v4637_v55 }
 0x221   :  { %5425 = vmatprep.subr.bf16.mxu1 %v5777_v53  ;;  %5521 = vmatprep.mubr.bf16.mxu0 %v4638_v52 }
 0x224   :  { %5426 = vmatpush3.bf16.msra.mxu1 %v5779_v50 }
 0x225   :  { %5427 = vmatprep.subr.bf16.mxu1 %v5780_v8 }
 0x226   :  { %v5215_v0 = vpop.f32.mrb[8].mxu1 }
 0x227   :  { %v5216_v32 = vpop.f32.mrb[9].mxu1 }
 0x228   :  { %5428 = vmatpush3.bf16.msra.mxu1 %v5782_v59  ;;  %5522 = vmatmul.mubr.bf16.gmra.mrb[32].mxu0 %v4639_v1  ;;  %v5217_v5 = vadd.f32 %v5216_v32, %v5215_v0  ;;  %v5218_v6 = vpop.f32.mrb[10].mxu1 }
 0x229   :  { %5429 = vmatprep.subr.bf16.mxu1 %v5783_v3  ;;  %5525 = vmatprep.mubr.bf16.mxu0 %v4640_v4  ;;  %v5219_v12 = vpop.f32.mrb[11].mxu1 }
 0x22a   :  { %v3102_v15 = vadd.f32 %v5217_v5, %v6316_v36  ;;  %v5795_v36 = vld [vmem:[#allocation8 + $0x3c8] sm:$0xff]  }
 0x22c   :  { %5430 = vmatpush3.bf16.msra.mxu1 %v5785_v38  ;;  %v6333_v57 = vadd.f32 %v6326_v19, %v3102_v15  ;;  %v5797_v19 = vld [vmem:[#allocation8 + $0x388] sm:$0xff]  }
 0x22d   :  { %5431 = vmatprep.subr.bf16.mxu1 %v5786_v7 }
 0x230   :  { %5432 = vmatpush3.bf16.msra.mxu1 %v5788_v16  ;;  %5526 = vmatmul.mubr.bf16.gmra.mrb[36].mxu0 %v4641_v29 }
 0x231   :  { %5433 = vmatprep.subr.bf16.mxu1 %v5789_v17  ;;  %5529 = vmatprep.mubr.bf16.mxu0 %v4642_v9 }
 0x234   :  { %5434 = vmatpush3.bf16.msra.mxu1 %v5791_v56 }
 0x235   :  { %5463 = vmatprep.subr.bf16.mxu1 %v5792_v21 }
 0x237   :  { %4532 = vmatmul.mubr.bf16.vlgmr.msra.gmra.mrb[28].mxu1 %v6279_v20  ;;  %v5805_v20 = vld [vmem:[#allocation8 + $0x3a8] sm:$0xff]  }
 0x238   :  { %5464 = vmatpush3.bf16.msra.mxu1 %v5794_v24  ;;  %4611 = vmatprep.mubr.bf16.mxu1 %v6297_v61  ;;  %v5807_v61 = vld [vmem:[#allocation8 + $0x3b0] sm:$0xff]  }
 0x239   :  { %5465 = vmatprep.subr.bf16.mxu1 %v5795_v36  ;;  %5530 = vmatmul.mubr.bf16.gmra.mrb[40].mxu0 %v4643_v26 }
 0x23c   :  { %5466 = vmatpush3.bf16.msra.mxu1 %v5797_v19 }
 0x23d   :  { %5467 = vmatprep.subr.bf16.mxu1 %v5798_v28 }
 0x240   :  { %5468 = vmatpush3.bf16.msra.mxu1 %v5799_v27 }
 0x241   :  { %5469 = vmatprep.subr.bf16.mxu1 %v5800_v23 }
 0x244   :  { %5470 = vmatpush3.bf16.msra.mxu1 %v5801_v31 }
 0x245   :  { %5471 = vmatprep.subr.bf16.mxu1 %v5802_v34 }
 0x248   :  { %5472 = vmatpush3.bf16.msra.mxu1 %v5803_v25 }
 0x249   :  { %5473 = vmatprep.subr.bf16.mxu1 %v5804_v62 }
 0x24c   :  { %5474 = vmatpush3.bf16.msra.mxu1 %v5805_v20 }
 0x24d   :  { %5475 = vmatprep.subr.bf16.mxu1 %v5806_v33 }
 0x250   :  { %5476 = vmatpush3.bf16.msra.mxu1 %v5807_v61 }
 0x251   :  { %5477 = vmatprep.subr.bf16.mxu1 %v5808_v35 }
 0x252   :  { %v5281_v30 = vpop.f32.mrb[8].mxu0 }
 0x253   :  { %v5282_v42 = vpop.f32.mrb[9].mxu0 }
 0x254   :  { %5478 = vmatpush3.bf16.msra.mxu1 %v5809_v54  ;;  %v5283_v39 = vadd.f32 %v5282_v42, %v5281_v30  ;;  %v5284_v40 = vpop.f32.mrb[10].mxu0 }
 0x255   :  { %v5285_v41 = vpop.f32.mrb[11].mxu0 }
 0x257   :  { %4612 = vmatmul.mubr.bf16.vlgmr.msra.gmra.mrb[32].mxu1 %v6318_v37 }
 0x272   :  { %v5325_v43 = vpop.f32.mrb[12].mxu0 }
 0x273   :  { %v5326_v44 = vpop.f32.mrb[13].mxu0 }
 0x274   :  { %v5327_v45 = vadd.f32 %v5326_v44, %v5325_v43  ;;  %v5328_v2 = vpop.f32.mrb[14].mxu0 }
 0x275   :  { %v5329_v46 = vpop.f32.mrb[15].mxu0 }
 0x27e   :  { %v5259_v47 = vpop.f32.mrb[12].mxu1 }
 0x27f   :  { %v5260_v48 = vpop.f32.mrb[13].mxu1 }
 0x280   :  { %v5261_v18 = vadd.f32 %v5260_v48, %v5259_v47  ;;  %v5262_v55 = vpop.f32.mrb[14].mxu1 }
 0x281   :  { %v5263_v53 = vpop.f32.mrb[15].mxu1 }
 0x282   :  { %v3182_v52 = vadd.f32 %v5261_v18, %v6333_v57 }
 0x284   :  { %v3222_v50 = vadd.f32 %v5283_v39, %v3182_v52 }
 0x292   :  { %v5369_v8 = vpop.f32.mrb[16].mxu0 }
 0x293   :  { %v5370_v49 = vpop.f32.mrb[17].mxu0 }
 0x294   :  { %v5371_v58 = vadd.f32 %v5370_v49, %v5369_v8  ;;  %v5372_v60 = vpop.f32.mrb[18].mxu0 }
 0x295   :  { %v5373_v63 = vpop.f32.mrb[19].mxu0 }
 0x2aa   :  { %v5303_v59 = vpop.f32.mrb[16].mxu1 }
 0x2ab   :  { %v5304_v37 = vpop.f32.mrb[17].mxu1 }
 0x2ac   :  { %v5305_v1 = vadd.f32 %v5304_v37, %v5303_v59  ;;  %v5306_v3 = vpop.f32.mrb[18].mxu1 }
 0x2ad   :  { %v5307_v4 = vpop.f32.mrb[19].mxu1 }
 0x2ae   :  { %v3262_v0 = vadd.f32 %v5305_v1, %v3222_v50 }
 0x2b0   :  { %3267 = vst [vmem:[#allocation11] sm:$0xff] %v3262_v0 }
 0x2b1   :  { %5931 = shalt.err (!%p5928_p2)
}
 0x2b2   :  { %s5932_s16 = scalar_lea.hbm %s6395_s7, 128 }
 0x2b3   :  { %p5933_p3 = scmp.ne.s32.totalorder %s6395_s7, %s5932_s16  ;;  %p5936_p4 = scmp.lt.u32.totalorder %s5932_s16, %s6395_s7 }
 0x2b5   :  { %p5938_p5 = pnand %p5936_p4, %p5933_p3 }
 0x2b7   :  { %5941 = shalt.err (!%p5938_p5)
}
 0x2b8   :  { %4830 = dma.vmem_to_hbm [thread:$0]  %s4828_s14, 128, %s6395_s7, [#allocation4]   ;;  %v5413_v32 = vpop.f32.mrb[20].mxu0  ;;  %v4996_v10 = vld [vmem:[%s6393_s5] ss:$0 sm:$0xff] }
 0x2b9   :  { %v5414_v38 = vpop.f32.mrb[21].mxu0  ;;  %v4334_v13 = vadd.f32 %v5327_v45, %v4996_v10  ;;  %s6007_s5 = smov [#allocation12]   ;;  %s6008_s27 = smov [#allocation14]  }
 0x2ba   :  { %v5415_v5 = vadd.f32 %v5414_v38, %v5413_v32  ;;  %v5416_v6 = vpop.f32.mrb[22].mxu0  ;;  %s4837_s7 = sshll.u32 %s6007_s5, 4  ;;  %s4846_s28 = sshll.u32 %s6008_s27, 4  ;;  %s4838_s7 = int_to_ptr.vmem [resolvable:$true] %s4837_s7  ;;  %s6354_s28 = int_to_ptr.vmem [resolvable:$true] %s4846_s28 }
 0x2bb   :  { %v5417_v7 = vpop.f32.mrb[23].mxu0  ;;  %s5942_s4 = scalar_lea.vmem %s4838_s7, 128  ;;  %p5947_p7 = scmp.lt.s32.totalorder %s4838_s7, %s4838_s7 }
 0x2bc   :  { %p5943_p6 = scmp.ne.s32.totalorder %s4838_s7, %s5942_s4  ;;  %p5948_p8 = scmp.lt.s32.totalorder %s5942_s4, %s5942_s4 }
 0x2be   :  { %p5949_p9 = por %p5948_p8, %p5947_p7 }
 0x2c0   :  { %p5950_p10 = pnand %p5949_p9, %p5943_p6 }
 0x2ca   :  { %v5347_v11 = vpop.f32.mrb[20].mxu1 }
 0x2cb   :  { %v5348_v12 = vpop.f32.mrb[21].mxu1 }
 0x2cc   :  { %v5349_v14 = vadd.f32 %v5348_v12, %v5347_v11  ;;  %v5350_v15 = vpop.f32.mrb[22].mxu1 }
 0x2cd   :  { %v5351_v16 = vpop.f32.mrb[23].mxu1 }
 0x2ce   :  { %v4374_v29 = vadd.f32 %v5349_v14, %v4334_v13 }
 0x2d0   :  { %v4414_v57 = vadd.f32 %v5371_v58, %v4374_v29 }
 0x2d3   :  { %v5457_v17 = vpop.f32.mrb[24].mxu0 }
 0x2d4   :  { %v5458_v9 = vpop.f32.mrb[25].mxu0 }
 0x2d5   :  { %v5459_v56 = vadd.f32 %v5458_v9, %v5457_v17  ;;  %v5460_v21 = vpop.f32.mrb[26].mxu0 }
 0x2d6   :  { %v5461_v51 = vpop.f32.mrb[27].mxu0 }
 0x2ea   :  { %v5391_v22 = vpop.f32.mrb[24].mxu1 }
 0x2eb   :  { %v5392_v24 = vpop.f32.mrb[25].mxu1 }
 0x2ec   :  { %v5393_v36 = vadd.f32 %v5392_v24, %v5391_v22  ;;  %v5394_v26 = vpop.f32.mrb[26].mxu1 }
 0x2ed   :  { %v5395_v19 = vpop.f32.mrb[27].mxu1 }
 0x2ee   :  { %v4454_v28 = vadd.f32 %v5393_v36, %v4414_v57 }
 0x2f0   :  { %v4494_v27 = vadd.f32 %v5415_v5, %v4454_v28 }
 0x2f3   :  { %v5519_v23 = vpop.f32.mrb[28].mxu0 }
 0x2f4   :  { %4807 = vst [vmem:[#allocation14 + $0x10] sm:$0xff] %v5519_v23  ;;  %v4742_v31 = vpop.f32.mrb[29].mxu0 }
 0x2f5   :  { %4805 = vst [vmem:[#allocation14] sm:$0xff] %v4742_v31  ;;  %v5520_v34 = vpop.f32.mrb[30].mxu0 }
 0x2f6   :  { %4808 = vst [vmem:[#allocation14 + $0x18] sm:$0xff] %v5520_v34  ;;  %v4745_v25 = vpop.f32.mrb[31].mxu0 }
 0x2f7   :  { %4806 = vst [vmem:[#allocation14 + $0x8] sm:$0xff] %v4745_v25 }
 0x2fb   :  { %v5523_v62 = vpop.f32.mrb[32].mxu0 }
 0x2fc   :  { %4811 = vst [vmem:[#allocation14 + $0x30] sm:$0xff] %v5523_v62  ;;  %v4758_v20 = vpop.f32.mrb[33].mxu0 }
 0x2fd   :  { %4809 = vst [vmem:[#allocation14 + $0x20] sm:$0xff] %v4758_v20  ;;  %v5524_v33 = vpop.f32.mrb[34].mxu0 }
 0x2fe   :  { %4812 = vst [vmem:[#allocation14 + $0x38] sm:$0xff] %v5524_v33  ;;  %v4761_v61 = vpop.f32.mrb[35].mxu0 }
 0x2ff   :  { %4810 = vst [vmem:[#allocation14 + $0x28] sm:$0xff] %v4761_v61 }
 0x303   :  { %v5527_v35 = vpop.f32.mrb[36].mxu0 }
 0x304   :  { %4815 = vst [vmem:[#allocation14 + $0x50] sm:$0xff] %v5527_v35  ;;  %v4774_v54 = vpop.f32.mrb[37].mxu0 }
 0x305   :  { %4813 = vst [vmem:[#allocation14 + $0x40] sm:$0xff] %v4774_v54  ;;  %v5528_v30 = vpop.f32.mrb[38].mxu0 }
 0x306   :  { %4816 = vst [vmem:[#allocation14 + $0x58] sm:$0xff] %v5528_v30  ;;  %v4777_v42 = vpop.f32.mrb[39].mxu0 }
 0x307   :  { %4814 = vst [vmem:[#allocation14 + $0x48] sm:$0xff] %v4777_v42 }
 0x30a   :  { %v5435_v39 = vpop.f32.mrb[28].mxu1 }
 0x30b   :  { %v5436_v40 = vpop.f32.mrb[29].mxu1 }
 0x30c   :  { %v5437_v41 = vadd.f32 %v5436_v40, %v5435_v39  ;;  %v5438_v43 = vpop.f32.mrb[30].mxu1  ;;  %v5531_v44 = vpop.f32.mrb[40].mxu0 }
 0x30d   :  { %v5439_v45 = vpop.f32.mrb[31].mxu1  ;;  %4819 = vst [vmem:[#allocation14 + $0x70] sm:$0xff] %v5531_v44  ;;  %v4790_v2 = vpop.f32.mrb[41].mxu0 }
 0x30e   :  { %v4534_v46 = vadd.f32 %v5437_v41, %v4494_v27  ;;  %4817 = vst [vmem:[#allocation14 + $0x60] sm:$0xff] %v4790_v2  ;;  %v5532_v47 = vpop.f32.mrb[42].mxu0 }
 0x30f   :  { %4820 = vst [vmem:[#allocation14 + $0x78] sm:$0xff] %v5532_v47  ;;  %v4793_v48 = vpop.f32.mrb[43].mxu0 }
 0x310   :  { %v4574_v18 = vadd.f32 %v5459_v56, %v4534_v46  ;;  %4818 = vst [vmem:[#allocation14 + $0x68] sm:$0xff] %v4793_v48 }
 0x32a   :  { %v5479_v55 = vpop.f32.mrb[32].mxu1 }
 0x32b   :  { %v5480_v53 = vpop.f32.mrb[33].mxu1 }
 0x32c   :  { %v5481_v52 = vadd.f32 %v5480_v53, %v5479_v55  ;;  %v5482_v50 = vpop.f32.mrb[34].mxu1 }
 0x32d   :  { %v5483_v8 = vpop.f32.mrb[35].mxu1 }
 0x32e   :  { %v4614_v49 = vadd.f32 %v5481_v52, %v4574_v18 }
 0x330   :  { %4619 = vst [vmem:[#allocation12] sm:$0xff] %v4614_v49 }
 0x331   :  { %5953 = shalt.err (!%p5950_p10)
}
 0x332   :  { %s5954_s30 = scalar_lea.hbm %s6396_s8, 128 }
 0x333   :  { %p5955_p11 = scmp.ne.s32.totalorder %s6396_s8, %s5954_s30  ;;  %p5958_p12 = scmp.lt.u32.totalorder %s5954_s30, %s6396_s8 }
 0x335   :  { %p5960_p13 = pnand %p5958_p12, %p5955_p11 }
 0x337   :  { %5963 = shalt.err (!%p5960_p13)
}
 0x338   :  { %4840 = dma.vmem_to_hbm [thread:$0]  %s4838_s7, 128, %s6396_s8, [#allocation13]  }
 0x339   :  { %s5964_s14 = scalar_lea.vmem %s6354_s28, 2048  ;;  %p5969_p1 = scmp.lt.s32.totalorder %s6354_s28, %s6354_s28 }
 0x33a   :  { %p5965_p0 = scmp.ne.s32.totalorder %s6354_s28, %s5964_s14  ;;  %p5970_p2 = scmp.lt.s32.totalorder %s5964_s14, %s5964_s14 }
 0x33c   :  { %p5971_p3 = por %p5970_p2, %p5969_p1 }
 0x33e   :  { %p5972_p4 = pnand %p5971_p3, %p5965_p0 }
 0x340   :  { %5975 = shalt.err (!%p5972_p4)
}
 0x341   :  { %s5976_s15 = scalar_lea.hbm %s6397_s9, 2048 }
 0x342   :  { %p5977_p5 = scmp.ne.s32.totalorder %s6397_s9, %s5976_s15  ;;  %p5980_p6 = scmp.lt.u32.totalorder %s5976_s15, %s6397_s9 }
 0x344   :  { %p5982_p7 = pnand %p5980_p6, %p5977_p5 }
 0x346   :  { %5985 = shalt.err (!%p5982_p7)
}
 0x347   :  { %4852 = dma.vmem_to_hbm [thread:$0]  %s6354_s28, 2048, %s6397_s9, [#allocation13], %s5997_s19, %s5997_s19, %s5998_s20  }
 0x348   :  { %5992 = dma.done.wait [#allocation4], 128  }
 0x349   :  { %5993 = vsyncadd [#allocation4], 4294967168 }
 0x34a   :  { %5994 = dma.done.wait [#allocation13], 2176  }
 0x34b   :  { %5995 = vsyncadd [#allocation13], 4294965120 }
 0x34c   :  { %4862 = vsyncpa [#allocation3], 1 }
 0x34d   :  { %4863 = vsyncpa [#allocation6], 1 }
 0x34e   :  { %4864 = vsyncpa [#allocation9], 1 }
 0x34f   :  { %4865 = vsyncpa [#allocation4], 1 }
 0x350   :  { %4866 = vsyncpa [#allocation13], 1 }

</bundles_post_ra>
